<compile_context>
chip_gen: v7x
topology: tpu7x:2x2x1
jax: 0.10.0
libtpu: 0.0.40
codegen_flags: <defaults>
</compile_context>

<pallas_src>
import functools
import numpy as np

import jax
import jax.numpy as jnp
from jax.experimental import pallas as pl
from jax.experimental.pallas import tpu as pltpu


VMEM_LIMIT = 32 * 1024 * 1024   # >= v5e's 16 MiB default scoped VMEM, safe on v6e/v7x


# ----------------------------------------------------------------------------
# In-kernel helpers
# ----------------------------------------------------------------------------
def _accumulate_taps(acc, pad_ref, w_ref, D, H):
    """Accumulate the 9 (kd, kh) taps.

    pad_ref : VMEM (D+2, H+2, K) zero-padded folded slab
    w_ref   : (3, 3, K, Nout) boundary-clipped block-Toeplitz weights
    Each tap is one MXU matmul with LHS (D*H, K) (lane-dense, M=128 at demo shapes).
    """
    K = pad_ref.shape[-1]
    for kd in range(3):
        for kh in range(3):
            lhs = pad_ref[kd:kd + D, kh:kh + H, :].reshape(D * H, K)
            acc = acc + jnp.dot(lhs, w_ref[kd, kh],
                                preferred_element_type=jnp.float32)
    return acc


def _emit_out_and_stats(acc, b_ref, o_ref, s_ref, D, H):
    """Add bias, store folded conv output and per-lane BN partial statistics."""
    acc = acc + b_ref[...]                                   # (1, Nout) broadcast
    o_ref[0] = acc.reshape(D, H, acc.shape[-1])
    s_ref[0, 0:1, :] = jnp.sum(acc, axis=0, keepdims=True)
    s_ref[0, 1:2, :] = jnp.sum(acc * acc, axis=0, keepdims=True)


# ----------------------------------------------------------------------------
# Pallas kernels
# ----------------------------------------------------------------------------
def _conv1_concat_kernel(xa_ref, xb_ref, wa_ref, wb_ref, b_ref,
                         o_ref, s_ref, pa_ref, pb_ref, *, D, H):
    """First 3x3x3 conv with the skip-concat fused (two Cin halves), one n per step.

    xa_ref / xb_ref : (1, D, H, W*Ca) / (1, D, H, W*Cb)  folded x2 / upsampled x1
    wa_ref / wb_ref : (3, 3, W*C_, W*C1)                 boundary-clipped Toeplitz
    b_ref           : (1, W*C1)
    o_ref           : (1, D, H, W*C1)                    conv1 output (folded)
    s_ref           : (1, 2, W*C1)                       [sum, sum_sq] BN partials
    pa_ref / pb_ref : VMEM (D+2, H+2, W*C_)              zero-padded scratch slabs
    """
    # Build the D/H zero-padded slabs in VMEM (no padded HBM duplicate of the input).
    pa_ref[...] = jnp.zeros_like(pa_ref)
    pb_ref[...] = jnp.zeros_like(pb_ref)
    pa_ref[1:D + 1, 1:H + 1, :] = xa_ref[0]
    pb_ref[1:D + 1, 1:H + 1, :] = xb_ref[0]

    acc = jnp.zeros((D * H, o_ref.shape[-1]), jnp.float32)
    acc = _accumulate_taps(acc, pa_ref, wa_ref, D, H)        # x2 half of Cin
    acc = _accumulate_taps(acc, pb_ref, wb_ref, D, H)        # x1 half of Cin
    _emit_out_and_stats(acc, b_ref, o_ref, s_ref, D, H)


def _conv2_bnrelu_kernel(y_ref, sc_ref, sh_ref, w_ref, b_ref,
                         o_ref, s_ref, pad_ref, *, D, H):
    """BN1 affine + ReLU + zero-pad (in VMEM) + second 3x3x3 conv, one n per step.

    y_ref   : (1, D, H, W*C1)   conv1 output (folded, f32)
    sc_ref  : (1, W*C1)         BN1 scale, W-tiled
    sh_ref  : (1, W*C1)         BN1 shift, W-tiled
    w_ref   : (3, 3, W*C1, W*C2)
    o_ref   : (1, D, H, W*C2)
    s_ref   : (1, 2, W*C2)
    pad_ref : VMEM (D+2, H+2, W*C1)
    """
    pad_ref[...] = jnp.zeros_like(pad_ref)
    pad_ref[1:D + 1, 1:H + 1, :] = jnp.maximum(
        y_ref[0] * sc_ref[...] + sh_ref[...], 0.0)

    acc = jnp.zeros((D * H, o_ref.shape[-1]), jnp.float32)
    acc = _accumulate_taps(acc, pad_ref, w_ref, D, H)
    _emit_out_and_stats(acc, b_ref, o_ref, s_ref, D, H)


def _bn_relu_flat_kernel(x_ref, sc_ref, sh_ref, o_ref):
    """Final BatchNorm affine + ReLU on lane-dense 2D row blocks."""
    o_ref[...] = jnp.maximum(
        x_ref[...] * sc_ref[...] + sh_ref[...], 0.0).astype(o_ref.dtype)


# ----------------------------------------------------------------------------
# Pallas wrappers
# ----------------------------------------------------------------------------
def conv1_pallas(xa, xb, wa, wb, brow):
    """xa/xb: folded (N, D, H, W*Ca) / (N, D, H, W*Cb); returns (y1, stats1)."""
    N, D, H, Ka = xa.shape
    Kb = xb.shape[-1]
    Nout = wa.shape[-1]
    kernel = functools.partial(_conv1_concat_kernel, D=D, H=H)
    return pl.pallas_call(
        kernel,
        out_shape=(jax.ShapeDtypeStruct((N, D, H, Nout), jnp.float32),
                   jax.ShapeDtypeStruct((N, 2, Nout), jnp.float32)),
        grid_spec=pltpu.PrefetchScalarGridSpec(
            num_scalar_prefetch=0,
            grid=(N,),                                   # extent 2 -> both v7x TCs
            in_specs=[
                pl.BlockSpec((1, D, H, Ka), lambda n: (n, 0, 0, 0)),
                pl.BlockSpec((1, D, H, Kb), lambda n: (n, 0, 0, 0)),
                pl.BlockSpec((3, 3, Ka, Nout), lambda n: (0, 0, 0, 0)),
                pl.BlockSpec((3, 3, Kb, Nout), lambda n: (0, 0, 0, 0)),
                pl.BlockSpec((1, Nout), lambda n: (0, 0)),
            ],
            out_specs=(
                pl.BlockSpec((1, D, H, Nout), lambda n: (n, 0, 0, 0)),
                pl.BlockSpec((1, 2, Nout), lambda n: (n, 0, 0)),
            ),
            scratch_shapes=[pltpu.VMEM((D + 2, H + 2, Ka), jnp.float32),
                            pltpu.VMEM((D + 2, H + 2, Kb), jnp.float32)],
        ),
        compiler_params=pltpu.CompilerParams(
            dimension_semantics=("parallel",),
            vmem_limit_bytes=VMEM_LIMIT),
    )(xa, xb, wa, wb, brow)


def conv2_pallas(y1, sc_row, sh_row, w2, brow):
    """y1: (N, D, H, W*C1). BN1+ReLU+pad fused in-kernel. Returns (y2, stats2)."""
    N, D, H, K = y1.shape
    Nout = w2.shape[-1]
    kernel = functools.partial(_conv2_bnrelu_kernel, D=D, H=H)
    return pl.pallas_call(
        kernel,
        out_shape=(jax.ShapeDtypeStruct((N, D, H, Nout), jnp.float32),
                   jax.ShapeDtypeStruct((N, 2, Nout), jnp.float32)),
        grid_spec=pltpu.PrefetchScalarGridSpec(
            num_scalar_prefetch=0,
            grid=(N,),
            in_specs=[
                pl.BlockSpec((1, D, H, K), lambda n: (n, 0, 0, 0)),
                pl.BlockSpec((1, K), lambda n: (0, 0)),
                pl.BlockSpec((1, K), lambda n: (0, 0)),
                pl.BlockSpec((3, 3, K, Nout), lambda n: (0, 0, 0, 0)),
                pl.BlockSpec((1, Nout), lambda n: (0, 0)),
            ],
            out_specs=(
                pl.BlockSpec((1, D, H, Nout), lambda n: (n, 0, 0, 0)),
                pl.BlockSpec((1, 2, Nout), lambda n: (n, 0, 0)),
            ),
            scratch_shapes=[pltpu.VMEM((D + 2, H + 2, K), jnp.float32)],
        ),
        compiler_params=pltpu.CompilerParams(
            dimension_semantics=("parallel",),
            vmem_limit_bytes=VMEM_LIMIT),
    )(y1, sc_row, sh_row, w2, brow)


def bn_relu_flat_pallas(y2d, scale_row, shift_row):
    """Final BN affine + ReLU on a lane-dense (rows, cols) view (cols % 128 == 0)."""
    rows, cols = y2d.shape
    # Keep a parallel grid axis of extent >= 2 when possible (v7x has 2 TensorCores).
    rb = rows // 2 if (rows % 2 == 0 and (rows // 2) % 8 == 0) else rows
    return pl.pallas_call(
        _bn_relu_flat_kernel,
        out_shape=jax.ShapeDtypeStruct((rows, cols), jnp.float32),
        grid_spec=pltpu.PrefetchScalarGridSpec(
            num_scalar_prefetch=0,
            grid=(rows // rb,),
            in_specs=[
                pl.BlockSpec((rb, cols), lambda r: (r, 0)),
                pl.BlockSpec((1, cols), lambda r: (0, 0)),
                pl.BlockSpec((1, cols), lambda r: (0, 0)),
            ],
            out_specs=pl.BlockSpec((rb, cols), lambda r: (r, 0)),
        ),
        compiler_params=pltpu.CompilerParams(
            dimension_semantics=("parallel",),
            vmem_limit_bytes=VMEM_LIMIT),
    )(y2d, scale_row, shift_row)


# ----------------------------------------------------------------------------
# Host-side helpers (weight folding, BN finalize, layout transforms)
# ----------------------------------------------------------------------------
def build_banded_weights(w, W):
    """(3,3,3,Cin,Cout) -> boundary-clipped block-Toeplitz (3, 3, W*Cin, W*Cout).

    The kw tap and the W axis are folded into the matmul K/N dims; out-of-range
    boundary taps are left as zeros, so the activations need no W padding and
    K = W*Cin is a lane-aligned multiple of Cin*W."""
    _, _, _, Cin, Cout = w.shape
    wb = jnp.zeros((3, 3, W, Cin, W, Cout), w.dtype)
    for kw in range(3):
        for wo in range(W):
            wi = wo + kw - 1
            if 0 <= wi < W:
                wb = wb.at[:, :, wi, :, wo, :].set(w[:, :, kw, :, :])
    return wb.reshape(3, 3, W * Cin, W * Cout)


def batchnorm_scale_shift(stats, gamma, beta, *, count, eps=1e-5):
    """Training-mode (batch, biased-var) BN scale/shift from conv-kernel partials.

    stats: (N, 2, L) per-lane [sum, sum_sq]; lane layout has channel as the minor axis
    (lane % C == channel), so a (2, L//C, C) reshape folds the W positions away.
    NOTE: E[x^2]-E[x]^2 is cancellation-prone at large counts; fine at these sizes."""
    C = gamma.shape[0]
    s = jnp.sum(stats, axis=0).reshape(2, -1, C).sum(axis=1)   # (2, C)
    mean = s[0] / count
    var = jnp.maximum(s[1] / count - mean * mean, 0.0)
    scale = gamma * jax.lax.rsqrt(var + eps)
    shift = beta - mean * scale
    return scale, shift


def fold_channels_last(x_ncdhw):
    """(N, C, D, H, W) -> folded channels-last (N, D, H, W*C): lane dim = W*C."""
    N, C, D, H, W = x_ncdhw.shape
    return jnp.transpose(x_ncdhw, (0, 2, 3, 4, 1)).reshape(N, D, H, W * C)


# ----------------------------------------------------------------------------
# XLA glue: trilinear upsample (align_corners=True) and the module's F.pad mapping.
# TODO(synk): the separable upsample (3 small gather/lerp passes on the pre-upsample
# tensor) and the final folded->NCDHW transpose remain XLA glue; they could be folded
# into the conv1 input DMA / bn_relu_flat out_spec if profiling demands.
# ----------------------------------------------------------------------------
def _linear_upsample_axis(x, axis, out_size):
    in_size = x.shape[axis]
    if out_size == in_size:
        return x
    if in_size == 1:
        reps = [1] * x.ndim
        reps[axis] = out_size
        return jnp.tile(x, reps)
    pos = jnp.arange(out_size, dtype=jnp.float32) * (in_size - 1) / (out_size - 1)
    lo = jnp.clip(jnp.floor(pos).astype(jnp.int32), 0, in_size - 2)
    frac = pos - lo.astype(jnp.float32)
    xlo = jnp.take(x, lo, axis=axis)
    xhi = jnp.take(x, lo + 1, axis=axis)
    shape = [1] * x.ndim
    shape[axis] = out_size
    frac = frac.reshape(shape)
    return xlo * (1.0 - frac) + xhi * frac


def trilinear_upsample_2x(x_ncdhw):
    # nn.Upsample(scale_factor=2, mode='trilinear', align_corners=True)
    N, C, D, H, W = x_ncdhw.shape
    y = _linear_upsample_axis(x_ncdhw, 2, 2 * D)
    y = _linear_upsample_axis(y, 3, 2 * H)
    y = _linear_upsample_axis(y, 4, 2 * W)
    return y


def _pad_x1_like_module(x1u, x2):
    # exact reproduction of the module's F.pad axis mapping:
    #   diffY = D-diff, diffX = H-diff, diffZ = W-diff
    #   pad list applies: W <- diffX, H <- diffY, D <- diffZ
    diffY = x2.shape[2] - x1u.shape[2]
    diffX = x2.shape[3] - x1u.shape[3]
    diffZ = x2.shape[4] - x1u.shape[4]
    return jnp.pad(x1u, ((0, 0), (0, 0),
                         (diffZ // 2, diffZ - diffZ // 2),
                         (diffY // 2, diffY - diffY // 2),
                         (diffX // 2, diffX - diffX // 2)))


# ----------------------------------------------------------------------------
# Up.forward — Pallas path
# ----------------------------------------------------------------------------
def up_forward(x1, x2, p):
    x1u = _pad_x1_like_module(trilinear_upsample_2x(x1), x2)   # (N, Cb, D, H, W)

    N, Ca, D, H, W = x2.shape
    Cb = x1u.shape[1]
    C1 = p["w1"].shape[-1]
    C2 = p["w2"].shape[-1]
    count = N * D * H * W

    # Fold both concat halves to lane-dense channels-last; the concat itself is fused
    # into conv1, so the (N, Ca+Cb, D, H, W) tensor is never written to HBM.
    x2f = fold_channels_last(x2)                               # (N, D, H, W*Ca)
    x1f = fold_channels_last(x1u)                              # (N, D, H, W*Cb)

    # conv1 (+ BN1 partial stats), skip-concat fused via the two weight halves.
    wa = build_banded_weights(p["w1"][:, :, :, :Ca, :], W)     # x2 half of Cin
    wb = build_banded_weights(p["w1"][:, :, :, Ca:, :], W)     # x1 half of Cin
    b1row = jnp.tile(p["b1"], W).reshape(1, W * C1)
    y1, st1 = conv1_pallas(x2f, x1f, wa, wb, b1row)
    sc1, sh1 = batchnorm_scale_shift(st1, p["g1"], p["be1"], count=count)

    # conv2 (+ BN2 partial stats); BN1 affine + ReLU + zero-pad fused into its input.
    w2t = build_banded_weights(p["w2"], W)
    b2row = jnp.tile(p["b2"], W).reshape(1, W * C2)
    sc1row = jnp.tile(sc1, W).reshape(1, W * C1)
    sh1row = jnp.tile(sh1, W).reshape(1, W * C1)
    y2, st2 = conv2_pallas(y1, sc1row, sh1row, w2t, b2row)
    sc2, sh2 = batchnorm_scale_shift(st2, p["g2"], p["be2"], count=count)

    # Final BN2 + ReLU as a lane-dense flat pass, then unfold back to NCDHW.
    y2flat = y2.reshape(N * D, H * W * C2)
    sc2row = jnp.tile(sc2, H * W).reshape(1, H * W * C2)
    sh2row = jnp.tile(sh2, H * W).reshape(1, H * W * C2)
    a2 = bn_relu_flat_pallas(y2flat, sc2row, sh2row)
    return a2.reshape(N, D, H, W, C2).transpose(0, 4, 1, 2, 3)  # back to NCDHW


# ----------------------------------------------------------------------------
# Pure-JAX reference (same default MXU precision class as the kernels).
# ----------------------------------------------------------------------------
def _conv3d_ref(x_ncdhw, w_kkkio, b):
    w = jnp.transpose(w_kkkio, (4, 3, 0, 1, 2))                # OIDHW
    y = jax.lax.conv_general_dilated(
        x_ncdhw, w, window_strides=(1, 1, 1),
        padding=((1, 1), (1, 1), (1, 1)),
        dimension_numbers=("NCDHW", "OIDHW", "NCDHW"),
        precision=jax.lax.Precision.DEFAULT)
    return y + b[None, :, None, None, None]


def _bn_relu_ref(x, gamma, beta, eps=1e-5):
    mean = jnp.mean(x, axis=(0, 2, 3, 4), keepdims=True)
    var = jnp.mean((x - mean) ** 2, axis=(0, 2, 3, 4), keepdims=True)
    xn = (x - mean) * jax.lax.rsqrt(var + eps)
    return jnp.maximum(xn * gamma[None, :, None, None, None]
                       + beta[None, :, None, None, None], 0.0)


def _pad_and_concat_ref(x1u, x2):
    x1u = _pad_x1_like_module(x1u, x2)
    return jnp.concatenate([x2, x1u], axis=1)


def up_forward_ref(x1, x2, p):
    x1u = trilinear_upsample_2x(x1)
    x = _pad_and_concat_ref(x1u, x2)
    h = _bn_relu_ref(_conv3d_ref(x, p["w1"], p["b1"]), p["g1"], p["be1"])
    h = _bn_relu_ref(_conv3d_ref(h, p["w2"], p["b2"]), p["g2"], p["be2"])
    return h


# ----------------------------------------------------------------------------
# Deterministic parameter init (matches module __init__ shapes)
# ----------------------------------------------------------------------------
def init_params(key, cin, c1, c2):
    ks = jax.random.split(key, 4)

    def u(k, shape, fan_in):
        bound = 1.0 / (fan_in ** 0.5)
        return jax.random.uniform(k, shape, jnp.float32, -bound, bound)

    return dict(
        w1=u(ks[0], (3, 3, 3, cin, c1), cin * 27),
        b1=u(ks[1], (c1,), cin * 27),
        g1=jnp.ones((c1,), jnp.float32),
        be1=jnp.zeros((c1,), jnp.float32),
        w2=u(ks[2], (3, 3, 3, c1, c2), c1 * 27),
        b2=u(ks[3], (c2,), c1 * 27),
        g2=jnp.ones((c2,), jnp.float32),
        be2=jnp.zeros((c2,), jnp.float32),
    )


if __name__ == "__main__":
    key = jax.random.PRNGKey(0)
    k1, k2, kp = jax.random.split(key, 3)

    # x1: deep feature (to be upsampled), x2: skip connection (NCDHW)
    N, C1x, D1, H1, W1 = 2, 4, 4, 8, 8
    C2x = 4
    x1 = jax.random.normal(k1, (N, C1x, D1, H1, W1), jnp.float32)
    x2 = jax.random.normal(k2, (N, C2x, 2 * D1, 2 * H1, 2 * W1), jnp.float32)

    in_channels = C1x + C2x          # channels after (fused) concat = 8
    out_channels1, out_channels2 = 8, 4
    params = init_params(kp, in_channels, out_channels1, out_channels2)

    out = jax.jit(up_forward)(x1, x2, params)
    out = jax.block_until_ready(out)

    ref = up_forward_ref(x1, x2, params)
    # Tolerance sized for default (single-pass bf16-input) MXU precision through two
    # conv + normalizing-BN stages; both paths use the same precision class.
    np.testing.assert_allclose(np.asarray(out), np.asarray(ref),
                               rtol=1e-2, atol=5e-3)
    assert out.shape == (N, out_channels2, 2 * D1, 2 * H1, 2 * W1)
    print("KERNEL_OK")
</pallas_src>

<mosaic_0001>
module attributes {stable_mosaic.version = 11 : i64} {
  func.func @_conv1_concat_kernel(%arg0: i32, %arg1: memref<1x8x16x64xf32, #tpu.memory_space<vmem>>, %arg2: memref<1x8x16x64xf32, #tpu.memory_space<vmem>>, %arg3: memref<3x3x64x128xf32, #tpu.memory_space<vmem>>, %arg4: memref<3x3x64x128xf32, #tpu.memory_space<vmem>>, %arg5: memref<1x128xf32, #tpu.memory_space<vmem>>, %arg6: memref<1x8x16x128xf32, #tpu.memory_space<vmem>>, %arg7: memref<1x2x128xf32, #tpu.memory_space<vmem>>, %arg8: memref<10x18x64xf32, #tpu.memory_space<vmem>>, %arg9: memref<10x18x64xf32, #tpu.memory_space<vmem>>) attributes {dimension_semantics = [#tpu.dimension_semantics<parallel>], iteration_bounds = array<i64: 2>, scalar_prefetch = 0 : i64, scratch_operands = 2 : i64, tpu.core_type = #tpu.core_type<tc>, window_params = [{transform_indices = @transform_0, window_bounds = array<i64: 1, 8, 16, 64>}, {transform_indices = @transform_1, window_bounds = array<i64: 1, 8, 16, 64>}, {pipeline_mode = #tpu.pipeline_mode<synchronous>, transform_indices = @transform_2, window_bounds = array<i64: 3, 3, 64, 128>}, {pipeline_mode = #tpu.pipeline_mode<synchronous>, transform_indices = @transform_3, window_bounds = array<i64: 3, 3, 64, 128>}, {pipeline_mode = #tpu.pipeline_mode<synchronous>, transform_indices = @transform_4, window_bounds = array<i64: 1, 128>}, {transform_indices = @transform_5, window_bounds = array<i64: 1, 8, 16, 128>}, {transform_indices = @transform_6, window_bounds = array<i64: 1, 2, 128>}]} {
    %cst = arith.constant 0.000000e+00 : f32
    %0 = vector.broadcast %cst : f32 to vector<10x18x64xf32>
    %c0 = arith.constant 0 : index
    %c0_0 = arith.constant 0 : index
    %c0_1 = arith.constant 0 : index
    %1 = vector.load %arg8[%c0, %c0_0, %c0_1] : memref<10x18x64xf32, #tpu.memory_space<vmem>>, vector<10x18x64xf32>
    tpu.vector_store %arg8[%c0, %c0_0, %c0_1], %0 {strides = array<i32>} : memref<10x18x64xf32, #tpu.memory_space<vmem>>, vector<10x18x64xf32>,
    %cst_2 = arith.constant 0.000000e+00 : f32
    %2 = vector.broadcast %cst_2 : f32 to vector<10x18x64xf32>
    %c0_3 = arith.constant 0 : index
    %c0_4 = arith.constant 0 : index
    %c0_5 = arith.constant 0 : index
    %3 = vector.load %arg9[%c0_3, %c0_4, %c0_5] : memref<10x18x64xf32, #tpu.memory_space<vmem>>, vector<10x18x64xf32>
    tpu.vector_store %arg9[%c0_3, %c0_4, %c0_5], %2 {strides = array<i32>} : memref<10x18x64xf32, #tpu.memory_space<vmem>>, vector<10x18x64xf32>,
    %c0_6 = arith.constant 0 : index
    %c0_7 = arith.constant 0 : index
    %c0_8 = arith.constant 0 : index
    %c0_9 = arith.constant 0 : index
    %4 = vector.load %arg1[%c0_6, %c0_7, %c0_8, %c0_9] : memref<1x8x16x64xf32, #tpu.memory_space<vmem>>, vector<1x8x16x64xf32>
    %5 = vector.shape_cast %4 : vector<1x8x16x64xf32> to vector<8x16x64xf32>
    %c1 = arith.constant 1 : index
    %c1_10 = arith.constant 1 : index
    %c0_11 = arith.constant 0 : index
    %6 = vector.load %arg8[%c1, %c1_10, %c0_11] : memref<10x18x64xf32, #tpu.memory_space<vmem>>, vector<8x16x64xf32>
    tpu.vector_store %arg8[%c1, %c1_10, %c0_11], %5 {strides = array<i32>} : memref<10x18x64xf32, #tpu.memory_space<vmem>>, vector<8x16x64xf32>,
    %c0_12 = arith.constant 0 : index
    %c0_13 = arith.constant 0 : index
    %c0_14 = arith.constant 0 : index
    %c0_15 = arith.constant 0 : index
    %7 = vector.load %arg2[%c0_12, %c0_13, %c0_14, %c0_15] : memref<1x8x16x64xf32, #tpu.memory_space<vmem>>, vector<1x8x16x64xf32>
    %8 = vector.shape_cast %7 : vector<1x8x16x64xf32> to vector<8x16x64xf32>
    %c1_16 = arith.constant 1 : index
    %c1_17 = arith.constant 1 : index
    %c0_18 = arith.constant 0 : index
    %9 = vector.load %arg9[%c1_16, %c1_17, %c0_18] : memref<10x18x64xf32, #tpu.memory_space<vmem>>, vector<8x16x64xf32>
    tpu.vector_store %arg9[%c1_16, %c1_17, %c0_18], %8 {strides = array<i32>} : memref<10x18x64xf32, #tpu.memory_space<vmem>>, vector<8x16x64xf32>,
    %cst_19 = arith.constant 0.000000e+00 : f32
    %10 = vector.broadcast %cst_19 : f32 to vector<128x128xf32>
    %c0_20 = arith.constant 0 : index
    %c0_21 = arith.constant 0 : index
    %c0_22 = arith.constant 0 : index
    %11 = vector.load %arg8[%c0_20, %c0_21, %c0_22] : memref<10x18x64xf32, #tpu.memory_space<vmem>>, vector<8x16x64xf32>
    %12 = vector.shape_cast %11 : vector<8x16x64xf32> to vector<128x64xf32>
    %c0_23 = arith.constant 0 : index
    %c0_24 = arith.constant 0 : index
    %c0_25 = arith.constant 0 : index
    %c0_26 = arith.constant 0 : index
    %13 = vector.load %arg3[%c0_23, %c0_24, %c0_25, %c0_26] : memref<3x3x64x128xf32, #tpu.memory_space<vmem>>, vector<1x1x64x128xf32>
    %14 = vector.shape_cast %13 : vector<1x1x64x128xf32> to vector<64x128xf32>
    %cst_27 = arith.constant dense<0.000000e+00> : vector<128x128xf32>
    %15 = tpu.matmul %12, %14, %cst_27 {dimension_numbers = #tpu.dot_dimension_numbers<[1], [0], [0], [1], [0, 0, 1, 1], [], []>} : vector<128x64xf32>, vector<64x128xf32>, vector<128x128xf32> -> vector<128x128xf32>
    %16 = arith.addf %10, %15 : vector<128x128xf32>
    %c0_28 = arith.constant 0 : index
    %c1_29 = arith.constant 1 : index
    %c0_30 = arith.constant 0 : index
    %17 = vector.load %arg8[%c0_28, %c1_29, %c0_30] : memref<10x18x64xf32, #tpu.memory_space<vmem>>, vector<8x16x64xf32>
    %18 = vector.shape_cast %17 : vector<8x16x64xf32> to vector<128x64xf32>
    %c0_31 = arith.constant 0 : index
    %c1_32 = arith.constant 1 : index
    %c0_33 = arith.constant 0 : index
    %c0_34 = arith.constant 0 : index
    %19 = vector.load %arg3[%c0_31, %c1_32, %c0_33, %c0_34] : memref<3x3x64x128xf32, #tpu.memory_space<vmem>>, vector<1x1x64x128xf32>
    %20 = vector.shape_cast %19 : vector<1x1x64x128xf32> to vector<64x128xf32>
    %cst_35 = arith.constant dense<0.000000e+00> : vector<128x128xf32>
    %21 = tpu.matmul %18, %20, %cst_35 {dimension_numbers = #tpu.dot_dimension_numbers<[1], [0], [0], [1], [0, 0, 1, 1], [], []>} : vector<128x64xf32>, vector<64x128xf32>, vector<128x128xf32> -> vector<128x128xf32>
    %22 = arith.addf %16, %21 : vector<128x128xf32>
    %c0_36 = arith.constant 0 : index
    %c2 = arith.constant 2 : index
    %c0_37 = arith.constant 0 : index
    %23 = vector.load %arg8[%c0_36, %c2, %c0_37] : memref<10x18x64xf32, #tpu.memory_space<vmem>>, vector<8x16x64xf32>
    %24 = vector.shape_cast %23 : vector<8x16x64xf32> to vector<128x64xf32>
    %c0_38 = arith.constant 0 : index
    %c2_39 = arith.constant 2 : index
    %c0_40 = arith.constant 0 : index
    %c0_41 = arith.constant 0 : index
    %25 = vector.load %arg3[%c0_38, %c2_39, %c0_40, %c0_41] : memref<3x3x64x128xf32, #tpu.memory_space<vmem>>, vector<1x1x64x128xf32>
    %26 = vector.shape_cast %25 : vector<1x1x64x128xf32> to vector<64x128xf32>
    %cst_42 = arith.constant dense<0.000000e+00> : vector<128x128xf32>
    %27 = tpu.matmul %24, %26, %cst_42 {dimension_numbers = #tpu.dot_dimension_numbers<[1], [0], [0], [1], [0, 0, 1, 1], [], []>} : vector<128x64xf32>, vector<64x128xf32>, vector<128x128xf32> -> vector<128x128xf32>
    %28 = arith.addf %22, %27 : vector<128x128xf32>
    %c1_43 = arith.constant 1 : index
    %c0_44 = arith.constant 0 : index
    %c0_45 = arith.constant 0 : index
    %29 = vector.load %arg8[%c1_43, %c0_44, %c0_45] : memref<10x18x64xf32, #tpu.memory_space<vmem>>, vector<8x16x64xf32>
    %30 = vector.shape_cast %29 : vector<8x16x64xf32> to vector<128x64xf32>
    %c1_46 = arith.constant 1 : index
    %c0_47 = arith.constant 0 : index
    %c0_48 = arith.constant 0 : index
    %c0_49 = arith.constant 0 : index
    %31 = vector.load %arg3[%c1_46, %c0_47, %c0_48, %c0_49] : memref<3x3x64x128xf32, #tpu.memory_space<vmem>>, vector<1x1x64x128xf32>
    %32 = vector.shape_cast %31 : vector<1x1x64x128xf32> to vector<64x128xf32>
    %cst_50 = arith.constant dense<0.000000e+00> : vector<128x128xf32>
    %33 = tpu.matmul %30, %32, %cst_50 {dimension_numbers = #tpu.dot_dimension_numbers<[1], [0], [0], [1], [0, 0, 1, 1], [], []>} : vector<128x64xf32>, vector<64x128xf32>, vector<128x128xf32> -> vector<128x128xf32>
    %34 = arith.addf %28, %33 : vector<128x128xf32>
    %c1_51 = arith.constant 1 : index
    %c1_52 = arith.constant 1 : index
    %c0_53 = arith.constant 0 : index
    %35 = vector.load %arg8[%c1_51, %c1_52, %c0_53] : memref<10x18x64xf32, #tpu.memory_space<vmem>>, vector<8x16x64xf32>
    %36 = vector.shape_cast %35 : vector<8x16x64xf32> to vector<128x64xf32>
    %c1_54 = arith.constant 1 : index
    %c1_55 = arith.constant 1 : index
    %c0_56 = arith.constant 0 : index
    %c0_57 = arith.constant 0 : index
    %37 = vector.load %arg3[%c1_54, %c1_55, %c0_56, %c0_57] : memref<3x3x64x128xf32, #tpu.memory_space<vmem>>, vector<1x1x64x128xf32>
    %38 = vector.shape_cast %37 : vector<1x1x64x128xf32> to vector<64x128xf32>
    %cst_58 = arith.constant dense<0.000000e+00> : vector<128x128xf32>
    %39 = tpu.matmul %36, %38, %cst_58 {dimension_numbers = #tpu.dot_dimension_numbers<[1], [0], [0], [1], [0, 0, 1, 1], [], []>} : vector<128x64xf32>, vector<64x128xf32>, vector<128x128xf32> -> vector<128x128xf32>
    %40 = arith.addf %34, %39 : vector<128x128xf32>
    %c1_59 = arith.constant 1 : index
    %c2_60 = arith.constant 2 : index
    %c0_61 = arith.constant 0 : index
    %41 = vector.load %arg8[%c1_59, %c2_60, %c0_61] : memref<10x18x64xf32, #tpu.memory_space<vmem>>, vector<8x16x64xf32>
    %42 = vector.shape_cast %41 : vector<8x16x64xf32> to vector<128x64xf32>
    %c1_62 = arith.constant 1 : index
    %c2_63 = arith.constant 2 : index
    %c0_64 = arith.constant 0 : index
    %c0_65 = arith.constant 0 : index
    %43 = vector.load %arg3[%c1_62, %c2_63, %c0_64, %c0_65] : memref<3x3x64x128xf32, #tpu.memory_space<vmem>>, vector<1x1x64x128xf32>
    %44 = vector.shape_cast %43 : vector<1x1x64x128xf32> to vector<64x128xf32>
    %cst_66 = arith.constant dense<0.000000e+00> : vector<128x128xf32>
    %45 = tpu.matmul %42, %44, %cst_66 {dimension_numbers = #tpu.dot_dimension_numbers<[1], [0], [0], [1], [0, 0, 1, 1], [], []>} : vector<128x64xf32>, vector<64x128xf32>, vector<128x128xf32> -> vector<128x128xf32>
    %46 = arith.addf %40, %45 : vector<128x128xf32>
    %c2_67 = arith.constant 2 : index
    %c0_68 = arith.constant 0 : index
    %c0_69 = arith.constant 0 : index
    %47 = vector.load %arg8[%c2_67, %c0_68, %c0_69] : memref<10x18x64xf32, #tpu.memory_space<vmem>>, vector<8x16x64xf32>
    %48 = vector.shape_cast %47 : vector<8x16x64xf32> to vector<128x64xf32>
    %c2_70 = arith.constant 2 : index
    %c0_71 = arith.constant 0 : index
    %c0_72 = arith.constant 0 : index
    %c0_73 = arith.constant 0 : index
    %49 = vector.load %arg3[%c2_70, %c0_71, %c0_72, %c0_73] : memref<3x3x64x128xf32, #tpu.memory_space<vmem>>, vector<1x1x64x128xf32>
    %50 = vector.shape_cast %49 : vector<1x1x64x128xf32> to vector<64x128xf32>
    %cst_74 = arith.constant dense<0.000000e+00> : vector<128x128xf32>
    %51 = tpu.matmul %48, %50, %cst_74 {dimension_numbers = #tpu.dot_dimension_numbers<[1], [0], [0], [1], [0, 0, 1, 1], [], []>} : vector<128x64xf32>, vector<64x128xf32>, vector<128x128xf32> -> vector<128x128xf32>
    %52 = arith.addf %46, %51 : vector<128x128xf32>
    %c2_75 = arith.constant 2 : index
    %c1_76 = arith.constant 1 : index
    %c0_77 = arith.constant 0 : index
    %53 = vector.load %arg8[%c2_75, %c1_76, %c0_77] : memref<10x18x64xf32, #tpu.memory_space<vmem>>, vector<8x16x64xf32>
    %54 = vector.shape_cast %53 : vector<8x16x64xf32> to vector<128x64xf32>
    %c2_78 = arith.constant 2 : index
    %c1_79 = arith.constant 1 : index
    %c0_80 = arith.constant 0 : index
    %c0_81 = arith.constant 0 : index
    %55 = vector.load %arg3[%c2_78, %c1_79, %c0_80, %c0_81] : memref<3x3x64x128xf32, #tpu.memory_space<vmem>>, vector<1x1x64x128xf32>
    %56 = vector.shape_cast %55 : vector<1x1x64x128xf32> to vector<64x128xf32>
    %cst_82 = arith.constant dense<0.000000e+00> : vector<128x128xf32>
    %57 = tpu.matmul %54, %56, %cst_82 {dimension_numbers = #tpu.dot_dimension_numbers<[1], [0], [0], [1], [0, 0, 1, 1], [], []>} : vector<128x64xf32>, vector<64x128xf32>, vector<128x128xf32> -> vector<128x128xf32>
    %58 = arith.addf %52, %57 : vector<128x128xf32>
    %c2_83 = arith.constant 2 : index
    %c2_84 = arith.constant 2 : index
    %c0_85 = arith.constant 0 : index
    %59 = vector.load %arg8[%c2_83, %c2_84, %c0_85] : memref<10x18x64xf32, #tpu.memory_space<vmem>>, vector<8x16x64xf32>
    %60 = vector.shape_cast %59 : vector<8x16x64xf32> to vector<128x64xf32>
    %c2_86 = arith.constant 2 : index
    %c2_87 = arith.constant 2 : index
    %c0_88 = arith.constant 0 : index
    %c0_89 = arith.constant 0 : index
    %61 = vector.load %arg3[%c2_86, %c2_87, %c0_88, %c0_89] : memref<3x3x64x128xf32, #tpu.memory_space<vmem>>, vector<1x1x64x128xf32>
    %62 = vector.shape_cast %61 : vector<1x1x64x128xf32> to vector<64x128xf32>
    %cst_90 = arith.constant dense<0.000000e+00> : vector<128x128xf32>
    %63 = tpu.matmul %60, %62, %cst_90 {dimension_numbers = #tpu.dot_dimension_numbers<[1], [0], [0], [1], [0, 0, 1, 1], [], []>} : vector<128x64xf32>, vector<64x128xf32>, vector<128x128xf32> -> vector<128x128xf32>
    %64 = arith.addf %58, %63 : vector<128x128xf32>
    %c0_91 = arith.constant 0 : index
    %c0_92 = arith.constant 0 : index
    %c0_93 = arith.constant 0 : index
    %65 = vector.load %arg9[%c0_91, %c0_92, %c0_93] : memref<10x18x64xf32, #tpu.memory_space<vmem>>, vector<8x16x64xf32>
    %66 = vector.shape_cast %65 : vector<8x16x64xf32> to vector<128x64xf32>
    %c0_94 = arith.constant 0 : index
    %c0_95 = arith.constant 0 : index
    %c0_96 = arith.constant 0 : index
    %c0_97 = arith.constant 0 : index
    %67 = vector.load %arg4[%c0_94, %c0_95, %c0_96, %c0_97] : memref<3x3x64x128xf32, #tpu.memory_space<vmem>>, vector<1x1x64x128xf32>
    %68 = vector.shape_cast %67 : vector<1x1x64x128xf32> to vector<64x128xf32>
    %cst_98 = arith.constant dense<0.000000e+00> : vector<128x128xf32>
    %69 = tpu.matmul %66, %68, %cst_98 {dimension_numbers = #tpu.dot_dimension_numbers<[1], [0], [0], [1], [0, 0, 1, 1], [], []>} : vector<128x64xf32>, vector<64x128xf32>, vector<128x128xf32> -> vector<128x128xf32>
    %70 = arith.addf %64, %69 : vector<128x128xf32>
    %c0_99 = arith.constant 0 : index
    %c1_100 = arith.constant 1 : index
    %c0_101 = arith.constant 0 : index
    %71 = vector.load %arg9[%c0_99, %c1_100, %c0_101] : memref<10x18x64xf32, #tpu.memory_space<vmem>>, vector<8x16x64xf32>
    %72 = vector.shape_cast %71 : vector<8x16x64xf32> to vector<128x64xf32>
    %c0_102 = arith.constant 0 : index
    %c1_103 = arith.constant 1 : index
    %c0_104 = arith.constant 0 : index
    %c0_105 = arith.constant 0 : index
    %73 = vector.load %arg4[%c0_102, %c1_103, %c0_104, %c0_105] : memref<3x3x64x128xf32, #tpu.memory_space<vmem>>, vector<1x1x64x128xf32>
    %74 = vector.shape_cast %73 : vector<1x1x64x128xf32> to vector<64x128xf32>
    %cst_106 = arith.constant dense<0.000000e+00> : vector<128x128xf32>
    %75 = tpu.matmul %72, %74, %cst_106 {dimension_numbers = #tpu.dot_dimension_numbers<[1], [0], [0], [1], [0, 0, 1, 1], [], []>} : vector<128x64xf32>, vector<64x128xf32>, vector<128x128xf32> -> vector<128x128xf32>
    %76 = arith.addf %70, %75 : vector<128x128xf32>
    %c0_107 = arith.constant 0 : index
    %c2_108 = arith.constant 2 : index
    %c0_109 = arith.constant 0 : index
    %77 = vector.load %arg9[%c0_107, %c2_108, %c0_109] : memref<10x18x64xf32, #tpu.memory_space<vmem>>, vector<8x16x64xf32>
    %78 = vector.shape_cast %77 : vector<8x16x64xf32> to vector<128x64xf32>
    %c0_110 = arith.constant 0 : index
    %c2_111 = arith.constant 2 : index
    %c0_112 = arith.constant 0 : index
    %c0_113 = arith.constant 0 : index
    %79 = vector.load %arg4[%c0_110, %c2_111, %c0_112, %c0_113] : memref<3x3x64x128xf32, #tpu.memory_space<vmem>>, vector<1x1x64x128xf32>
    %80 = vector.shape_cast %79 : vector<1x1x64x128xf32> to vector<64x128xf32>
    %cst_114 = arith.constant dense<0.000000e+00> : vector<128x128xf32>
    %81 = tpu.matmul %78, %80, %cst_114 {dimension_numbers = #tpu.dot_dimension_numbers<[1], [0], [0], [1], [0, 0, 1, 1], [], []>} : vector<128x64xf32>, vector<64x128xf32>, vector<128x128xf32> -> vector<128x128xf32>
    %82 = arith.addf %76, %81 : vector<128x128xf32>
    %c1_115 = arith.constant 1 : index
    %c0_116 = arith.constant 0 : index
    %c0_117 = arith.constant 0 : index
    %83 = vector.load %arg9[%c1_115, %c0_116, %c0_117] : memref<10x18x64xf32, #tpu.memory_space<vmem>>, vector<8x16x64xf32>
    %84 = vector.shape_cast %83 : vector<8x16x64xf32> to vector<128x64xf32>
    %c1_118 = arith.constant 1 : index
    %c0_119 = arith.constant 0 : index
    %c0_120 = arith.constant 0 : index
    %c0_121 = arith.constant 0 : index
    %85 = vector.load %arg4[%c1_118, %c0_119, %c0_120, %c0_121] : memref<3x3x64x128xf32, #tpu.memory_space<vmem>>, vector<1x1x64x128xf32>
    %86 = vector.shape_cast %85 : vector<1x1x64x128xf32> to vector<64x128xf32>
    %cst_122 = arith.constant dense<0.000000e+00> : vector<128x128xf32>
    %87 = tpu.matmul %84, %86, %cst_122 {dimension_numbers = #tpu.dot_dimension_numbers<[1], [0], [0], [1], [0, 0, 1, 1], [], []>} : vector<128x64xf32>, vector<64x128xf32>, vector<128x128xf32> -> vector<128x128xf32>
    %88 = arith.addf %82, %87 : vector<128x128xf32>
    %c1_123 = arith.constant 1 : index
    %c1_124 = arith.constant 1 : index
    %c0_125 = arith.constant 0 : index
    %89 = vector.load %arg9[%c1_123, %c1_124, %c0_125] : memref<10x18x64xf32, #tpu.memory_space<vmem>>, vector<8x16x64xf32>
    %90 = vector.shape_cast %89 : vector<8x16x64xf32> to vector<128x64xf32>
    %c1_126 = arith.constant 1 : index
    %c1_127 = arith.constant 1 : index
    %c0_128 = arith.constant 0 : index
    %c0_129 = arith.constant 0 : index
    %91 = vector.load %arg4[%c1_126, %c1_127, %c0_128, %c0_129] : memref<3x3x64x128xf32, #tpu.memory_space<vmem>>, vector<1x1x64x128xf32>
    %92 = vector.shape_cast %91 : vector<1x1x64x128xf32> to vector<64x128xf32>
    %cst_130 = arith.constant dense<0.000000e+00> : vector<128x128xf32>
    %93 = tpu.matmul %90, %92, %cst_130 {dimension_numbers = #tpu.dot_dimension_numbers<[1], [0], [0], [1], [0, 0, 1, 1], [], []>} : vector<128x64xf32>, vector<64x128xf32>, vector<128x128xf32> -> vector<128x128xf32>
    %94 = arith.addf %88, %93 : vector<128x128xf32>
    %c1_131 = arith.constant 1 : index
    %c2_132 = arith.constant 2 : index
    %c0_133 = arith.constant 0 : index
    %95 = vector.load %arg9[%c1_131, %c2_132, %c0_133] : memref<10x18x64xf32, #tpu.memory_space<vmem>>, vector<8x16x64xf32>
    %96 = vector.shape_cast %95 : vector<8x16x64xf32> to vector<128x64xf32>
    %c1_134 = arith.constant 1 : index
    %c2_135 = arith.constant 2 : index
    %c0_136 = arith.constant 0 : index
    %c0_137 = arith.constant 0 : index
    %97 = vector.load %arg4[%c1_134, %c2_135, %c0_136, %c0_137] : memref<3x3x64x128xf32, #tpu.memory_space<vmem>>, vector<1x1x64x128xf32>
    %98 = vector.shape_cast %97 : vector<1x1x64x128xf32> to vector<64x128xf32>
    %cst_138 = arith.constant dense<0.000000e+00> : vector<128x128xf32>
    %99 = tpu.matmul %96, %98, %cst_138 {dimension_numbers = #tpu.dot_dimension_numbers<[1], [0], [0], [1], [0, 0, 1, 1], [], []>} : vector<128x64xf32>, vector<64x128xf32>, vector<128x128xf32> -> vector<128x128xf32>
    %100 = arith.addf %94, %99 : vector<128x128xf32>
    %c2_139 = arith.constant 2 : index
    %c0_140 = arith.constant 0 : index
    %c0_141 = arith.constant 0 : index
    %101 = vector.load %arg9[%c2_139, %c0_140, %c0_141] : memref<10x18x64xf32, #tpu.memory_space<vmem>>, vector<8x16x64xf32>
    %102 = vector.shape_cast %101 : vector<8x16x64xf32> to vector<128x64xf32>
    %c2_142 = arith.constant 2 : index
    %c0_143 = arith.constant 0 : index
    %c0_144 = arith.constant 0 : index
    %c0_145 = arith.constant 0 : index
    %103 = vector.load %arg4[%c2_142, %c0_143, %c0_144, %c0_145] : memref<3x3x64x128xf32, #tpu.memory_space<vmem>>, vector<1x1x64x128xf32>
    %104 = vector.shape_cast %103 : vector<1x1x64x128xf32> to vector<64x128xf32>
    %cst_146 = arith.constant dense<0.000000e+00> : vector<128x128xf32>
    %105 = tpu.matmul %102, %104, %cst_146 {dimension_numbers = #tpu.dot_dimension_numbers<[1], [0], [0], [1], [0, 0, 1, 1], [], []>} : vector<128x64xf32>, vector<64x128xf32>, vector<128x128xf32> -> vector<128x128xf32>
    %106 = arith.addf %100, %105 : vector<128x128xf32>
    %c2_147 = arith.constant 2 : index
    %c1_148 = arith.constant 1 : index
    %c0_149 = arith.constant 0 : index
    %107 = vector.load %arg9[%c2_147, %c1_148, %c0_149] : memref<10x18x64xf32, #tpu.memory_space<vmem>>, vector<8x16x64xf32>
    %108 = vector.shape_cast %107 : vector<8x16x64xf32> to vector<128x64xf32>
    %c2_150 = arith.constant 2 : index
    %c1_151 = arith.constant 1 : index
    %c0_152 = arith.constant 0 : index
    %c0_153 = arith.constant 0 : index
    %109 = vector.load %arg4[%c2_150, %c1_151, %c0_152, %c0_153] : memref<3x3x64x128xf32, #tpu.memory_space<vmem>>, vector<1x1x64x128xf32>
    %110 = vector.shape_cast %109 : vector<1x1x64x128xf32> to vector<64x128xf32>
    %cst_154 = arith.constant dense<0.000000e+00> : vector<128x128xf32>
    %111 = tpu.matmul %108, %110, %cst_154 {dimension_numbers = #tpu.dot_dimension_numbers<[1], [0], [0], [1], [0, 0, 1, 1], [], []>} : vector<128x64xf32>, vector<64x128xf32>, vector<128x128xf32> -> vector<128x128xf32>
    %112 = arith.addf %106, %111 : vector<128x128xf32>
    %c2_155 = arith.constant 2 : index
    %c2_156 = arith.constant 2 : index
    %c0_157 = arith.constant 0 : index
    %113 = vector.load %arg9[%c2_155, %c2_156, %c0_157] : memref<10x18x64xf32, #tpu.memory_space<vmem>>, vector<8x16x64xf32>
    %114 = vector.shape_cast %113 : vector<8x16x64xf32> to vector<128x64xf32>
    %c2_158 = arith.constant 2 : index
    %c2_159 = arith.constant 2 : index
    %c0_160 = arith.constant 0 : index
    %c0_161 = arith.constant 0 : index
    %115 = vector.load %arg4[%c2_158, %c2_159, %c0_160, %c0_161] : memref<3x3x64x128xf32, #tpu.memory_space<vmem>>, vector<1x1x64x128xf32>
    %116 = vector.shape_cast %115 : vector<1x1x64x128xf32> to vector<64x128xf32>
    %cst_162 = arith.constant dense<0.000000e+00> : vector<128x128xf32>
    %117 = tpu.matmul %114, %116, %cst_162 {dimension_numbers = #tpu.dot_dimension_numbers<[1], [0], [0], [1], [0, 0, 1, 1], [], []>} : vector<128x64xf32>, vector<64x128xf32>, vector<128x128xf32> -> vector<128x128xf32>
    %118 = arith.addf %112, %117 : vector<128x128xf32>
    %c0_163 = arith.constant 0 : index
    %c0_164 = arith.constant 0 : index
    %119 = vector.load %arg5[%c0_163, %c0_164] : memref<1x128xf32, #tpu.memory_space<vmem>>, vector<1x128xf32>
    %120 = vector.broadcast %119 : vector<1x128xf32> to vector<128x128xf32>
    %121 = arith.addf %118, %120 : vector<128x128xf32>
    %122 = vector.shape_cast %121 : vector<128x128xf32> to vector<8x16x128xf32>
    %c0_165 = arith.constant 0 : index
    %c0_166 = arith.constant 0 : index
    %c0_167 = arith.constant 0 : index
    %c0_168 = arith.constant 0 : index
    %123 = vector.load %arg6[%c0_165, %c0_166, %c0_167, %c0_168] : memref<1x8x16x128xf32, #tpu.memory_space<vmem>>, vector<1x8x16x128xf32>
    %124 = vector.shape_cast %123 : vector<1x8x16x128xf32> to vector<8x16x128xf32>
    %125 = vector.shape_cast %122 : vector<8x16x128xf32> to vector<1x8x16x128xf32>
    tpu.vector_store %arg6[%c0_165, %c0_166, %c0_167, %c0_168], %125 {strides = array<i32>} : memref<1x8x16x128xf32, #tpu.memory_space<vmem>>, vector<1x8x16x128xf32>,
    %cst_169 = arith.constant dense<0.000000e+00> : vector<128xf32>
    %126 = vector.multi_reduction <add>, %121, %cst_169 [0] : vector<128x128xf32> to vector<128xf32>
    %127 = vector.shape_cast %126 : vector<128xf32> to vector<1x128xf32>
    %c0_170 = arith.constant 0 : index
    %c0_171 = arith.constant 0 : index
    %c0_172 = arith.constant 0 : index
    %128 = vector.load %arg7[%c0_170, %c0_171, %c0_172] : memref<1x2x128xf32, #tpu.memory_space<vmem>>, vector<1x1x128xf32>
    %129 = vector.shape_cast %128 : vector<1x1x128xf32> to vector<1x128xf32>
    %130 = vector.shape_cast %127 : vector<1x128xf32> to vector<1x1x128xf32>
    tpu.vector_store %arg7[%c0_170, %c0_171, %c0_172], %130 {strides = array<i32>} : memref<1x2x128xf32, #tpu.memory_space<vmem>>, vector<1x1x128xf32>,
    %131 = arith.mulf %121, %121 : vector<128x128xf32>
    %cst_173 = arith.constant dense<0.000000e+00> : vector<128xf32>
    %132 = vector.multi_reduction <add>, %131, %cst_173 [0] : vector<128x128xf32> to vector<128xf32>
    %133 = vector.shape_cast %132 : vector<128xf32> to vector<1x128xf32>
    %c0_174 = arith.constant 0 : index
    %c1_175 = arith.constant 1 : index
    %c0_176 = arith.constant 0 : index
    %134 = vector.load %arg7[%c0_174, %c1_175, %c0_176] : memref<1x2x128xf32, #tpu.memory_space<vmem>>, vector<1x1x128xf32>
    %135 = vector.shape_cast %134 : vector<1x1x128xf32> to vector<1x128xf32>
    %136 = vector.shape_cast %133 : vector<1x128xf32> to vector<1x1x128xf32>
    tpu.vector_store %arg7[%c0_174, %c1_175, %c0_176], %136 {strides = array<i32>} : memref<1x2x128xf32, #tpu.memory_space<vmem>>, vector<1x1x128xf32>,
    return
  }
  func.func @transform_0(%arg0: i32) -> (i32, i32, i32, i32) {
    %c0_i32 = arith.constant 0 : i32
    %c0_i32_0 = arith.constant 0 : i32
    %c0_i32_1 = arith.constant 0 : i32
    %c0_i32_2 = arith.constant 0 : i32
    return %arg0, %c0_i32, %c0_i32_0, %c0_i32_1 : i32, i32, i32, i32
  }
  func.func @transform_1(%arg0: i32) -> (i32, i32, i32, i32) {
    %c0_i32 = arith.constant 0 : i32
    %c0_i32_0 = arith.constant 0 : i32
    %c0_i32_1 = arith.constant 0 : i32
    %c0_i32_2 = arith.constant 0 : i32
    return %arg0, %c0_i32, %c0_i32_0, %c0_i32_1 : i32, i32, i32, i32
  }
  func.func @transform_2(%arg0: i32) -> (i32, i32, i32, i32) {
    %c0_i32 = arith.constant 0 : i32
    %c0_i32_0 = arith.constant 0 : i32
    %c0_i32_1 = arith.constant 0 : i32
    %c0_i32_2 = arith.constant 0 : i32
    %c0_i32_3 = arith.constant 0 : i32
    return %c0_i32, %c0_i32_0, %c0_i32_1, %c0_i32_2 : i32, i32, i32, i32
  }
  func.func @transform_3(%arg0: i32) -> (i32, i32, i32, i32) {
    %c0_i32 = arith.constant 0 : i32
    %c0_i32_0 = arith.constant 0 : i32
    %c0_i32_1 = arith.constant 0 : i32
    %c0_i32_2 = arith.constant 0 : i32
    %c0_i32_3 = arith.constant 0 : i32
    return %c0_i32, %c0_i32_0, %c0_i32_1, %c0_i32_2 : i32, i32, i32, i32
  }
  func.func @transform_4(%arg0: i32) -> (i32, i32) {
    %c0_i32 = arith.constant 0 : i32
    %c0_i32_0 = arith.constant 0 : i32
    %c0_i32_1 = arith.constant 0 : i32
    return %c0_i32, %c0_i32_0 : i32, i32
  }
  func.func @transform_5(%arg0: i32) -> (i32, i32, i32, i32) {
    %c0_i32 = arith.constant 0 : i32
    %c0_i32_0 = arith.constant 0 : i32
    %c0_i32_1 = arith.constant 0 : i32
    %c0_i32_2 = arith.constant 0 : i32
    return %arg0, %c0_i32, %c0_i32_0, %c0_i32_1 : i32, i32, i32, i32
  }
  func.func @transform_6(%arg0: i32) -> (i32, i32, i32) {
    %c0_i32 = arith.constant 0 : i32
    %c0_i32_0 = arith.constant 0 : i32
    %c0_i32_1 = arith.constant 0 : i32
    return %arg0, %c0_i32, %c0_i32_0 : i32, i32, i32
  }
}

module attributes {stable_mosaic.version = 11 : i64} {
  func.func @_conv2_bnrelu_kernel(%arg0: i32, %arg1: memref<1x8x16x128xf32, #tpu.memory_space<vmem>>, %arg2: memref<1x128xf32, #tpu.memory_space<vmem>>, %arg3: memref<1x128xf32, #tpu.memory_space<vmem>>, %arg4: memref<3x3x128x64xf32, #tpu.memory_space<vmem>>, %arg5: memref<1x64xf32, #tpu.memory_space<vmem>>, %arg6: memref<1x8x16x64xf32, #tpu.memory_space<vmem>>, %arg7: memref<1x2x64xf32, #tpu.memory_space<vmem>>, %arg8: memref<10x18x128xf32, #tpu.memory_space<vmem>>) attributes {dimension_semantics = [#tpu.dimension_semantics<parallel>], iteration_bounds = array<i64: 2>, scalar_prefetch = 0 : i64, scratch_operands = 1 : i64, tpu.core_type = #tpu.core_type<tc>, window_params = [{transform_indices = @transform_0, window_bounds = array<i64: 1, 8, 16, 128>}, {pipeline_mode = #tpu.pipeline_mode<synchronous>, transform_indices = @transform_1, window_bounds = array<i64: 1, 128>}, {pipeline_mode = #tpu.pipeline_mode<synchronous>, transform_indices = @transform_2, window_bounds = array<i64: 1, 128>}, {pipeline_mode = #tpu.pipeline_mode<synchronous>, transform_indices = @transform_3, window_bounds = array<i64: 3, 3, 128, 64>}, {pipeline_mode = #tpu.pipeline_mode<synchronous>, transform_indices = @transform_4, window_bounds = array<i64: 1, 64>}, {transform_indices = @transform_5, window_bounds = array<i64: 1, 8, 16, 64>}, {transform_indices = @transform_6, window_bounds = array<i64: 1, 2, 64>}]} {
    %cst = arith.constant 0.000000e+00 : f32
    %0 = vector.broadcast %cst : f32 to vector<10x18x128xf32>
    %c0 = arith.constant 0 : index
    %c0_0 = arith.constant 0 : index
    %c0_1 = arith.constant 0 : index
    %1 = vector.load %arg8[%c0, %c0_0, %c0_1] : memref<10x18x128xf32, #tpu.memory_space<vmem>>, vector<10x18x128xf32>
    tpu.vector_store %arg8[%c0, %c0_0, %c0_1], %0 {strides = array<i32>} : memref<10x18x128xf32, #tpu.memory_space<vmem>>, vector<10x18x128xf32>,
    %c0_2 = arith.constant 0 : index
    %c0_3 = arith.constant 0 : index
    %c0_4 = arith.constant 0 : index
    %c0_5 = arith.constant 0 : index
    %2 = vector.load %arg1[%c0_2, %c0_3, %c0_4, %c0_5] : memref<1x8x16x128xf32, #tpu.memory_space<vmem>>, vector<1x8x16x128xf32>
    %3 = vector.shape_cast %2 : vector<1x8x16x128xf32> to vector<8x16x128xf32>
    %c0_6 = arith.constant 0 : index
    %c0_7 = arith.constant 0 : index
    %4 = vector.load %arg2[%c0_6, %c0_7] : memref<1x128xf32, #tpu.memory_space<vmem>>, vector<1x128xf32>
    %5 = vector.shape_cast %4 : vector<1x128xf32> to vector<1x1x128xf32>
    %6 = vector.broadcast %5 : vector<1x1x128xf32> to vector<8x16x128xf32>
    %7 = arith.mulf %3, %6 : vector<8x16x128xf32>
    %c0_8 = arith.constant 0 : index
    %c0_9 = arith.constant 0 : index
    %8 = vector.load %arg3[%c0_8, %c0_9] : memref<1x128xf32, #tpu.memory_space<vmem>>, vector<1x128xf32>
    %9 = vector.shape_cast %8 : vector<1x128xf32> to vector<1x1x128xf32>
    %10 = vector.broadcast %9 : vector<1x1x128xf32> to vector<8x16x128xf32>
    %11 = arith.addf %7, %10 : vector<8x16x128xf32>
    %cst_10 = arith.constant 0.000000e+00 : f32
    %12 = vector.broadcast %cst_10 : f32 to vector<8x16x128xf32>
    %13 = arith.maximumf %11, %12 : vector<8x16x128xf32>
    %c1 = arith.constant 1 : index
    %c1_11 = arith.constant 1 : index
    %c0_12 = arith.constant 0 : index
    %14 = vector.load %arg8[%c1, %c1_11, %c0_12] : memref<10x18x128xf32, #tpu.memory_space<vmem>>, vector<8x16x128xf32>
    tpu.vector_store %arg8[%c1, %c1_11, %c0_12], %13 {strides = array<i32>} : memref<10x18x128xf32, #tpu.memory_space<vmem>>, vector<8x16x128xf32>,
    %cst_13 = arith.constant 0.000000e+00 : f32
    %15 = vector.broadcast %cst_13 : f32 to vector<128x64xf32>
    %c0_14 = arith.constant 0 : index
    %c0_15 = arith.constant 0 : index
    %c0_16 = arith.constant 0 : index
    %16 = vector.load %arg8[%c0_14, %c0_15, %c0_16] : memref<10x18x128xf32, #tpu.memory_space<vmem>>, vector<8x16x128xf32>
    %17 = vector.shape_cast %16 : vector<8x16x128xf32> to vector<128x128xf32>
    %c0_17 = arith.constant 0 : index
    %c0_18 = arith.constant 0 : index
    %c0_19 = arith.constant 0 : index
    %c0_20 = arith.constant 0 : index
    %18 = vector.load %arg4[%c0_17, %c0_18, %c0_19, %c0_20] : memref<3x3x128x64xf32, #tpu.memory_space<vmem>>, vector<1x1x128x64xf32>
    %19 = vector.shape_cast %18 : vector<1x1x128x64xf32> to vector<128x64xf32>
    %cst_21 = arith.constant dense<0.000000e+00> : vector<128x64xf32>
    %20 = tpu.matmul %17, %19, %cst_21 {dimension_numbers = #tpu.dot_dimension_numbers<[1], [0], [0], [1], [0, 0, 1, 1], [], []>} : vector<128x128xf32>, vector<128x64xf32>, vector<128x64xf32> -> vector<128x64xf32>
    %21 = arith.addf %15, %20 : vector<128x64xf32>
    %c0_22 = arith.constant 0 : index
    %c1_23 = arith.constant 1 : index
    %c0_24 = arith.constant 0 : index
    %22 = vector.load %arg8[%c0_22, %c1_23, %c0_24] : memref<10x18x128xf32, #tpu.memory_space<vmem>>, vector<8x16x128xf32>
    %23 = vector.shape_cast %22 : vector<8x16x128xf32> to vector<128x128xf32>
    %c0_25 = arith.constant 0 : index
    %c1_26 = arith.constant 1 : index
    %c0_27 = arith.constant 0 : index
    %c0_28 = arith.constant 0 : index
    %24 = vector.load %arg4[%c0_25, %c1_26, %c0_27, %c0_28] : memref<3x3x128x64xf32, #tpu.memory_space<vmem>>, vector<1x1x128x64xf32>
    %25 = vector.shape_cast %24 : vector<1x1x128x64xf32> to vector<128x64xf32>
    %cst_29 = arith.constant dense<0.000000e+00> : vector<128x64xf32>
    %26 = tpu.matmul %23, %25, %cst_29 {dimension_numbers = #tpu.dot_dimension_numbers<[1], [0], [0], [1], [0, 0, 1, 1], [], []>} : vector<128x128xf32>, vector<128x64xf32>, vector<128x64xf32> -> vector<128x64xf32>
    %27 = arith.addf %21, %26 : vector<128x64xf32>
    %c0_30 = arith.constant 0 : index
    %c2 = arith.constant 2 : index
    %c0_31 = arith.constant 0 : index
    %28 = vector.load %arg8[%c0_30, %c2, %c0_31] : memref<10x18x128xf32, #tpu.memory_space<vmem>>, vector<8x16x128xf32>
    %29 = vector.shape_cast %28 : vector<8x16x128xf32> to vector<128x128xf32>
    %c0_32 = arith.constant 0 : index
    %c2_33 = arith.constant 2 : index
    %c0_34 = arith.constant 0 : index
    %c0_35 = arith.constant 0 : index
    %30 = vector.load %arg4[%c0_32, %c2_33, %c0_34, %c0_35] : memref<3x3x128x64xf32, #tpu.memory_space<vmem>>, vector<1x1x128x64xf32>
    %31 = vector.shape_cast %30 : vector<1x1x128x64xf32> to vector<128x64xf32>
    %cst_36 = arith.constant dense<0.000000e+00> : vector<128x64xf32>
    %32 = tpu.matmul %29, %31, %cst_36 {dimension_numbers = #tpu.dot_dimension_numbers<[1], [0], [0], [1], [0, 0, 1, 1], [], []>} : vector<128x128xf32>, vector<128x64xf32>, vector<128x64xf32> -> vector<128x64xf32>
    %33 = arith.addf %27, %32 : vector<128x64xf32>
    %c1_37 = arith.constant 1 : index
    %c0_38 = arith.constant 0 : index
    %c0_39 = arith.constant 0 : index
    %34 = vector.load %arg8[%c1_37, %c0_38, %c0_39] : memref<10x18x128xf32, #tpu.memory_space<vmem>>, vector<8x16x128xf32>
    %35 = vector.shape_cast %34 : vector<8x16x128xf32> to vector<128x128xf32>
    %c1_40 = arith.constant 1 : index
    %c0_41 = arith.constant 0 : index
    %c0_42 = arith.constant 0 : index
    %c0_43 = arith.constant 0 : index
    %36 = vector.load %arg4[%c1_40, %c0_41, %c0_42, %c0_43] : memref<3x3x128x64xf32, #tpu.memory_space<vmem>>, vector<1x1x128x64xf32>
    %37 = vector.shape_cast %36 : vector<1x1x128x64xf32> to vector<128x64xf32>
    %cst_44 = arith.constant dense<0.000000e+00> : vector<128x64xf32>
    %38 = tpu.matmul %35, %37, %cst_44 {dimension_numbers = #tpu.dot_dimension_numbers<[1], [0], [0], [1], [0, 0, 1, 1], [], []>} : vector<128x128xf32>, vector<128x64xf32>, vector<128x64xf32> -> vector<128x64xf32>
    %39 = arith.addf %33, %38 : vector<128x64xf32>
    %c1_45 = arith.constant 1 : index
    %c1_46 = arith.constant 1 : index
    %c0_47 = arith.constant 0 : index
    %40 = vector.load %arg8[%c1_45, %c1_46, %c0_47] : memref<10x18x128xf32, #tpu.memory_space<vmem>>, vector<8x16x128xf32>
    %41 = vector.shape_cast %40 : vector<8x16x128xf32> to vector<128x128xf32>
    %c1_48 = arith.constant 1 : index
    %c1_49 = arith.constant 1 : index
    %c0_50 = arith.constant 0 : index
    %c0_51 = arith.constant 0 : index
    %42 = vector.load %arg4[%c1_48, %c1_49, %c0_50, %c0_51] : memref<3x3x128x64xf32, #tpu.memory_space<vmem>>, vector<1x1x128x64xf32>
    %43 = vector.shape_cast %42 : vector<1x1x128x64xf32> to vector<128x64xf32>
    %cst_52 = arith.constant dense<0.000000e+00> : vector<128x64xf32>
    %44 = tpu.matmul %41, %43, %cst_52 {dimension_numbers = #tpu.dot_dimension_numbers<[1], [0], [0], [1], [0, 0, 1, 1], [], []>} : vector<128x128xf32>, vector<128x64xf32>, vector<128x64xf32> -> vector<128x64xf32>
    %45 = arith.addf %39, %44 : vector<128x64xf32>
    %c1_53 = arith.constant 1 : index
    %c2_54 = arith.constant 2 : index
    %c0_55 = arith.constant 0 : index
    %46 = vector.load %arg8[%c1_53, %c2_54, %c0_55] : memref<10x18x128xf32, #tpu.memory_space<vmem>>, vector<8x16x128xf32>
    %47 = vector.shape_cast %46 : vector<8x16x128xf32> to vector<128x128xf32>
    %c1_56 = arith.constant 1 : index
    %c2_57 = arith.constant 2 : index
    %c0_58 = arith.constant 0 : index
    %c0_59 = arith.constant 0 : index
    %48 = vector.load %arg4[%c1_56, %c2_57, %c0_58, %c0_59] : memref<3x3x128x64xf32, #tpu.memory_space<vmem>>, vector<1x1x128x64xf32>
    %49 = vector.shape_cast %48 : vector<1x1x128x64xf32> to vector<128x64xf32>
    %cst_60 = arith.constant dense<0.000000e+00> : vector<128x64xf32>
    %50 = tpu.matmul %47, %49, %cst_60 {dimension_numbers = #tpu.dot_dimension_numbers<[1], [0], [0], [1], [0, 0, 1, 1], [], []>} : vector<128x128xf32>, vector<128x64xf32>, vector<128x64xf32> -> vector<128x64xf32>
    %51 = arith.addf %45, %50 : vector<128x64xf32>
    %c2_61 = arith.constant 2 : index
    %c0_62 = arith.constant 0 : index
    %c0_63 = arith.constant 0 : index
    %52 = vector.load %arg8[%c2_61, %c0_62, %c0_63] : memref<10x18x128xf32, #tpu.memory_space<vmem>>, vector<8x16x128xf32>
    %53 = vector.shape_cast %52 : vector<8x16x128xf32> to vector<128x128xf32>
    %c2_64 = arith.constant 2 : index
    %c0_65 = arith.constant 0 : index
    %c0_66 = arith.constant 0 : index
    %c0_67 = arith.constant 0 : index
    %54 = vector.load %arg4[%c2_64, %c0_65, %c0_66, %c0_67] : memref<3x3x128x64xf32, #tpu.memory_space<vmem>>, vector<1x1x128x64xf32>
    %55 = vector.shape_cast %54 : vector<1x1x128x64xf32> to vector<128x64xf32>
    %cst_68 = arith.constant dense<0.000000e+00> : vector<128x64xf32>
    %56 = tpu.matmul %53, %55, %cst_68 {dimension_numbers = #tpu.dot_dimension_numbers<[1], [0], [0], [1], [0, 0, 1, 1], [], []>} : vector<128x128xf32>, vector<128x64xf32>, vector<128x64xf32> -> vector<128x64xf32>
    %57 = arith.addf %51, %56 : vector<128x64xf32>
    %c2_69 = arith.constant 2 : index
    %c1_70 = arith.constant 1 : index
    %c0_71 = arith.constant 0 : index
    %58 = vector.load %arg8[%c2_69, %c1_70, %c0_71] : memref<10x18x128xf32, #tpu.memory_space<vmem>>, vector<8x16x128xf32>
    %59 = vector.shape_cast %58 : vector<8x16x128xf32> to vector<128x128xf32>
    %c2_72 = arith.constant 2 : index
    %c1_73 = arith.constant 1 : index
    %c0_74 = arith.constant 0 : index
    %c0_75 = arith.constant 0 : index
    %60 = vector.load %arg4[%c2_72, %c1_73, %c0_74, %c0_75] : memref<3x3x128x64xf32, #tpu.memory_space<vmem>>, vector<1x1x128x64xf32>
    %61 = vector.shape_cast %60 : vector<1x1x128x64xf32> to vector<128x64xf32>
    %cst_76 = arith.constant dense<0.000000e+00> : vector<128x64xf32>
    %62 = tpu.matmul %59, %61, %cst_76 {dimension_numbers = #tpu.dot_dimension_numbers<[1], [0], [0], [1], [0, 0, 1, 1], [], []>} : vector<128x128xf32>, vector<128x64xf32>, vector<128x64xf32> -> vector<128x64xf32>
    %63 = arith.addf %57, %62 : vector<128x64xf32>
    %c2_77 = arith.constant 2 : index
    %c2_78 = arith.constant 2 : index
    %c0_79 = arith.constant 0 : index
    %64 = vector.load %arg8[%c2_77, %c2_78, %c0_79] : memref<10x18x128xf32, #tpu.memory_space<vmem>>, vector<8x16x128xf32>
    %65 = vector.shape_cast %64 : vector<8x16x128xf32> to vector<128x128xf32>
    %c2_80 = arith.constant 2 : index
    %c2_81 = arith.constant 2 : index
    %c0_82 = arith.constant 0 : index
    %c0_83 = arith.constant 0 : index
    %66 = vector.load %arg4[%c2_80, %c2_81, %c0_82, %c0_83] : memref<3x3x128x64xf32, #tpu.memory_space<vmem>>, vector<1x1x128x64xf32>
    %67 = vector.shape_cast %66 : vector<1x1x128x64xf32> to vector<128x64xf32>
    %cst_84 = arith.constant dense<0.000000e+00> : vector<128x64xf32>
    %68 = tpu.matmul %65, %67, %cst_84 {dimension_numbers = #tpu.dot_dimension_numbers<[1], [0], [0], [1], [0, 0, 1, 1], [], []>} : vector<128x128xf32>, vector<128x64xf32>, vector<128x64xf32> -> vector<128x64xf32>
    %69 = arith.addf %63, %68 : vector<128x64xf32>
    %c0_85 = arith.constant 0 : index
    %c0_86 = arith.constant 0 : index
    %70 = vector.load %arg5[%c0_85, %c0_86] : memref<1x64xf32, #tpu.memory_space<vmem>>, vector<1x64xf32>
    %71 = vector.broadcast %70 : vector<1x64xf32> to vector<128x64xf32>
    %72 = arith.addf %69, %71 : vector<128x64xf32>
    %73 = vector.shape_cast %72 : vector<128x64xf32> to vector<8x16x64xf32>
    %c0_87 = arith.constant 0 : index
    %c0_88 = arith.constant 0 : index
    %c0_89 = arith.constant 0 : index
    %c0_90 = arith.constant 0 : index
    %74 = vector.load %arg6[%c0_87, %c0_88, %c0_89, %c0_90] : memref<1x8x16x64xf32, #tpu.memory_space<vmem>>, vector<1x8x16x64xf32>
    %75 = vector.shape_cast %74 : vector<1x8x16x64xf32> to vector<8x16x64xf32>
    %76 = vector.shape_cast %73 : vector<8x16x64xf32> to vector<1x8x16x64xf32>
    tpu.vector_store %arg6[%c0_87, %c0_88, %c0_89, %c0_90], %76 {strides = array<i32>} : memref<1x8x16x64xf32, #tpu.memory_space<vmem>>, vector<1x8x16x64xf32>,
    %cst_91 = arith.constant dense<0.000000e+00> : vector<64xf32>
    %77 = vector.multi_reduction <add>, %72, %cst_91 [0] : vector<128x64xf32> to vector<64xf32>
    %78 = vector.shape_cast %77 : vector<64xf32> to vector<1x64xf32>
    %c0_92 = arith.constant 0 : index
    %c0_93 = arith.constant 0 : index
    %c0_94 = arith.constant 0 : index
    %79 = vector.load %arg7[%c0_92, %c0_93, %c0_94] : memref<1x2x64xf32, #tpu.memory_space<vmem>>, vector<1x1x64xf32>
    %80 = vector.shape_cast %79 : vector<1x1x64xf32> to vector<1x64xf32>
    %81 = vector.shape_cast %78 : vector<1x64xf32> to vector<1x1x64xf32>
    tpu.vector_store %arg7[%c0_92, %c0_93, %c0_94], %81 {strides = array<i32>} : memref<1x2x64xf32, #tpu.memory_space<vmem>>, vector<1x1x64xf32>,
    %82 = arith.mulf %72, %72 : vector<128x64xf32>
    %cst_95 = arith.constant dense<0.000000e+00> : vector<64xf32>
    %83 = vector.multi_reduction <add>, %82, %cst_95 [0] : vector<128x64xf32> to vector<64xf32>
    %84 = vector.shape_cast %83 : vector<64xf32> to vector<1x64xf32>
    %c0_96 = arith.constant 0 : index
    %c1_97 = arith.constant 1 : index
    %c0_98 = arith.constant 0 : index
    %85 = vector.load %arg7[%c0_96, %c1_97, %c0_98] : memref<1x2x64xf32, #tpu.memory_space<vmem>>, vector<1x1x64xf32>
    %86 = vector.shape_cast %85 : vector<1x1x64xf32> to vector<1x64xf32>
    %87 = vector.shape_cast %84 : vector<1x64xf32> to vector<1x1x64xf32>
    tpu.vector_store %arg7[%c0_96, %c1_97, %c0_98], %87 {strides = array<i32>} : memref<1x2x64xf32, #tpu.memory_space<vmem>>, vector<1x1x64xf32>,
    return
  }
  func.func @transform_0(%arg0: i32) -> (i32, i32, i32, i32) {
    %c0_i32 = arith.constant 0 : i32
    %c0_i32_0 = arith.constant 0 : i32
    %c0_i32_1 = arith.constant 0 : i32
    %c0_i32_2 = arith.constant 0 : i32
    return %arg0, %c0_i32, %c0_i32_0, %c0_i32_1 : i32, i32, i32, i32
  }
  func.func @transform_1(%arg0: i32) -> (i32, i32) {
    %c0_i32 = arith.constant 0 : i32
    %c0_i32_0 = arith.constant 0 : i32
    %c0_i32_1 = arith.constant 0 : i32
    return %c0_i32, %c0_i32_0 : i32, i32
  }
  func.func @transform_2(%arg0: i32) -> (i32, i32) {
    %c0_i32 = arith.constant 0 : i32
    %c0_i32_0 = arith.constant 0 : i32
    %c0_i32_1 = arith.constant 0 : i32
    return %c0_i32, %c0_i32_0 : i32, i32
  }
  func.func @transform_3(%arg0: i32) -> (i32, i32, i32, i32) {
    %c0_i32 = arith.constant 0 : i32
    %c0_i32_0 = arith.constant 0 : i32
    %c0_i32_1 = arith.constant 0 : i32
    %c0_i32_2 = arith.constant 0 : i32
    %c0_i32_3 = arith.constant 0 : i32
    return %c0_i32, %c0_i32_0, %c0_i32_1, %c0_i32_2 : i32, i32, i32, i32
  }
  func.func @transform_4(%arg0: i32) -> (i32, i32) {
    %c0_i32 = arith.constant 0 : i32
    %c0_i32_0 = arith.constant 0 : i32
    %c0_i32_1 = arith.constant 0 : i32
    return %c0_i32, %c0_i32_0 : i32, i32
  }
  func.func @transform_5(%arg0: i32) -> (i32, i32, i32, i32) {
    %c0_i32 = arith.constant 0 : i32
    %c0_i32_0 = arith.constant 0 : i32
    %c0_i32_1 = arith.constant 0 : i32
    %c0_i32_2 = arith.constant 0 : i32
    return %arg0, %c0_i32, %c0_i32_0, %c0_i32_1 : i32, i32, i32, i32
  }
  func.func @transform_6(%arg0: i32) -> (i32, i32, i32) {
    %c0_i32 = arith.constant 0 : i32
    %c0_i32_0 = arith.constant 0 : i32
    %c0_i32_1 = arith.constant 0 : i32
    return %arg0, %c0_i32, %c0_i32_0 : i32, i32, i32
  }
}

module attributes {stable_mosaic.version = 11 : i64} {
  func.func @_bn_relu_flat_kernel(%arg0: i32, %arg1: memref<8x1024xf32, #tpu.memory_space<vmem>>, %arg2: memref<1x1024xf32, #tpu.memory_space<vmem>>, %arg3: memref<1x1024xf32, #tpu.memory_space<vmem>>, %arg4: memref<8x1024xf32, #tpu.memory_space<vmem>>) attributes {dimension_semantics = [#tpu.dimension_semantics<parallel>], iteration_bounds = array<i64: 2>, scalar_prefetch = 0 : i64, scratch_operands = 0 : i64, tpu.core_type = #tpu.core_type<tc>, window_params = [{transform_indices = @transform_0, window_bounds = array<i64: 8, 1024>}, {pipeline_mode = #tpu.pipeline_mode<synchronous>, transform_indices = @transform_1, window_bounds = array<i64: 1, 1024>}, {pipeline_mode = #tpu.pipeline_mode<synchronous>, transform_indices = @transform_2, window_bounds = array<i64: 1, 1024>}, {transform_indices = @transform_3, window_bounds = array<i64: 8, 1024>}]} {
    %c0 = arith.constant 0 : index
    %c0_0 = arith.constant 0 : index
    %0 = vector.load %arg1[%c0, %c0_0] : memref<8x1024xf32, #tpu.memory_space<vmem>>, vector<8x1024xf32>
    %c0_1 = arith.constant 0 : index
    %c0_2 = arith.constant 0 : index
    %1 = vector.load %arg2[%c0_1, %c0_2] : memref<1x1024xf32, #tpu.memory_space<vmem>>, vector<1x1024xf32>
    %2 = vector.broadcast %1 : vector<1x1024xf32> to vector<8x1024xf32>
    %3 = arith.mulf %0, %2 : vector<8x1024xf32>
    %c0_3 = arith.constant 0 : index
    %c0_4 = arith.constant 0 : index
    %4 = vector.load %arg3[%c0_3, %c0_4] : memref<1x1024xf32, #tpu.memory_space<vmem>>, vector<1x1024xf32>
    %5 = vector.broadcast %4 : vector<1x1024xf32> to vector<8x1024xf32>
    %6 = arith.addf %3, %5 : vector<8x1024xf32>
    %cst = arith.constant 0.000000e+00 : f32
    %7 = vector.broadcast %cst : f32 to vector<8x1024xf32>
    %8 = arith.maximumf %6, %7 : vector<8x1024xf32>
    %c0_5 = arith.constant 0 : index
    %c0_6 = arith.constant 0 : index
    %9 = vector.load %arg4[%c0_5, %c0_6] : memref<8x1024xf32, #tpu.memory_space<vmem>>, vector<8x1024xf32>
    tpu.vector_store %arg4[%c0_5, %c0_6], %8 {strides = array<i32>} : memref<8x1024xf32, #tpu.memory_space<vmem>>, vector<8x1024xf32>,
    return
  }
  func.func @transform_0(%arg0: i32) -> (i32, i32) {
    %c0_i32 = arith.constant 0 : i32
    %c0_i32_0 = arith.constant 0 : i32
    return %arg0, %c0_i32 : i32, i32
  }
  func.func @transform_1(%arg0: i32) -> (i32, i32) {
    %c0_i32 = arith.constant 0 : i32
    %c0_i32_0 = arith.constant 0 : i32
    %c0_i32_1 = arith.constant 0 : i32
    return %c0_i32, %c0_i32_0 : i32, i32
  }
  func.func @transform_2(%arg0: i32) -> (i32, i32) {
    %c0_i32 = arith.constant 0 : i32
    %c0_i32_0 = arith.constant 0 : i32
    %c0_i32_1 = arith.constant 0 : i32
    return %c0_i32, %c0_i32_0 : i32, i32
  }
  func.func @transform_3(%arg0: i32) -> (i32, i32) {
    %c0_i32 = arith.constant 0 : i32
    %c0_i32_0 = arith.constant 0 : i32
    return %arg0, %c0_i32 : i32, i32
  }
}

</mosaic_0001>

<bundles_post_ra>
// kernel: tile.33
= control target key start
LH: loop header
LB: loop body
LE: loop exit
PB: predicated region body
PF: predicated region fallthrough
CT: control target
= control target key end

     0   :  { %s28_s0 = inlined_call_operand.vmem [shape: f32[8], index: 0, kind: input, shape index: {}]   ;;  %s29_s1 = inlined_call_operand.vmem [shape: f32[16,8], index: 1, kind: output, shape index: {}]  }
   0x1   :  { %v4_v0 = vld [vmem:[%s28_s0] ss:$0 sm:$0xff] }
   0x2   :  { %5 = vst [vmem:[%s29_s1] sm:$0xff] %v4_v0  ;;  %8 = vst [vmem:[%s29_s1 + $0x8] sm:$0xff] %v4_v0 }

// kernel: tile.34
= control target key start
LH: loop header
LB: loop body
LE: loop exit
PB: predicated region body
PF: predicated region fallthrough
CT: control target
= control target key end

     0   :  { %s131_s10 = smov 120   ;;  %s132_s11 = smov 104   ;;  %vm3_vm0 = vcmask 64512   ;;  %vm9_vm1 = vcmask 1048512   ;;  %vm15_vm2 = vcmask 982912   ;;  %vm21_vm3 = vcmask 917312   ;;  %s207_s0 = inlined_call_operand.vmem [shape: f32[16,8], index: 0, kind: input, shape index: {}]   ;;  %s208_s1 = inlined_call_operand.vmem [shape: f32[1,128], index: 1, kind: output, shape index: {}]  }
   0x1   :  { %v101_v0 = vld [vmem:[%s207_s0 + $0xf] sm:$0x1]   ;;  %v103_v1 = vld [vmem:[%s207_s0 + $0xd] sm:$0x1]   ;;  %v102_v2 = vld [vmem:[%s207_s0 + $0xe] sm:$0x1]  }
   0x2   :  { %7 = vrot.lane.b32.xlu0 %v101_v0, %s131_s10  ;;  %19 = vrot.lane.b32.xlu1 %v103_v1, %s132_s11  ;;  %v104_v3 = vld [vmem:[%s207_s0 + $0xc] sm:$0x1]   ;;  %s133_s16 = smov 112   ;;  %s134_s17 = smov 96   ;;  %v105_v4 = vld [vmem:[%s207_s0 + $0xb] sm:$0x1]  }
   0x3   :  { %v106_v5 = vld [vmem:[%s207_s0 + $0xa] sm:$0x1]   ;;  %v2_v6 = vld [vmem:[%s207_s0] sm:$0x1]   ;;  %s135_s24 = smov 88   ;;  %s136_s25 = smov 80  }
   0x4   :  { %4 = vst.msk [vmem:[#allocation0] sm:$0x1] %vm3_vm0, %v2_v6   ;;  %v107_v7 = vld [vmem:[%s207_s0 + $0x9] sm:$0x1]   ;;  %v108_v8 = vld [vmem:[%s207_s0 + $0x8] sm:$0x1]  }
   0x5   :  { %s137_s30 = smov 72   ;;  %s138_s2 = smov 64   ;;  %v109_v9 = vld [vmem:[%s207_s0 + $0x7] sm:$0x1]   ;;  %v110_v10 = vld [vmem:[%s207_s0 + $0x6] sm:$0x1]  }
   0x6   :  { %13 = vrot.lane.b32.xlu0 %v102_v2, %s133_s16  ;;  %25 = vrot.lane.b32.xlu1 %v104_v3, %s134_s17  ;;  %s139_s7 = smov 56   ;;  %s140_s8 = smov 48   ;;  %v111_v11 = vld [vmem:[%s207_s0 + $0x5] sm:$0x1]   ;;  %v112_v12 = vld [vmem:[%s207_s0 + $0x4] sm:$0x1]  }
   0x7   :  { %s141_s13 = smov 40   ;;  %s142_s14 = smov 32   ;;  %v113_v13 = vld [vmem:[%s207_s0 + $0x3] sm:$0x1]   ;;  %v114_v14 = vld [vmem:[%s207_s0 + $0x2] sm:$0x1]  }
   0x8   :  { %s143_s19 = smov 24   ;;  %s144_s20 = smov 16   ;;  %v115_v15 = vld [vmem:[%s207_s0 + $0x1] sm:$0x1]   ;;  %vm27_vm4 = vcmask 851712   ;;  %vm33_vm5 = vcmask 786112  }
   0x9   :  { %s145_s0 = smov 8   ;;  %vm39_vm6 = vcmask 720512   ;;  %vm45_vm7 = vcmask 654912   ;;  %vm51_vm8 = vcmask 589312   ;;  %vm57_vm9 = vcmask 523712  }
   0xa   :  { %31 = vrot.lane.b32.xlu0 %v105_v4, %s135_s24  ;;  %37 = vrot.lane.b32.xlu1 %v106_v5, %s136_s25  ;;  %vm63_vm10 = vcmask 458112   ;;  %vm69_vm11 = vcmask 392512   ;;  %vm75_vm12 = vcmask 326912   ;;  %vm81_vm13 = vcmask 261312  }
   0xb   :  { %vm87_vm14 = vcmask 195712   ;;  %vm93_vm15 = vcmask 130112  }
   0xe   :  { %43 = vrot.lane.b32.xlu0 %v107_v7, %s137_s30  ;;  %49 = vrot.lane.b32.xlu1 %v108_v8, %s138_s2 }
  0x12   :  { %55 = vrot.lane.b32.xlu0 %v109_v9, %s139_s7  ;;  %61 = vrot.lane.b32.xlu1 %v110_v10, %s140_s8 }
  0x16   :  { %67 = vrot.lane.b32.xlu0 %v111_v11, %s141_s13  ;;  %73 = vrot.lane.b32.xlu1 %v112_v12, %s142_s14 }
  0x1a   :  { %79 = vrot.lane.b32.xlu0 %v113_v13, %s143_s19  ;;  %85 = vrot.lane.b32.xlu1 %v114_v14, %s144_s20 }
  0x1e   :  { %91 = vrot.lane.b32.xlu0 %v115_v15, %s145_s0 }
  0x74   :  { %v8_v16 = vpop.permute.xlu0 %7   ;;  %v20_v17 = vpop.permute.xlu1 %19  }
  0x75   :  { %10 = vst.msk [vmem:[#allocation0] sm:$0x1] %vm9_vm1, %v8_v16  }
  0x78   :  { %v14_v18 = vpop.permute.xlu0 %13   ;;  %v26_v19 = vpop.permute.xlu1 %25  }
  0x79   :  { %16 = vst.msk [vmem:[#allocation0] sm:$0x1] %vm15_vm2, %v14_v18  }
  0x7a   :  { %22 = vst.msk [vmem:[#allocation0] sm:$0x1] %vm21_vm3, %v20_v17  }
  0x7b   :  { %28 = vst.msk [vmem:[#allocation0] sm:$0x1] %vm27_vm4, %v26_v19  }
  0x7c   :  { %v32_v20 = vpop.permute.xlu0 %31   ;;  %v38_v21 = vpop.permute.xlu1 %37  }
  0x7d   :  { %34 = vst.msk [vmem:[#allocation0] sm:$0x1] %vm33_vm5, %v32_v20  }
  0x7e   :  { %40 = vst.msk [vmem:[#allocation0] sm:$0x1] %vm39_vm6, %v38_v21  }
  0x80   :  { %v44_v22 = vpop.permute.xlu0 %43   ;;  %v50_v23 = vpop.permute.xlu1 %49  }
  0x81   :  { %46 = vst.msk [vmem:[#allocation0] sm:$0x1] %vm45_vm7, %v44_v22  }
  0x82   :  { %52 = vst.msk [vmem:[#allocation0] sm:$0x1] %vm51_vm8, %v50_v23  }
  0x84   :  { %v56_v24 = vpop.permute.xlu0 %55   ;;  %v62_v25 = vpop.permute.xlu1 %61  }
  0x85   :  { %58 = vst.msk [vmem:[#allocation0] sm:$0x1] %vm57_vm9, %v56_v24  }
  0x86   :  { %64 = vst.msk [vmem:[#allocation0] sm:$0x1] %vm63_vm10, %v62_v25  }
  0x88   :  { %v68_v26 = vpop.permute.xlu0 %67   ;;  %v74_v27 = vpop.permute.xlu1 %73  }
  0x89   :  { %70 = vst.msk [vmem:[#allocation0] sm:$0x1] %vm69_vm11, %v68_v26  }
  0x8a   :  { %76 = vst.msk [vmem:[#allocation0] sm:$0x1] %vm75_vm12, %v74_v27  }
  0x8c   :  { %v80_v28 = vpop.permute.xlu0 %79   ;;  %v86_v29 = vpop.permute.xlu1 %85  }
  0x8d   :  { %82 = vst.msk [vmem:[#allocation0] sm:$0x1] %vm81_vm13, %v80_v28  }
  0x8e   :  { %88 = vst.msk [vmem:[#allocation0] sm:$0x1] %vm87_vm14, %v86_v29  }
  0x90   :  { %v92_v30 = vpop.permute.xlu0 %91  }
  0x91   :  { %94 = vst.msk [vmem:[#allocation0] sm:$0x1] %vm93_vm15, %v92_v30  }
  0x98   :  { %v98_v31 = vld [vmem:[#allocation0] sm:$0x1] }
  0x99   :  { %100 = vst [vmem:[%s208_s1] sm:$0x1] %v98_v31 }

// kernel: up_forward.3
= control target key start
LH: loop header
LB: loop body
LE: loop exit
PB: predicated region body
PF: predicated region fallthrough
CT: control target
= control target key end

     0   :  { %s6987_s21 = smov 0   ;;  %s8330_s0 = inlined_call_operand.vmem [shape: f32[2,8,16,64], index: 0, kind: input, shape index: {}]   ;;  %s8331_s1 = inlined_call_operand.vmem [shape: f32[2,8,16,64], index: 1, kind: input, shape index: {}]   ;;  %s8332_s2 = inlined_call_operand.vmem [shape: f32[3,3,64,128], index: 2, kind: input, shape index: {}]   ;;  %s8333_s3 = inlined_call_operand.vmem [shape: f32[3,3,64,128], index: 3, kind: input, shape index: {}]   ;;  %s8334_s4 = inlined_call_operand.vmem [shape: f32[1,128], index: 4, kind: input, shape index: {}]   ;;  %s8335_s5 = inlined_call_operand.vmem [shape: f32[2,8,16,128], index: 5, kind: output, shape index: {0}]   ;;  %s8336_s6 = inlined_call_operand.vmem [shape: f32[2,2,128], index: 6, kind: output, shape index: {1}]  }
   0x1 LB: > { %s4788_s22 = sadd.s32 4294967295, %s6949_s21   ;;  %p4792_p0 = scmp.ge.s32.totalorder %s6949_s21, 1  ;;  %s6949_s21 = sphi %s6987_s21, %s17_s21  }
   0x2   : > { %p225_p1 = scmp.lt.s32.totalorder %s6949_s21, 3 }
   0x4   : > { %p226_p2 = pnand %p4792_p0, %p225_p1 }
   0x6   : > { %229 = sbr.rel (%p226_p2) target bundleno = 570 (0x23a), region = 40 }
   0xd   : > { %v4800_v0 = vld [vmem:[%s8332_s2 + $0x40] sm:$0xff]  ;;  %v4801_v1 = vld [vmem:[%s8332_s2 + $0x48] sm:$0xff]  ;;  %vm283_vm0 = vcmask 523264   ;;  %vm286_vm1 = vcmask 517120   ;;  %v7016_v5 = vld [vmem:[%s8332_s2 + $0x50] sm:$0xff]  ;;  %v6951_v7 = vmov 0.0  }
   0xe   : > { %v7004_v2 = vld [vmem:[%s8333_s3] sm:$0xff]  ;;  %v7006_v3 = vpack.c.bf16 %v4801_v1, %v4800_v0  ;;  %v7011_v4 = vld [vmem:[%s8333_s3 + $0x8] sm:$0xff]  ;;  %v7021_v6 = vld [vmem:[%s8332_s2 + $0x58] sm:$0xff]  ;;  %284 = vst.msk [vmem:[#allocation2] sm:$0xff] %vm283_vm0, %v6951_v7  ;;  %p264_p3 = scmp.lt.s32.totalorder %s4788_s22, 1 }
   0xf   : > { %285 = vst.msk [vmem:[#allocation2 + $0x8] sm:$0xff] %vm283_vm0, %v6951_v7  ;;  %288 = vst.msk [vmem:[#allocation2 + $0x18] sm:$0xff] %vm283_vm0, %v6951_v7  ;;  %v6518_v8 = vpack.c.bf16 %v7011_v4, %v7004_v2  ;;  %v6378_v9 = vpack.c.bf16 %v7021_v6, %v7016_v5  ;;  %v2503_v10 = vld [vmem:[%s8333_s3 + $0x10] sm:$0xff]  ;;  %v2504_v11 = vld [vmem:[%s8333_s3 + $0x18] sm:$0xff] }
  0x10   : > { %289 = vst.msk [vmem:[#allocation2 + $0x20] sm:$0xff] %vm283_vm0, %v6951_v7  ;;  %291 = vst.msk [vmem:[#allocation2 + $0x30] sm:$0xff] %vm283_vm0, %v6951_v7  ;;  %v4804_v12 = vld [vmem:[%s8332_s2 + $0x60] sm:$0xff]  ;;  %6375 = vmatprep.subr.bf16.mxu1 %v7006_v3  ;;  %v6522_v13 = vpack.c.bf16 %v2504_v11, %v2503_v10  ;;  %v4805_v14 = vld [vmem:[%s8332_s2 + $0x68] sm:$0xff]  ;;  %s8425_s22 = smov (!%p264_p3, %s4788_s22), 1 }
  0x11   : > { %292 = vst.msk [vmem:[#allocation2 + $0x38] sm:$0xff] %vm283_vm0, %v6951_v7  ;;  %294 = vst.msk [vmem:[#allocation2 + $0x48] sm:$0xff] %vm283_vm0, %v6951_v7  ;;  %v2505_v15 = vld [vmem:[%s8333_s3 + $0x20] sm:$0xff]  ;;  %v2506_v16 = vld [vmem:[%s8333_s3 + $0x28] sm:$0xff]  ;;  %6519 = vmatprep.subr.bf16.mxu0 %v6518_v8  ;;  %6377 = vmatpush3.bf16.msra.mxu1 %v7006_v3  ;;  %v6382_v17 = vpack.c.bf16 %v4805_v14, %v4804_v12  ;;  %s7117_s27 = sshll.u32 %s8425_s22, 7 }
  0x12   : > { %295 = vst.msk [vmem:[#allocation2 + $0x50] sm:$0xff] %vm283_vm0, %v6951_v7  ;;  %297 = vst.msk [vmem:[#allocation2 + $0x60] sm:$0xff] %vm283_vm0, %v6951_v7  ;;  %6521 = vmatpush3.bf16.msra.mxu0 %v6518_v8  ;;  %6379 = vmatprep.subr.bf16.mxu1 %v6378_v9  ;;  %v4806_v18 = vld [vmem:[%s8332_s2 + $0x70] sm:$0xff]  ;;  %v6526_v19 = vpack.c.bf16 %v2506_v16, %v2505_v15  ;;  %v4807_v20 = vld [vmem:[%s8332_s2 + $0x78] sm:$0xff]  ;;  %s7132_s12 = scalar_lea.vmem %s8330_s0, %s7117_s27  ;;  %s7138_s15 = scalar_lea.vmem %s8331_s1, %s7117_s27 }
  0x13   : > { %298 = vst.msk [vmem:[#allocation2 + $0x68] sm:$0xff] %vm283_vm0, %v6951_v7  ;;  %300 = vst.msk [vmem:[#allocation2 + $0x78] sm:$0xff] %vm283_vm0, %v6951_v7  ;;  %6523 = vmatprep.subr.bf16.mxu0 %v6522_v13  ;;  %v2507_v21 = vld [vmem:[%s8333_s3 + $0x30] sm:$0xff]  ;;  %v2508_v22 = vld [vmem:[%s8333_s3 + $0x38] sm:$0xff]  ;;  %v6386_v28 = vpack.c.bf16 %v4807_v20, %v4806_v18  ;;  %s8289_s9 = scalar_lea.vmem %s8335_s5, %s7117_s27  ;;  %s4799_s27 = sshll.u32 %s8425_s22, 1 }
  0x14   : > { %301 = vst.msk [vmem:[#allocation2 + $0x80] sm:$0xff] %vm283_vm0, %v6951_v7  ;;  %303 = vst.msk [vmem:[#allocation2 + $0x90] sm:$0xff] %vm283_vm0, %v6951_v7  ;;  %v345_v23 = vld [vmem:[%s7132_s12] sm:$0xff]  ;;  %v346_v25 = vld [vmem:[%s7132_s12 + $0x8] sm:$0xff]  ;;  %v6530_v32 = vpack.c.bf16 %v2508_v22, %v2507_v21  ;;  %s282_s10 = scalar_lea.vmem %s8336_s6, %s4799_s27 }
  0x15   : > { %304 = vst.msk [vmem:[#allocation2 + $0x98] sm:$0xff] %vm283_vm0, %v6951_v7  ;;  %306 = vst.msk [vmem:[#allocation2 + $0xa8] sm:$0xff] %vm283_vm0, %v6951_v7  ;;  %v378_v24 = vld [vmem:[%s7138_s15] sm:$0xff]  ;;  %6381 = vmatpush3.bf16.msra.mxu1 %v6378_v9  ;;  %v379_v30 = vld [vmem:[%s7138_s15 + $0x8] sm:$0xff] }
  0x16   : > { %307 = vst.msk [vmem:[#allocation2 + $0xb0] sm:$0xff] %vm283_vm0, %v6951_v7  ;;  %309 = vst.msk [vmem:[#allocation2 + $0xc0] sm:$0xff] %vm283_vm0, %v6951_v7  ;;  %v435_v26 = vld [vmem:[#allocation2 + $0x1] sm:$0xff]  ;;  %6525 = vmatpush3.bf16.msra.mxu0 %v6522_v13  ;;  %6383 = vmatprep.subr.bf16.mxu1 %v6382_v17  ;;  %v347_v31 = vld [vmem:[%s7132_s12 + $0x10] sm:$0xff] }
  0x17   : > { %310 = vst.msk [vmem:[#allocation2 + $0xc8] sm:$0xff] %vm283_vm0, %v6951_v7  ;;  %312 = vst.msk [vmem:[#allocation2 + $0xd8] sm:$0xff] %vm283_vm0, %v6951_v7  ;;  %v427_v29 = vld [vmem:[%s8332_s2] sm:$0xff]  ;;  %6527 = vmatprep.subr.bf16.mxu0 %v6526_v19  ;;  %5670 = vmatprep.mubr.msk.f32.mxu1 %vm283_vm0, %v435_v26  ;;  %v428_v33 = vld [vmem:[%s8332_s2 + $0x8] sm:$0xff] }
  0x18   : > { %313 = vst.msk [vmem:[#allocation2 + $0xe0] sm:$0xff] %vm283_vm0, %v6951_v7  ;;  %315 = vst.msk [vmem:[#allocation3] sm:$0xff] %vm283_vm0, %v6951_v7  ;;  %v380_v34 = vld [vmem:[%s7138_s15 + $0x10] sm:$0xff]  ;;  %v348_v35 = vld [vmem:[%s7132_s12 + $0x18] sm:$0xff]  ;;  %v6390_v42 = vpack.c.bf16 %v428_v33, %v427_v29 }
  0x19   : > { %316 = vst.msk [vmem:[#allocation3 + $0x8] sm:$0xff] %vm283_vm0, %v6951_v7  ;;  %318 = vst.msk [vmem:[#allocation3 + $0x18] sm:$0xff] %vm283_vm0, %v6951_v7  ;;  %v5024_v36 = vld [vmem:[%s8333_s3 + $0x40] sm:$0xff]  ;;  %v5025_v37 = vld [vmem:[%s8333_s3 + $0x48] sm:$0xff]  ;;  %6385 = vmatpush3.bf16.msra.mxu1 %v6382_v17 }
  0x1a   : > { %319 = vst.msk [vmem:[#allocation3 + $0x20] sm:$0xff] %vm283_vm0, %v6951_v7  ;;  %321 = vst.msk [vmem:[#allocation3 + $0x30] sm:$0xff] %vm283_vm0, %v6951_v7  ;;  %v381_v38 = vld [vmem:[%s7138_s15 + $0x18] sm:$0xff]  ;;  %v349_v39 = vld [vmem:[%s7132_s12 + $0x20] sm:$0xff]  ;;  %6529 = vmatpush3.bf16.msra.mxu0 %v6526_v19  ;;  %6387 = vmatprep.subr.bf16.mxu1 %v6386_v28  ;;  %v6534_v46 = vpack.c.bf16 %v5025_v37, %v5024_v36 }
  0x1b   : > { %322 = vst.msk [vmem:[#allocation3 + $0x38] sm:$0xff] %vm283_vm0, %v6951_v7  ;;  %324 = vst.msk [vmem:[#allocation3 + $0x48] sm:$0xff] %vm283_vm0, %v6951_v7  ;;  %v382_v40 = vld [vmem:[%s7138_s15 + $0x20] sm:$0xff]  ;;  %v350_v41 = vld [vmem:[%s7132_s12 + $0x28] sm:$0xff]  ;;  %6531 = vmatprep.subr.bf16.mxu0 %v6530_v32 }
  0x1c   : > { %325 = vst.msk [vmem:[#allocation3 + $0x50] sm:$0xff] %vm283_vm0, %v6951_v7  ;;  %327 = vst.msk [vmem:[#allocation3 + $0x60] sm:$0xff] %vm283_vm0, %v6951_v7  ;;  %v383_v43 = vld [vmem:[%s7138_s15 + $0x28] sm:$0xff]  ;;  %v351_v44 = vld [vmem:[%s7132_s12 + $0x30] sm:$0xff] }
  0x1d   : > { %328 = vst.msk [vmem:[#allocation3 + $0x68] sm:$0xff] %vm283_vm0, %v6951_v7  ;;  %330 = vst.msk [vmem:[#allocation3 + $0x78] sm:$0xff] %vm283_vm0, %v6951_v7  ;;  %v384_v45 = vld [vmem:[%s7138_s15 + $0x30] sm:$0xff]  ;;  %v352_v47 = vld [vmem:[%s7132_s12 + $0x38] sm:$0xff]  ;;  %6389 = vmatpush3.bf16.msra.mxu1 %v6386_v28 }
  0x1e   : > { %331 = vst.msk [vmem:[#allocation3 + $0x80] sm:$0xff] %vm283_vm0, %v6951_v7  ;;  %333 = vst.msk [vmem:[#allocation3 + $0x90] sm:$0xff] %vm283_vm0, %v6951_v7  ;;  %v429_v49 = vld [vmem:[%s8332_s2 + $0x10] sm:$0xff]  ;;  %v430_v50 = vld [vmem:[%s8332_s2 + $0x18] sm:$0xff]  ;;  %6533 = vmatpush3.bf16.msra.mxu0 %v6530_v32  ;;  %6391 = vmatprep.subr.bf16.mxu1 %v6390_v42 }
  0x1f   : > { %334 = vst.msk [vmem:[#allocation3 + $0x98] sm:$0xff] %vm283_vm0, %v6951_v7  ;;  %336 = vst.msk [vmem:[#allocation3 + $0xa8] sm:$0xff] %vm283_vm0, %v6951_v7  ;;  %v2485_v27 = vld [vmem:[#allocation3] sm:$0xff]  ;;  %v5027_v52 = vld [vmem:[%s8333_s3 + $0x58] sm:$0xff]  ;;  %6535 = vmatprep.subr.bf16.mxu0 %v6534_v46  ;;  %v6394_v58 = vpack.c.bf16 %v430_v50, %v429_v49 }
  0x20   : > { %337 = vst.msk [vmem:[#allocation3 + $0xb0] sm:$0xff] %vm283_vm0, %v6951_v7  ;;  %339 = vst.msk [vmem:[#allocation3 + $0xc0] sm:$0xff] %vm283_vm0, %v6951_v7  ;;  %6030 = vmatprep.mubr.msk.f32.mxu0 %vm283_vm0, %v2485_v27  ;;  %v5026_v51 = vld [vmem:[%s8333_s3 + $0x50] sm:$0xff]  ;;  %v385_v53 = vld [vmem:[%s7138_s15 + $0x38] sm:$0xff] }
  0x21   : > { %340 = vst.msk [vmem:[#allocation3 + $0xc8] sm:$0xff] %vm283_vm0, %v6951_v7  ;;  %342 = vst.msk [vmem:[#allocation3 + $0xd8] sm:$0xff] %vm283_vm0, %v6951_v7  ;;  %v2486_v54 = vld [vmem:[#allocation3 + $0x8] sm:$0xff]  ;;  %v431_v55 = vld [vmem:[%s8332_s2 + $0x20] sm:$0xff]  ;;  %v6538_v62 = vpack.c.bf16 %v5027_v52, %v5026_v51 }
  0x22   : > { %343 = vst.msk [vmem:[#allocation3 + $0xe0] sm:$0xff] %vm283_vm0, %v6951_v7  ;;  %362 = vst.msk [vmem:[#allocation2 + $0x19] sm:$0xff] %vm283_vm0, %v345_v23  ;;  %v353_v56 = vld [vmem:[%s7132_s12 + $0x40] sm:$0xff]  ;;  %v432_v59 = vld [vmem:[%s8332_s2 + $0x28] sm:$0xff]  ;;  %6031 = vmatmul.mubr.msk.f32.vlgmr.msra.gmra.mrb[0].mxu0 %vm283_vm0, %v2486_v54 }
  0x23   : > { %287 = vst.msk [vmem:[#allocation2 + $0x10] sm:$0x3] %vm286_vm1, %v6951_v7  ;;  %290 = vst.msk [vmem:[#allocation2 + $0x28] sm:$0x3] %vm286_vm1, %v6951_v7  ;;  %v386_v60 = vld [vmem:[%s7138_s15 + $0x40] sm:$0xff]  ;;  %v354_v63 = vld [vmem:[%s7132_s12 + $0x48] sm:$0xff]  ;;  %6537 = vmatpush3.bf16.msra.mxu0 %v6534_v46  ;;  %v6398_v8 = vpack.c.bf16 %v432_v59, %v431_v55 }
  0x24   : > { %293 = vst.msk [vmem:[#allocation2 + $0x40] sm:$0x3] %vm286_vm1, %v6951_v7  ;;  %296 = vst.msk [vmem:[#allocation2 + $0x58] sm:$0x3] %vm286_vm1, %v6951_v7  ;;  %v387_v0 = vld [vmem:[%s7138_s15 + $0x48] sm:$0xff]  ;;  %v5028_v2 = vld [vmem:[%s8333_s3 + $0x60] sm:$0xff]  ;;  %6539 = vmatprep.subr.bf16.mxu0 %v6538_v62 }
  0x25   : > { %299 = vst.msk [vmem:[#allocation2 + $0x70] sm:$0x3] %vm286_vm1, %v6951_v7  ;;  %302 = vst.msk [vmem:[#allocation2 + $0x88] sm:$0x3] %vm286_vm1, %v6951_v7  ;;  %v5029_v3 = vld [vmem:[%s8333_s3 + $0x68] sm:$0xff]  ;;  %v355_v9 = vld [vmem:[%s7132_s12 + $0x50] sm:$0xff] }
  0x26   : > { %305 = vst.msk [vmem:[#allocation2 + $0xa0] sm:$0x3] %vm286_vm1, %v6951_v7  ;;  %308 = vst.msk [vmem:[#allocation2 + $0xb8] sm:$0x3] %vm286_vm1, %v6951_v7  ;;  %v388_v10 = vld [vmem:[%s7138_s15 + $0x50] sm:$0xff]  ;;  %v6542_v11 = vpack.c.bf16 %v5029_v3, %v5028_v2  ;;  %v356_v12 = vld [vmem:[%s7132_s12 + $0x58] sm:$0xff] }
  0x27   : > { %311 = vst.msk [vmem:[#allocation2 + $0xd0] sm:$0x3] %vm286_vm1, %v6951_v7  ;;  %314 = vst.msk [vmem:[#allocation2 + $0xe8] sm:$0x3] %vm286_vm1, %v6951_v7  ;;  %v433_v13 = vld [vmem:[%s8332_s2 + $0x30] sm:$0xff]  ;;  %v434_v14 = vld [vmem:[%s8332_s2 + $0x38] sm:$0xff]  ;;  %6541 = vmatpush3.bf16.msra.mxu0 %v6538_v62 }
  0x28   : > { %317 = vst.msk [vmem:[#allocation3 + $0x10] sm:$0x3] %vm286_vm1, %v6951_v7  ;;  %320 = vst.msk [vmem:[#allocation3 + $0x28] sm:$0x3] %vm286_vm1, %v6951_v7  ;;  %v389_v16 = vld [vmem:[%s7138_s15 + $0x58] sm:$0xff]  ;;  %v5030_v17 = vld [vmem:[%s8333_s3 + $0x70] sm:$0xff]  ;;  %v6402_v22 = vpack.c.bf16 %v434_v14, %v433_v13  ;;  %6543 = vmatprep.subr.bf16.mxu0 %v6542_v11 }
  0x29   : > { %323 = vst.msk [vmem:[#allocation3 + $0x40] sm:$0x3] %vm286_vm1, %v6951_v7  ;;  %326 = vst.msk [vmem:[#allocation3 + $0x58] sm:$0x3] %vm286_vm1, %v6951_v7  ;;  %v7202_v57 = vld [vmem:[#allocation2 + $0x19] sm:$0xff]  ;;  %v391_v26 = vld [vmem:[%s7138_s15 + $0x68] sm:$0xff] }
  0x2a   : > { %329 = vst.msk [vmem:[#allocation3 + $0x70] sm:$0x3] %vm286_vm1, %v6951_v7  ;;  %332 = vst.msk [vmem:[#allocation3 + $0x88] sm:$0x3] %vm286_vm1, %v6951_v7  ;;  %v436_v48 = vld [vmem:[#allocation2 + $0x9] sm:$0xff]  ;;  %v5031_v19 = vld [vmem:[%s8333_s3 + $0x78] sm:$0xff] }
  0x2b   : > { %335 = vst.msk [vmem:[#allocation3 + $0xa0] sm:$0x3] %vm286_vm1, %v6951_v7  ;;  %338 = vst.msk [vmem:[#allocation3 + $0xb8] sm:$0x3] %vm286_vm1, %v6951_v7  ;;  %5671 = vmatmul.mubr.msk.f32.vlgmr.msra.gmra.mrb[0].mxu1 %vm283_vm0, %v436_v48  ;;  %v357_v20 = vld [vmem:[%s7132_s12 + $0x60] sm:$0xff]  ;;  %6545 = vmatpush3.bf16.msra.mxu0 %v6542_v11  ;;  %v2718_v52 = vld [vmem:[#allocation3 + $0x1] sm:$0xff] }
  0x2c   : > { %341 = vst.msk [vmem:[#allocation3 + $0xd0] sm:$0x3] %vm286_vm1, %v6951_v7  ;;  %344 = vst.msk [vmem:[#allocation3 + $0xe8] sm:$0x3] %vm286_vm1, %v6951_v7  ;;  %6393 = vmatpush3.bf16.msra.mxu1 %v6390_v42  ;;  %5673 = vmatprep.mubr.msk.f32.mxu1 %vm283_vm0, %v7202_v57  ;;  %v390_v23 = vld [vmem:[%s7138_s15 + $0x60] sm:$0xff]  ;;  %v4843_v54 = vld [vmem:[%s8332_s2 + $0x98] sm:$0xff] }
  0x2d   : > { %395 = vst.msk [vmem:[#allocation3 + $0x19] sm:$0xff] %vm283_vm0, %v378_v24  ;;  %363 = vst.msk [vmem:[#allocation2 + $0x21] sm:$0xff] %vm283_vm0, %v346_v25  ;;  %6395 = vmatprep.subr.bf16.mxu1 %v6394_v58  ;;  %v358_v24 = vld [vmem:[%s7132_s12 + $0x68] sm:$0xff]  ;;  %v6546_v25 = vpack.c.bf16 %v5031_v19, %v5030_v17  ;;  %v411_v51 = vld [vmem:[#allocation2] sm:$0xff] }
  0x2e   : > { %396 = vst.msk [vmem:[#allocation3 + $0x21] sm:$0xff] %vm283_vm0, %v379_v30  ;;  %364 = vst.msk [vmem:[#allocation2 + $0x31] sm:$0xff] %vm283_vm0, %v347_v31  ;;  %v4840_v30 = vld [vmem:[%s8332_s2 + $0x80] sm:$0xff]  ;;  %v4841_v31 = vld [vmem:[%s8332_s2 + $0x88] sm:$0xff] }
  0x2f   : > { %397 = vst.msk [vmem:[#allocation3 + $0x31] sm:$0xff] %vm283_vm0, %v380_v34  ;;  %365 = vst.msk [vmem:[#allocation2 + $0x39] sm:$0xff] %vm283_vm0, %v348_v35  ;;  %v6406_v33 = vpack.c.bf16 %v4841_v31, %v4840_v30  ;;  %v5048_v34 = vld [vmem:[%s8333_s3 + $0x80] sm:$0xff]  ;;  %6547 = vmatprep.subr.bf16.mxu0 %v6546_v25  ;;  %v5049_v35 = vld [vmem:[%s8333_s3 + $0x88] sm:$0xff] }
  0x30   : > { %398 = vst.msk [vmem:[#allocation3 + $0x39] sm:$0xff] %vm283_vm0, %v381_v38  ;;  %366 = vst.msk [vmem:[#allocation2 + $0x49] sm:$0xff] %vm283_vm0, %v349_v39  ;;  %6397 = vmatpush3.bf16.msra.mxu1 %v6394_v58  ;;  %v6550_v37 = vpack.c.bf16 %v5049_v35, %v5048_v34  ;;  %6549 = vmatpush3.bf16.msra.mxu0 %v6546_v25  ;;  %v412_v55 = vld [vmem:[#allocation2 + $0x8] sm:$0xff]  ;;  %v5051_v58 = vld [vmem:[%s8333_s3 + $0x98] sm:$0xff] }
  0x31   : > { %399 = vst.msk [vmem:[#allocation3 + $0x49] sm:$0xff] %vm283_vm0, %v382_v40  ;;  %367 = vst.msk [vmem:[#allocation2 + $0x51] sm:$0xff] %vm283_vm0, %v350_v41  ;;  %6399 = vmatprep.subr.bf16.mxu1 %v6398_v8  ;;  %v2719_v59 = vld [vmem:[#allocation3 + $0x9] sm:$0xff]  ;;  %v4845_v3 = vld [vmem:[%s8332_s2 + $0xa8] sm:$0xff] }
  0x32   : > { %400 = vst.msk [vmem:[#allocation3 + $0x51] sm:$0xff] %vm283_vm0, %v383_v43  ;;  %368 = vst.msk [vmem:[#allocation2 + $0x61] sm:$0xff] %vm283_vm0, %v351_v44  ;;  %6551 = vmatprep.subr.bf16.mxu0 %v6550_v37  ;;  %v4844_v2 = vld [vmem:[%s8332_s2 + $0xa0] sm:$0xff]  ;;  %v4846_v17 = vld [vmem:[%s8332_s2 + $0xb0] sm:$0xff] }
  0x33   : > { %401 = vst.msk [vmem:[#allocation3 + $0x61] sm:$0xff] %vm283_vm0, %v384_v45  ;;  %369 = vst.msk [vmem:[#allocation2 + $0x69] sm:$0xff] %vm283_vm0, %v352_v47  ;;  %v6414_v14 = vpack.c.bf16 %v4845_v3, %v4844_v2  ;;  %v4847_v19 = vld [vmem:[%s8332_s2 + $0xb8] sm:$0xff]  ;;  %v4865_v34 = vld [vmem:[%s8332_s2 + $0xc8] sm:$0xff] }
  0x34   : > { %402 = vst.msk [vmem:[#allocation3 + $0x69] sm:$0xff] %vm283_vm0, %v385_v53  ;;  %370 = vst.msk [vmem:[#allocation2 + $0x79] sm:$0xff] %vm283_vm0, %v353_v56  ;;  %v7210_v61 = vld [vmem:[#allocation3 + $0x18] sm:$0xff]  ;;  %6401 = vmatpush3.bf16.msra.mxu1 %v6398_v8  ;;  %v4842_v53 = vld [vmem:[%s8332_s2 + $0x90] sm:$0xff]  ;;  %v6418_v30 = vpack.c.bf16 %v4847_v19, %v4846_v17 }
  0x35   : > { %403 = vst.msk [vmem:[#allocation3 + $0x79] sm:$0xff] %vm283_vm0, %v386_v60  ;;  %v7216_v1 = vld [vmem:[#allocation2 + $0x21] sm:$0xff]  ;;  %371 = vst.msk [vmem:[#allocation2 + $0x81] sm:$0xff] %vm283_vm0, %v354_v63  ;;  %v7228_v4 = vld [vmem:[#allocation3 + $0x20] sm:$0xff]  ;;  %6033 = vmatprep.mubr.msk.f32.mxu0 %vm283_vm0, %v7210_v61  ;;  %6403 = vmatprep.subr.bf16.mxu1 %v6402_v22  ;;  %v6410_v62 = vpack.c.bf16 %v4843_v54, %v4842_v53 }
  0x36   : > { %404 = vst.msk [vmem:[#allocation3 + $0x81] sm:$0xff] %vm283_vm0, %v387_v0  ;;  %v7230_v5 = vld [vmem:[#allocation2 + $0x31] sm:$0xff]  ;;  %v7232_v6 = vld [vmem:[#allocation3 + $0x30] sm:$0xff]  ;;  %5674 = vmatmul.mubr.msk.f32.gmra.mrb[2].mxu1 %vm283_vm0, %v7216_v1  ;;  %372 = vst.msk [vmem:[#allocation2 + $0x91] sm:$0xff] %vm283_vm0, %v355_v9  ;;  %6034 = vmatmul.mubr.msk.f32.gmra.mrb[2].mxu0 %vm283_vm0, %v7228_v4 }
  0x37   : > { %v7236_v7 = vld [vmem:[#allocation2 + $0x39] sm:$0xff]  ;;  %405 = vst.msk [vmem:[#allocation3 + $0x91] sm:$0xff] %vm283_vm0, %v388_v10  ;;  %5676 = vmatprep.mubr.msk.f32.mxu1 %vm283_vm0, %v7230_v5  ;;  %v7255_v15 = vld [vmem:[#allocation3 + $0x38] sm:$0xff]  ;;  %373 = vst.msk [vmem:[#allocation2 + $0x99] sm:$0xff] %vm283_vm0, %v356_v12  ;;  %6036 = vmatprep.mubr.msk.f32.mxu0 %vm283_vm0, %v7232_v6 }
  0x38   : > { %v7264_v18 = vld [vmem:[#allocation2 + $0x49] sm:$0xff]  ;;  %406 = vst.msk [vmem:[#allocation3 + $0x99] sm:$0xff] %vm283_vm0, %v389_v16  ;;  %v7271_v21 = vld [vmem:[#allocation3 + $0x48] sm:$0xff]  ;;  %374 = vst.msk [vmem:[#allocation2 + $0xa9] sm:$0xff] %vm283_vm0, %v357_v20  ;;  %6405 = vmatpush3.bf16.msra.mxu1 %v6402_v22 }
  0x39   : > { %407 = vst.msk [vmem:[#allocation3 + $0xa9] sm:$0xff] %vm283_vm0, %v390_v23  ;;  %375 = vst.msk [vmem:[#allocation2 + $0xb1] sm:$0xff] %vm283_vm0, %v358_v24  ;;  %v7285_v27 = vld [vmem:[#allocation2 + $0x51] sm:$0xff]  ;;  %v7287_v28 = vld [vmem:[#allocation3 + $0x50] sm:$0xff]  ;;  %6407 = vmatprep.subr.bf16.mxu1 %v6406_v33 }
  0x3a   : > { %5677 = vmatmul.mubr.msk.f32.gmra.mrb[4].mxu1 %vm283_vm0, %v7236_v7  ;;  %6037 = vmatmul.mubr.msk.f32.gmra.mrb[4].mxu0 %vm283_vm0, %v7255_v15  ;;  %408 = vst.msk [vmem:[#allocation3 + $0xb1] sm:$0xff] %vm283_vm0, %v391_v26  ;;  %v7292_v29 = vld [vmem:[#allocation2 + $0x61] sm:$0xff]  ;;  %v7300_v32 = vld [vmem:[#allocation3 + $0x60] sm:$0xff]  ;;  %v7386_v60 = vld [vmem:[#allocation2 + $0x18] sm:$0xff] }
  0x3b   : > { %5679 = vmatprep.mubr.msk.f32.mxu1 %vm283_vm0, %v7264_v18  ;;  %6039 = vmatprep.mubr.msk.f32.mxu0 %vm283_vm0, %v7271_v21  ;;  %v7314_v36 = vld [vmem:[#allocation2 + $0x69] sm:$0xff]  ;;  %v7318_v38 = vld [vmem:[#allocation3 + $0x68] sm:$0xff]  ;;  %v7398_v8 = vld [vmem:[#allocation2 + $0x20] sm:$0xff] }
  0x3c   : > { %v7320_v39 = vld [vmem:[#allocation2 + $0x79] sm:$0xff]  ;;  %v7322_v40 = vld [vmem:[#allocation3 + $0x78] sm:$0xff]  ;;  %v5050_v56 = vld [vmem:[%s8333_s3 + $0x90] sm:$0xff] }
  0x3d   : > { %v7330_v41 = vld [vmem:[#allocation2 + $0x81] sm:$0xff]  ;;  %v7334_v42 = vld [vmem:[#allocation3 + $0x80] sm:$0xff]  ;;  %v6554_v0 = vpack.c.bf16 %v5051_v58, %v5050_v56  ;;  %v7428_v20 = vld [vmem:[#allocation2 + $0x38] sm:$0xff] }
  0x3e   : > { %5680 = vmatmul.mubr.msk.f32.gmra.mrb[6].mxu1 %vm283_vm0, %v7285_v27  ;;  %6040 = vmatmul.mubr.msk.f32.gmra.mrb[6].mxu0 %vm283_vm0, %v7287_v28  ;;  %v7336_v43 = vld [vmem:[#allocation2 + $0x91] sm:$0xff]  ;;  %v7338_v44 = vld [vmem:[#allocation3 + $0x90] sm:$0xff]  ;;  %v7389_v63 = vld [vmem:[#allocation3 + $0x19] sm:$0xff] }
  0x3f   : > { %5682 = vmatprep.mubr.msk.f32.mxu1 %vm283_vm0, %v7292_v29  ;;  %6042 = vmatprep.mubr.msk.f32.mxu0 %vm283_vm0, %v7300_v32  ;;  %8366 = vst [vmem:[#allocation4_spill] sm:$0xff] %v7336_v43  ;;  %v7346_v45 = vld [vmem:[#allocation2 + $0x99] sm:$0xff]  ;;  %v7350_v46 = vld [vmem:[#allocation3 + $0x98] sm:$0xff]  ;;  %v7408_v11 = vld [vmem:[#allocation3 + $0x21] sm:$0xff] }
  0x40   : > { %8367 = vst [vmem:[#allocation5_spill] sm:$0xff] %v7346_v45  ;;  %v7352_v47 = vld [vmem:[#allocation2 + $0xa9] sm:$0xff]  ;;  %v7354_v48 = vld [vmem:[#allocation3 + $0xa8] sm:$0xff]  ;;  %v5052_v9 = vld [vmem:[%s8333_s3 + $0xa0] sm:$0xff] }
  0x41   : > { %8368 = vst [vmem:[#allocation6_spill] sm:$0xff] %v7352_v47  ;;  %v7362_v49 = vld [vmem:[#allocation2 + $0xb1] sm:$0xff]  ;;  %v7366_v50 = vld [vmem:[#allocation3 + $0xb0] sm:$0xff]  ;;  %v5053_v10 = vld [vmem:[%s8333_s3 + $0xa8] sm:$0xff] }
  0x42   : > { %5683 = vmatmul.mubr.msk.f32.gmra.mrb[8].mxu1 %vm283_vm0, %v7314_v36  ;;  %6043 = vmatmul.mubr.msk.f32.gmra.mrb[8].mxu0 %vm283_vm0, %v7318_v38  ;;  %8369 = vst [vmem:[#allocation7_spill] sm:$0xff] %v7362_v49  ;;  %v7410_v12 = vld [vmem:[#allocation2 + $0x30] sm:$0xff]  ;;  %v7414_v13 = vld [vmem:[#allocation3 + $0x31] sm:$0xff]  ;;  %v6558_v16 = vpack.c.bf16 %v5053_v10, %v5052_v9  ;;  %v5055_v23 = vld [vmem:[%s8333_s3 + $0xb8] sm:$0xff] }
  0x43   : > { %5685 = vmatprep.mubr.msk.f32.mxu1 %vm283_vm0, %v7320_v39  ;;  %6045 = vmatprep.mubr.msk.f32.mxu0 %vm283_vm0, %v7322_v40  ;;  %v5054_v22 = vld [vmem:[%s8333_s3 + $0xb0] sm:$0xff]  ;;  %v7440_v25 = vld [vmem:[#allocation2 + $0x48] sm:$0xff]  ;;  %v7442_v26 = vld [vmem:[#allocation3 + $0x49] sm:$0xff] }
  0x44   : > { %v7438_v24 = vld [vmem:[#allocation3 + $0x39] sm:$0xff]  ;;  %v6562_v31 = vpack.c.bf16 %v5055_v23, %v5054_v22  ;;  %v7468_v53 = vld [vmem:[#allocation2 + $0x60] sm:$0xff]  ;;  %v7470_v54 = vld [vmem:[#allocation3 + $0x61] sm:$0xff] }
  0x45   : > { %v7456_v35 = vld [vmem:[#allocation2 + $0x50] sm:$0xff]  ;;  %v7482_v58 = vld [vmem:[#allocation2 + $0x68] sm:$0xff]  ;;  %v7495_v2 = vld [vmem:[#allocation2 + $0x80] sm:$0xff] }
  0x46   : > { %5686 = vmatmul.mubr.msk.f32.gmra.mrb[10].mxu1 %vm283_vm0, %v7330_v41  ;;  %6046 = vmatmul.mubr.msk.f32.gmra.mrb[10].mxu0 %vm283_vm0, %v7334_v42  ;;  %v359_v3 = vld [vmem:[%s7132_s12 + $0x70] sm:$0xff]  ;;  %v360_v10 = vld [vmem:[%s7132_s12 + $0x78] sm:$0xff]  ;;  %v7515_v19 = vld [vmem:[#allocation3 + $0x91] sm:$0xff] }
  0x47   : > { %5688 = vmatprep.mubr.msk.f32.mxu1 %vm283_vm0, %v7336_v43  ;;  %6048 = vmatprep.mubr.msk.f32.mxu0 %vm283_vm0, %v7338_v44  ;;  %v392_v9 = vld [vmem:[%s7138_s15 + $0x70] sm:$0xff]  ;;  %376 = vst.msk [vmem:[#allocation2 + $0xc1] sm:$0xff] %vm283_vm0, %v359_v3  ;;  %377 = vst.msk [vmem:[#allocation2 + $0xc9] sm:$0xff] %vm283_vm0, %v360_v10  ;;  %v393_v17 = vld [vmem:[%s7138_s15 + $0x78] sm:$0xff] }
  0x48   : > { %409 = vst.msk [vmem:[#allocation3 + $0xc1] sm:$0xff] %vm283_vm0, %v392_v9  ;;  %8370 = vst [vmem:[#allocation8_spill] sm:$0xff] %v7515_v19  ;;  %v7524_v22 = vld [vmem:[#allocation2 + $0x98] sm:$0xff]  ;;  %v7528_v23 = vld [vmem:[#allocation3 + $0x99] sm:$0xff] }
  0x49   : > { %410 = vst.msk [vmem:[#allocation3 + $0xc9] sm:$0xff] %vm283_vm0, %v393_v17  ;;  %8371 = vst [vmem:[#allocation9_spill] sm:$0xff] %v7528_v23  ;;  %v4866_v3 = vld [vmem:[%s8332_s2 + $0xd0] sm:$0xff]  ;;  %v4867_v9 = vld [vmem:[%s8332_s2 + $0xd8] sm:$0xff] }
  0x4a   : > { %5689 = vmatmul.mubr.msk.f32.gmra.mrb[12].mxu1 %vm283_vm0, %v7346_v45  ;;  %6049 = vmatmul.mubr.msk.f32.gmra.mrb[12].mxu0 %vm283_vm0, %v7350_v46  ;;  %v847_v10 = vld [vmem:[#allocation2 + $0xa] sm:$0xff]  ;;  %v4868_v45 = vld [vmem:[%s8332_s2 + $0xe0] sm:$0xff] }
  0x4b   : > { %5691 = vmatprep.mubr.msk.f32.mxu1 %vm283_vm0, %v7352_v47  ;;  %6051 = vmatprep.mubr.msk.f32.mxu0 %vm283_vm0, %v7354_v48  ;;  %v5074_v17 = vld [vmem:[%s8333_s3 + $0xd0] sm:$0xff]  ;;  %v7564_v47 = vld [vmem:[#allocation2 + $0x1a] sm:$0xff] }
  0x4c   : > { %8374 = vst [vmem:[#allocation12_spill] sm:$0xff] %v7564_v47  ;;  %v4888_v43 = vld [vmem:[%s8332_s2 + $0x100] sm:$0xff] }
  0x4e   : > { %5692 = vmatmul.mubr.msk.f32.gmra.mrb[14].mxu1 %vm283_vm0, %v7362_v49  ;;  %6052 = vmatmul.mubr.msk.f32.gmra.mrb[14].mxu0 %vm283_vm0, %v7366_v50  ;;  %v5075_v49 = vld [vmem:[%s8333_s3 + $0xd8] sm:$0xff] }
  0x4f   : > { %5710 = vmatprep.mubr.msk.f32.mxu1 %vm283_vm0, %v411_v51  ;;  %6070 = vmatprep.mubr.msk.f32.mxu0 %vm283_vm0, %v2718_v52  ;;  %v5073_v51 = vld [vmem:[%s8333_s3 + $0xc8] sm:$0xff] }
  0x50   : > { %v7466_v52 = vld [vmem:[#allocation3 + $0x51] sm:$0xff] }
  0x52   : > { %5711 = vmatmul.mubr.msk.f32.vlgmr.msra.gmra.mrb[0].mxu1 %vm283_vm0, %v412_v55  ;;  %6071 = vmatmul.mubr.msk.f32.vlgmr.msra.gmra.mrb[0].mxu0 %vm283_vm0, %v2719_v59  ;;  %v7486_v59 = vld [vmem:[#allocation3 + $0x69] sm:$0xff] }
  0x53   : > { %6409 = vmatpush3.bf16.msra.mxu1 %v6406_v33  ;;  %6553 = vmatpush3.bf16.msra.mxu0 %v6550_v37  ;;  %v4864_v33 = vld [vmem:[%s8332_s2 + $0xc0] sm:$0xff] }
  0x54   : > { %5713 = vmatprep.mubr.msk.f32.mxu1 %vm283_vm0, %v7386_v60  ;;  %6073 = vmatprep.mubr.msk.f32.mxu0 %vm283_vm0, %v7389_v63  ;;  %v5072_v37 = vld [vmem:[%s8333_s3 + $0xc0] sm:$0xff]  ;;  %v7472_v55 = vpack.c.bf16 %v4865_v34, %v4864_v33  ;;  %v7540_v33 = vld [vmem:[#allocation2 + $0xb0] sm:$0xff] }
  0x55   : > { %6411 = vmatprep.subr.bf16.mxu1 %v6410_v62  ;;  %6555 = vmatprep.subr.bf16.mxu0 %v6554_v0  ;;  %v7476_v56 = vpack.c.bf16 %v5073_v51, %v5072_v37  ;;  %v7544_v34 = vld [vmem:[#allocation3 + $0xb1] sm:$0xff]  ;;  %v2952_v51 = vld [vmem:[#allocation3 + $0x2] sm:$0xff] }
  0x56   : > { %5714 = vmatmul.mubr.msk.f32.gmra.mrb[2].mxu1 %vm283_vm0, %v7398_v8  ;;  %6074 = vmatmul.mubr.msk.f32.gmra.mrb[2].mxu0 %vm283_vm0, %v7408_v11  ;;  %8373 = vst [vmem:[#allocation11_spill] sm:$0xff] %v7544_v34  ;;  %v846_v37 = vld [vmem:[#allocation2 + $0x2] sm:$0xff] }
  0x57   : > { %5716 = vmatprep.mubr.msk.f32.mxu1 %vm283_vm0, %v7410_v12  ;;  %6076 = vmatprep.mubr.msk.f32.mxu0 %vm283_vm0, %v7414_v13 }
  0x58   : > { %6413 = vmatpush3.bf16.msra.mxu1 %v6410_v62  ;;  %6557 = vmatpush3.bf16.msra.mxu0 %v6554_v0  ;;  %v7488_v62 = vld [vmem:[#allocation2 + $0x78] sm:$0xff]  ;;  %v7490_v0 = vld [vmem:[#allocation3 + $0x79] sm:$0xff] }
  0x59   : > { %6415 = vmatprep.subr.bf16.mxu1 %v6414_v14  ;;  %6559 = vmatprep.subr.bf16.mxu0 %v6558_v16 }
  0x5a   : > { %5717 = vmatmul.mubr.msk.f32.gmra.mrb[4].mxu1 %vm283_vm0, %v7428_v20  ;;  %6077 = vmatmul.mubr.msk.f32.gmra.mrb[4].mxu0 %vm283_vm0, %v7438_v24 }
  0x5b   : > { %5719 = vmatprep.mubr.msk.f32.mxu1 %vm283_vm0, %v7440_v25  ;;  %6079 = vmatprep.mubr.msk.f32.mxu0 %vm283_vm0, %v7442_v26 }
  0x5c   : > { %6417 = vmatpush3.bf16.msra.mxu1 %v6414_v14  ;;  %6561 = vmatpush3.bf16.msra.mxu0 %v6558_v16  ;;  %v7507_v14 = vld [vmem:[#allocation3 + $0x81] sm:$0xff] }
  0x5d   : > { %6419 = vmatprep.subr.bf16.mxu1 %v6418_v30  ;;  %6563 = vmatprep.subr.bf16.mxu0 %v6562_v31  ;;  %v7509_v16 = vld [vmem:[#allocation2 + $0x90] sm:$0xff] }
  0x5e   : > { %5720 = vmatmul.mubr.msk.f32.gmra.mrb[6].mxu1 %vm283_vm0, %v7456_v35  ;;  %6080 = vmatmul.mubr.msk.f32.gmra.mrb[6].mxu0 %vm283_vm0, %v7466_v52 }
  0x5f   : > { %5722 = vmatprep.mubr.msk.f32.mxu1 %vm283_vm0, %v7468_v53  ;;  %6082 = vmatprep.mubr.msk.f32.mxu0 %vm283_vm0, %v7470_v54 }
  0x60   : > { %6421 = vmatpush3.bf16.msra.mxu1 %v6418_v30  ;;  %6565 = vmatpush3.bf16.msra.mxu0 %v6562_v31  ;;  %v7530_v30 = vld [vmem:[#allocation2 + $0xa8] sm:$0xff]  ;;  %v7532_v31 = vld [vmem:[#allocation3 + $0xa9] sm:$0xff] }
  0x61   : > { %6423 = vmatprep.subr.bf16.mxu1 %v7472_v55  ;;  %6567 = vmatprep.subr.bf16.mxu0 %v7476_v56  ;;  %8372 = vst [vmem:[#allocation10_spill] sm:$0xff] %v7532_v31 }
  0x62   : > { %5723 = vmatmul.mubr.msk.f32.gmra.mrb[8].mxu1 %vm283_vm0, %v7482_v58  ;;  %6083 = vmatmul.mubr.msk.f32.gmra.mrb[8].mxu0 %vm283_vm0, %v7486_v59 }
  0x63   : > { %5725 = vmatprep.mubr.msk.f32.mxu1 %vm283_vm0, %v7488_v62  ;;  %6085 = vmatprep.mubr.msk.f32.mxu0 %vm283_vm0, %v7490_v0 }
  0x66   : > { %5726 = vmatmul.mubr.msk.f32.gmra.mrb[10].mxu1 %vm283_vm0, %v7495_v2  ;;  %6086 = vmatmul.mubr.msk.f32.gmra.mrb[10].mxu0 %vm283_vm0, %v7507_v14 }
  0x67   : > { %5728 = vmatprep.mubr.msk.f32.mxu1 %vm283_vm0, %v7509_v16  ;;  %6088 = vmatprep.mubr.msk.f32.mxu0 %vm283_vm0, %v7515_v19  ;;  %v4869_v19 = vld [vmem:[%s8332_s2 + $0xe8] sm:$0xff] }
  0x6a   : > { %5729 = vmatmul.mubr.msk.f32.gmra.mrb[12].mxu1 %vm283_vm0, %v7524_v22  ;;  %6089 = vmatmul.mubr.msk.f32.gmra.mrb[12].mxu0 %vm283_vm0, %v7528_v23  ;;  %v6426_v23 = vpack.c.bf16 %v4867_v9, %v4866_v3  ;;  %v5076_v3 = vld [vmem:[%s8333_s3 + $0xe0] sm:$0xff]  ;;  %v7588_v9 = vld [vmem:[#allocation3 + $0x22] sm:$0xff] }
  0x6b   : > { %5731 = vmatprep.mubr.msk.f32.mxu1 %vm283_vm0, %v7530_v30  ;;  %6091 = vmatprep.mubr.msk.f32.mxu0 %vm283_vm0, %v7532_v31  ;;  %v2953_v31 = vld [vmem:[#allocation3 + $0xa] sm:$0xff]  ;;  %8377 = vst [vmem:[#allocation15_spill] sm:$0xff] %v7588_v9 }
  0x6e   : > { %5732 = vmatmul.mubr.msk.f32.gmra.mrb[14].mxu1 %vm283_vm0, %v7540_v33  ;;  %6092 = vmatmul.mubr.msk.f32.gmra.mrb[14].mxu0 %vm283_vm0, %v7544_v34  ;;  %v7567_v34 = vld [vmem:[#allocation3 + $0x1a] sm:$0xff] }
  0x6f   : > { %5750 = vmatprep.mubr.msk.f32.mxu1 %vm283_vm0, %v846_v37  ;;  %6110 = vmatprep.mubr.msk.f32.mxu0 %vm283_vm0, %v2952_v51  ;;  %8375 = vst [vmem:[#allocation13_spill] sm:$0xff] %v7567_v34  ;;  %v6570_v37 = vpack.c.bf16 %v5075_v49, %v5074_v17  ;;  %v7577_v51 = vld [vmem:[#allocation2 + $0x22] sm:$0xff] }
  0x70   : > { %8376 = vst [vmem:[#allocation14_spill] sm:$0xff] %v7577_v51  ;;  %v5077_v49 = vld [vmem:[%s8333_s3 + $0xe8] sm:$0xff] }
  0x71   : > { %v6574_v17 = vpack.c.bf16 %v5077_v49, %v5076_v3  ;;  %v5079_v3 = vld [vmem:[%s8333_s3 + $0xf8] sm:$0xff]  ;;  %v7618_v49 = vld [vmem:[#allocation3 + $0x3a] sm:$0xff] }
  0x72   : > { %5751 = vmatmul.mubr.msk.f32.vlgmr.msra.gmra.mrb[0].mxu1 %vm283_vm0, %v847_v10  ;;  %6111 = vmatmul.mubr.msk.f32.vlgmr.msra.gmra.mrb[0].mxu0 %vm283_vm0, %v2953_v31  ;;  %v7590_v31 = vld [vmem:[#allocation2 + $0x32] sm:$0xff]  ;;  %v6430_v10 = vpack.c.bf16 %v4869_v19, %v4868_v45  ;;  %v7608_v45 = vld [vmem:[#allocation2 + $0x3a] sm:$0xff]  ;;  %8380 = vst [vmem:[#allocation18_spill] sm:$0xff] %v7618_v49 }
  0x73   : > { %6425 = vmatpush3.bf16.msra.mxu1 %v7472_v55  ;;  %6569 = vmatpush3.bf16.msra.mxu0 %v7476_v56  ;;  %8378 = vst [vmem:[#allocation16_spill] sm:$0xff] %v7590_v31  ;;  %v7594_v55 = vld [vmem:[#allocation3 + $0x32] sm:$0xff]  ;;  %v4870_v56 = vld [vmem:[%s8332_s2 + $0xf0] sm:$0xff]  ;;  %8379 = vst [vmem:[#allocation17_spill] sm:$0xff] %v7608_v45 }
  0x74   : > { %5753 = vmatprep.mubr.msk.f32.mxu1 %vm283_vm0, %v7564_v47  ;;  %6113 = vmatprep.mubr.msk.f32.mxu0 %vm283_vm0, %v7567_v34  ;;  %v4871_v47 = vld [vmem:[%s8332_s2 + $0xf8] sm:$0xff]  ;;  %v5078_v19 = vld [vmem:[%s8333_s3 + $0xf0] sm:$0xff] }
  0x75   : > { %6427 = vmatprep.subr.bf16.mxu1 %v6426_v23  ;;  %6571 = vmatprep.subr.bf16.mxu0 %v6570_v37  ;;  %v6578_v34 = vpack.c.bf16 %v5079_v3, %v5078_v19  ;;  %v7646_v19 = vld [vmem:[#allocation3 + $0x52] sm:$0xff] }
  0x76   : > { %5754 = vmatmul.mubr.msk.f32.gmra.mrb[2].mxu1 %vm283_vm0, %v7577_v51  ;;  %6114 = vmatmul.mubr.msk.f32.gmra.mrb[2].mxu0 %vm283_vm0, %v7588_v9  ;;  %v7620_v9 = vld [vmem:[#allocation2 + $0x4a] sm:$0xff]  ;;  %v6434_v51 = vpack.c.bf16 %v4871_v47, %v4870_v56  ;;  %v7636_v47 = vld [vmem:[#allocation2 + $0x52] sm:$0xff]  ;;  %v7648_v3 = vld [vmem:[#allocation2 + $0x62] sm:$0xff] }
  0x77   : > { %5756 = vmatprep.mubr.msk.f32.mxu1 %vm283_vm0, %v7590_v31  ;;  %6116 = vmatprep.mubr.msk.f32.mxu0 %vm283_vm0, %v7594_v55  ;;  %8381 = vst [vmem:[#allocation19_spill] sm:$0xff] %v7620_v9  ;;  %v7622_v31 = vld [vmem:[#allocation3 + $0x4a] sm:$0xff]  ;;  %v5097_v56 = vld [vmem:[%s8333_s3 + $0x108] sm:$0xff] }
  0x78   : > { %6429 = vmatpush3.bf16.msra.mxu1 %v6426_v23  ;;  %6573 = vmatpush3.bf16.msra.mxu0 %v6570_v37  ;;  %8382 = vst [vmem:[#allocation20_spill] sm:$0xff] %v7622_v31  ;;  %v4889_v23 = vld [vmem:[%s8332_s2 + $0x108] sm:$0xff]  ;;  %v5096_v37 = vld [vmem:[%s8333_s3 + $0x100] sm:$0xff] }
  0x79   : > { %6431 = vmatprep.subr.bf16.mxu1 %v6430_v10  ;;  %6575 = vmatprep.subr.bf16.mxu0 %v6574_v17 }
  0x7a   : > { %5757 = vmatmul.mubr.msk.f32.gmra.mrb[4].mxu1 %vm283_vm0, %v7608_v45  ;;  %6117 = vmatmul.mubr.msk.f32.gmra.mrb[4].mxu0 %vm283_vm0, %v7618_v49  ;;  %v7650_v49 = vld [vmem:[#allocation3 + $0x62] sm:$0xff]  ;;  %v6582_v45 = vpack.c.bf16 %v5097_v56, %v5096_v37  ;;  %v7690_v56 = vld [vmem:[#allocation2 + $0x9a] sm:$0xff] }
  0x7b   : > { %5759 = vmatprep.mubr.msk.f32.mxu1 %vm283_vm0, %v7620_v9  ;;  %6119 = vmatprep.mubr.msk.f32.mxu0 %vm283_vm0, %v7622_v31  ;;  %v6438_v9 = vpack.c.bf16 %v4889_v23, %v4888_v43  ;;  %v7658_v31 = vld [vmem:[#allocation2 + $0x6a] sm:$0xff]  ;;  %v7674_v23 = vld [vmem:[#allocation2 + $0x82] sm:$0xff]  ;;  %v7680_v37 = vld [vmem:[#allocation2 + $0x92] sm:$0xff]  ;;  %8389 = vst [vmem:[#allocation27_spill] sm:$0xff] %v7690_v56 }
  0x7c   : > { %6433 = vmatpush3.bf16.msra.mxu1 %v6430_v10  ;;  %6577 = vmatpush3.bf16.msra.mxu0 %v6574_v17  ;;  %v7662_v10 = vld [vmem:[#allocation3 + $0x6a] sm:$0xff]  ;;  %v7666_v43 = vld [vmem:[#allocation3 + $0x7a] sm:$0xff]  ;;  %8387 = vst [vmem:[#allocation25_spill] sm:$0xff] %v7680_v37 }
  0x7d   : > { %6435 = vmatprep.subr.bf16.mxu1 %v6434_v51  ;;  %6579 = vmatprep.subr.bf16.mxu0 %v6578_v34  ;;  %8383 = vst [vmem:[#allocation21_spill] sm:$0xff] %v7662_v10  ;;  %v7664_v17 = vld [vmem:[#allocation2 + $0x7a] sm:$0xff]  ;;  %8385 = vst [vmem:[#allocation23_spill] sm:$0xff] %v7666_v43 }
  0x7e   : > { %5760 = vmatmul.mubr.msk.f32.gmra.mrb[6].mxu1 %vm283_vm0, %v7636_v47  ;;  %6120 = vmatmul.mubr.msk.f32.gmra.mrb[6].mxu0 %vm283_vm0, %v7646_v19  ;;  %8384 = vst [vmem:[#allocation22_spill] sm:$0xff] %v7664_v17 }
  0x7f   : > { %5762 = vmatprep.mubr.msk.f32.mxu1 %vm283_vm0, %v7648_v3  ;;  %6122 = vmatprep.mubr.msk.f32.mxu0 %vm283_vm0, %v7650_v49 }
  0x80   : > { %6437 = vmatpush3.bf16.msra.mxu1 %v6434_v51  ;;  %6581 = vmatpush3.bf16.msra.mxu0 %v6578_v34  ;;  %v7678_v51 = vld [vmem:[#allocation3 + $0x82] sm:$0xff]  ;;  %v7682_v34 = vld [vmem:[#allocation3 + $0x92] sm:$0xff] }
  0x81   : > { %6439 = vmatprep.subr.bf16.mxu1 %v6438_v9  ;;  %6583 = vmatprep.subr.bf16.mxu0 %v6582_v45  ;;  %8386 = vst [vmem:[#allocation24_spill] sm:$0xff] %v7678_v51  ;;  %8388 = vst [vmem:[#allocation26_spill] sm:$0xff] %v7682_v34 }
  0x82   : > { %5763 = vmatmul.mubr.msk.f32.gmra.mrb[8].mxu1 %vm283_vm0, %v7658_v31  ;;  %6123 = vmatmul.mubr.msk.f32.gmra.mrb[8].mxu0 %vm283_vm0, %v7662_v10  ;;  %v7698_v10 = vld [vmem:[#allocation3 + $0xaa] sm:$0xff] }
  0x83   : > { %5765 = vmatprep.mubr.msk.f32.mxu1 %vm283_vm0, %v7664_v17  ;;  %6125 = vmatprep.mubr.msk.f32.mxu0 %vm283_vm0, %v7666_v43  ;;  %v7694_v43 = vld [vmem:[#allocation3 + $0x9a] sm:$0xff]  ;;  %8392 = vst [vmem:[#allocation30_spill] sm:$0xff] %v7698_v10 }
  0x84   : > { %8390 = vst [vmem:[#allocation28_spill] sm:$0xff] %v7694_v43  ;;  %v7696_v17 = vld [vmem:[#allocation2 + $0xaa] sm:$0xff] }
  0x85   : > { %8391 = vst [vmem:[#allocation29_spill] sm:$0xff] %v7696_v17 }
  0x86   : > { %5766 = vmatmul.mubr.msk.f32.gmra.mrb[10].mxu1 %vm283_vm0, %v7674_v23  ;;  %6126 = vmatmul.mubr.msk.f32.gmra.mrb[10].mxu0 %vm283_vm0, %v7678_v51 }
  0x87   : > { %5768 = vmatprep.mubr.msk.f32.mxu1 %vm283_vm0, %v7680_v37  ;;  %6128 = vmatprep.mubr.msk.f32.mxu0 %vm283_vm0, %v7682_v34  ;;  %v7706_v37 = vld [vmem:[#allocation2 + $0xb2] sm:$0xff]  ;;  %v7710_v34 = vld [vmem:[#allocation3 + $0xb2] sm:$0xff] }
  0x88   : > { %8393 = vst [vmem:[#allocation31_spill] sm:$0xff] %v7706_v37  ;;  %8394 = vst [vmem:[#allocation32_spill] sm:$0xff] %v7710_v34 }
  0x8a   : > { %5769 = vmatmul.mubr.msk.f32.gmra.mrb[12].mxu1 %vm283_vm0, %v7690_v56  ;;  %6129 = vmatmul.mubr.msk.f32.gmra.mrb[12].mxu0 %vm283_vm0, %v7694_v43  ;;  %v4890_v56 = vld [vmem:[%s8332_s2 + $0x110] sm:$0xff]  ;;  %v4891_v43 = vld [vmem:[%s8332_s2 + $0x118] sm:$0xff] }
  0x8b   : > { %5771 = vmatprep.mubr.msk.f32.mxu1 %vm283_vm0, %v7696_v17  ;;  %6131 = vmatprep.mubr.msk.f32.mxu0 %vm283_vm0, %v7698_v10  ;;  %v5098_v10 = vld [vmem:[%s8333_s3 + $0x110] sm:$0xff]  ;;  %v6442_v17 = vpack.c.bf16 %v4891_v43, %v4890_v56  ;;  %v5103_v43 = vld [vmem:[%s8333_s3 + $0x138] sm:$0xff]  ;;  %v4913_v56 = vld [vmem:[%s8332_s2 + $0x148] sm:$0xff] }
  0x8e   : > { %5772 = vmatmul.mubr.msk.f32.gmra.mrb[14].mxu1 %vm283_vm0, %v7706_v37  ;;  %6132 = vmatmul.mubr.msk.f32.gmra.mrb[14].mxu0 %vm283_vm0, %v7710_v34  ;;  %v5099_v37 = vld [vmem:[%s8333_s3 + $0x118] sm:$0xff]  ;;  %v4893_v34 = vld [vmem:[%s8332_s2 + $0x128] sm:$0xff] }
  0x8f   : > { %5790 = vmatprep.mubr.msk.f32.mxu1 %vm283_vm0, %v7386_v60  ;;  %6150 = vmatprep.mubr.msk.f32.mxu0 %vm283_vm0, %v7210_v61  ;;  %v6586_v51 = vpack.c.bf16 %v5099_v37, %v5098_v10  ;;  %v4892_v60 = vld [vmem:[%s8332_s2 + $0x120] sm:$0xff] }
  0x90   : > { %v5100_v61 = vld [vmem:[%s8333_s3 + $0x120] sm:$0xff]  ;;  %v6446_v10 = vpack.c.bf16 %v4893_v34, %v4892_v60 }
  0x91   : > { %v4912_v34 = vld [vmem:[%s8332_s2 + $0x140] sm:$0xff] }
  0x92   : > { %5791 = vmatmul.mubr.msk.f32.vlgmr.msra.gmra.mrb[0].mxu1 %vm283_vm0, %v7398_v8  ;;  %6151 = vmatmul.mubr.msk.f32.vlgmr.msra.gmra.mrb[0].mxu0 %vm283_vm0, %v7228_v4  ;;  %v5101_v8 = vld [vmem:[%s8333_s3 + $0x128] sm:$0xff] }
  0x93   : > { %6441 = vmatpush3.bf16.msra.mxu1 %v6438_v9  ;;  %6585 = vmatpush3.bf16.msra.mxu0 %v6582_v45  ;;  %v6590_v4 = vpack.c.bf16 %v5101_v8, %v5100_v61  ;;  %v4894_v9 = vld [vmem:[%s8332_s2 + $0x130] sm:$0xff]  ;;  %v4895_v45 = vld [vmem:[%s8332_s2 + $0x138] sm:$0xff]  ;;  %v4917_v8 = vld [vmem:[%s8332_s2 + $0x168] sm:$0xff] }
  0x94   : > { %5793 = vmatprep.mubr.msk.f32.mxu1 %vm283_vm0, %v7410_v12  ;;  %6153 = vmatprep.mubr.msk.f32.mxu0 %vm283_vm0, %v7232_v6  ;;  %v5102_v6 = vld [vmem:[%s8333_s3 + $0x130] sm:$0xff]  ;;  %v6450_v37 = vpack.c.bf16 %v4895_v45, %v4894_v9  ;;  %v4919_v9 = vld [vmem:[%s8332_s2 + $0x178] sm:$0xff]  ;;  %v4937_v45 = vld [vmem:[%s8332_s2 + $0x188] sm:$0xff] }
  0x95   : > { %6443 = vmatprep.subr.bf16.mxu1 %v6442_v17  ;;  %6587 = vmatprep.subr.bf16.mxu0 %v6586_v51 }
  0x96   : > { %5794 = vmatmul.mubr.msk.f32.gmra.mrb[2].mxu1 %vm283_vm0, %v7428_v20  ;;  %6154 = vmatmul.mubr.msk.f32.gmra.mrb[2].mxu0 %vm283_vm0, %v7255_v15  ;;  %v6594_v15 = vpack.c.bf16 %v5103_v43, %v5102_v6  ;;  %v8401_v43 = vld [vmem:[#allocation7_spill] sm:$0xff] }
  0x97   : > { %5796 = vmatprep.mubr.msk.f32.mxu1 %vm283_vm0, %v7440_v25  ;;  %6156 = vmatprep.mubr.msk.f32.mxu0 %vm283_vm0, %v7271_v21  ;;  %v5120_v21 = vld [vmem:[%s8333_s3 + $0x140] sm:$0xff] }
  0x98   : > { %6445 = vmatpush3.bf16.msra.mxu1 %v6442_v17  ;;  %6589 = vmatpush3.bf16.msra.mxu0 %v6586_v51  ;;  %v5121_v17 = vld [vmem:[%s8333_s3 + $0x148] sm:$0xff]  ;;  %v6454_v51 = vpack.c.bf16 %v4913_v56, %v4912_v34  ;;  %v7950_v34 = vld [vmem:[#allocation3 + $0xc9] sm:$0xff]  ;;  %v4938_v56 = vld [vmem:[%s8332_s2 + $0x190] sm:$0xff] }
  0x99   : > { %6447 = vmatprep.subr.bf16.mxu1 %v6446_v10  ;;  %6591 = vmatprep.subr.bf16.mxu0 %v6590_v4 }
  0x9a   : > { %5797 = vmatmul.mubr.msk.f32.gmra.mrb[4].mxu1 %vm283_vm0, %v7456_v35  ;;  %6157 = vmatmul.mubr.msk.f32.gmra.mrb[4].mxu0 %vm283_vm0, %v7287_v28  ;;  %v6598_v28 = vpack.c.bf16 %v5121_v17, %v5120_v21  ;;  %v4939_v21 = vld [vmem:[%s8332_s2 + $0x198] sm:$0xff]  ;;  %v8403_v17 = vld [vmem:[#allocation12_spill] sm:$0xff] }
  0x9b   : > { %5799 = vmatprep.mubr.msk.f32.mxu1 %vm283_vm0, %v7468_v53  ;;  %6159 = vmatprep.mubr.msk.f32.mxu0 %vm283_vm0, %v7300_v32  ;;  %v7816_v32 = vld [vmem:[#allocation2 + $0xc0] sm:$0xff] }
  0x9c   : > { %6449 = vmatpush3.bf16.msra.mxu1 %v6446_v10  ;;  %6593 = vmatpush3.bf16.msra.mxu0 %v6590_v4  ;;  %v4918_v4 = vld [vmem:[%s8332_s2 + $0x170] sm:$0xff] }
  0x9d   : > { %6451 = vmatprep.subr.bf16.mxu1 %v6450_v37  ;;  %6595 = vmatprep.subr.bf16.mxu0 %v6594_v15 }
  0x9e   : > { %5800 = vmatmul.mubr.msk.f32.gmra.mrb[6].mxu1 %vm283_vm0, %v7482_v58  ;;  %6160 = vmatmul.mubr.msk.f32.gmra.mrb[6].mxu0 %vm283_vm0, %v7318_v38  ;;  %v7818_v38 = vld [vmem:[#allocation3 + $0xc0] sm:$0xff] }
  0x9f   : > { %5802 = vmatprep.mubr.msk.f32.mxu1 %vm283_vm0, %v7488_v62  ;;  %6162 = vmatprep.mubr.msk.f32.mxu0 %vm283_vm0, %v7322_v40  ;;  %v7826_v40 = vld [vmem:[#allocation2 + $0xc8] sm:$0xff] }
  0xa0   : > { %6453 = vmatpush3.bf16.msra.mxu1 %v6450_v37  ;;  %6597 = vmatpush3.bf16.msra.mxu0 %v6594_v15  ;;  %v8402_v37 = vld [vmem:[#allocation11_spill] sm:$0xff]  ;;  %v7946_v15 = vld [vmem:[#allocation2 + $0xc9] sm:$0xff] }
  0xa1   : > { %6455 = vmatprep.subr.bf16.mxu1 %v6454_v51  ;;  %6599 = vmatprep.subr.bf16.mxu0 %v6598_v28 }
  0xa2   : > { %5803 = vmatmul.mubr.msk.f32.gmra.mrb[8].mxu1 %vm283_vm0, %v7495_v2  ;;  %6163 = vmatmul.mubr.msk.f32.gmra.mrb[8].mxu0 %vm283_vm0, %v7334_v42  ;;  %v7830_v42 = vld [vmem:[#allocation3 + $0xc8] sm:$0xff] }
  0xa3   : > { %5805 = vmatprep.mubr.msk.f32.mxu1 %vm283_vm0, %v7509_v16  ;;  %6165 = vmatprep.mubr.msk.f32.mxu0 %vm283_vm0, %v7338_v44  ;;  %v4914_v44 = vld [vmem:[%s8332_s2 + $0x150] sm:$0xff] }
  0xa6   : > { %5806 = vmatmul.mubr.msk.f32.gmra.mrb[10].mxu1 %vm283_vm0, %v7524_v22  ;;  %6166 = vmatmul.mubr.msk.f32.gmra.mrb[10].mxu0 %vm283_vm0, %v7350_v46  ;;  %v4915_v46 = vld [vmem:[%s8332_s2 + $0x158] sm:$0xff] }
  0xa7   : > { %5808 = vmatprep.mubr.msk.f32.mxu1 %vm283_vm0, %v7530_v30  ;;  %6168 = vmatprep.mubr.msk.f32.mxu0 %vm283_vm0, %v7354_v48  ;;  %v5122_v48 = vld [vmem:[%s8333_s3 + $0x150] sm:$0xff]  ;;  %v6458_v60 = vpack.c.bf16 %v4915_v46, %v4914_v44  ;;  %v8404_v44 = vld [vmem:[#allocation13_spill] sm:$0xff]  ;;  %v6474_v46 = vpack.c.bf16 %v4939_v21, %v4938_v56  ;;  %v8422_v21 = vld [vmem:[#allocation31_spill] sm:$0xff] }
  0xa8   : > { %v8058_v56 = vld [vmem:[#allocation3 + $0xc2] sm:$0xff] }
  0xaa   : > { %5809 = vmatmul.mubr.msk.f32.gmra.mrb[12].mxu1 %vm283_vm0, %v7540_v33  ;;  %6169 = vmatmul.mubr.msk.f32.gmra.mrb[12].mxu0 %vm283_vm0, %v7366_v50  ;;  %v5123_v50 = vld [vmem:[%s8333_s3 + $0x158] sm:$0xff] }
  0xab   : > { %5811 = vmatprep.mubr.msk.f32.mxu1 %vm283_vm0, %v7816_v32  ;;  %6171 = vmatprep.mubr.msk.f32.mxu0 %vm283_vm0, %v7818_v38  ;;  %v6602_v61 = vpack.c.bf16 %v5123_v50, %v5122_v48  ;;  %v8405_v48 = vld [vmem:[#allocation14_spill] sm:$0xff] }
  0xae   : > { %5812 = vmatmul.mubr.msk.f32.gmra.mrb[14].mxu1 %vm283_vm0, %v7826_v40  ;;  %6172 = vmatmul.mubr.msk.f32.gmra.mrb[14].mxu0 %vm283_vm0, %v7830_v42 }
  0xaf   : > { %5830 = vmatprep.mubr.msk.f32.mxu1 %vm283_vm0, %v7202_v57  ;;  %6190 = vmatprep.mubr.msk.f32.mxu0 %vm283_vm0, %v7389_v63  ;;  %v4916_v57 = vld [vmem:[%s8332_s2 + $0x160] sm:$0xff] }
  0xb0   : > { %v5124_v63 = vld [vmem:[%s8333_s3 + $0x160] sm:$0xff]  ;;  %v6462_v10 = vpack.c.bf16 %v4917_v8, %v4916_v57  ;;  %v8406_v57 = vld [vmem:[#allocation15_spill] sm:$0xff] }
  0xb1   : > { %v5148_v8 = vld [vmem:[%s8333_s3 + $0x1a0] sm:$0xff] }
  0xb2   : > { %5831 = vmatmul.mubr.msk.f32.vlgmr.msra.gmra.mrb[0].mxu1 %vm283_vm0, %v7216_v1  ;;  %6191 = vmatmul.mubr.msk.f32.vlgmr.msra.gmra.mrb[0].mxu0 %vm283_vm0, %v7408_v11  ;;  %v5125_v1 = vld [vmem:[%s8333_s3 + $0x168] sm:$0xff] }
  0xb3   : > { %6457 = vmatpush3.bf16.msra.mxu1 %v6454_v51  ;;  %6601 = vmatpush3.bf16.msra.mxu0 %v6598_v28  ;;  %v6606_v11 = vpack.c.bf16 %v5125_v1, %v5124_v63  ;;  %v5146_v51 = vld [vmem:[%s8333_s3 + $0x190] sm:$0xff]  ;;  %v5147_v28 = vld [vmem:[%s8333_s3 + $0x198] sm:$0xff]  ;;  %v5149_v63 = vld [vmem:[%s8333_s3 + $0x1a8] sm:$0xff] }
  0xb4   : > { %5833 = vmatprep.mubr.msk.f32.mxu1 %vm283_vm0, %v7230_v5  ;;  %6193 = vmatprep.mubr.msk.f32.mxu0 %vm283_vm0, %v7414_v13  ;;  %v5126_v5 = vld [vmem:[%s8333_s3 + $0x170] sm:$0xff]  ;;  %v6466_v13 = vpack.c.bf16 %v4919_v9, %v4918_v4  ;;  %v6618_v50 = vpack.c.bf16 %v5147_v28, %v5146_v51  ;;  %v8407_v1 = vld [vmem:[#allocation16_spill] sm:$0xff]  ;;  %v6622_v4 = vpack.c.bf16 %v5149_v63, %v5148_v8  ;;  %v3891_v8 = vld [vmem:[#allocation3 + $0x48] sm:$0xff] }
  0xb5   : > { %6459 = vmatprep.subr.bf16.mxu1 %v6458_v60  ;;  %6603 = vmatprep.subr.bf16.mxu0 %v6602_v61  ;;  %v4942_v9 = vld [vmem:[%s8332_s2 + $0x1b0] sm:$0xff]  ;;  %v8070_v28 = vld [vmem:[#allocation3 + $0xca] sm:$0xff] }
  0xb6   : > { %5834 = vmatmul.mubr.msk.f32.gmra.mrb[2].mxu1 %vm283_vm0, %v7236_v7  ;;  %6194 = vmatmul.mubr.msk.f32.gmra.mrb[2].mxu0 %vm283_vm0, %v7438_v24  ;;  %v5127_v7 = vld [vmem:[%s8333_s3 + $0x178] sm:$0xff]  ;;  %v4936_v24 = vld [vmem:[%s8332_s2 + $0x180] sm:$0xff]  ;;  %v8066_v51 = vld [vmem:[#allocation2 + $0xca] sm:$0xff] }
  0xb7   : > { %5836 = vmatprep.mubr.msk.f32.mxu1 %vm283_vm0, %v7264_v18  ;;  %6196 = vmatprep.mubr.msk.f32.mxu0 %vm283_vm0, %v7442_v26  ;;  %v6610_v18 = vpack.c.bf16 %v5127_v7, %v5126_v5  ;;  %v5145_v26 = vld [vmem:[%s8333_s3 + $0x188] sm:$0xff]  ;;  %v6470_v6 = vpack.c.bf16 %v4937_v45, %v4936_v24  ;;  %v4943_v5 = vld [vmem:[%s8332_s2 + $0x1b8] sm:$0xff]  ;;  %v8409_v7 = vld [vmem:[#allocation18_spill] sm:$0xff] }
  0xb8   : > { %6461 = vmatpush3.bf16.msra.mxu1 %v6458_v60  ;;  %6605 = vmatpush3.bf16.msra.mxu0 %v6602_v61  ;;  %v4940_v60 = vld [vmem:[%s8332_s2 + $0x1a0] sm:$0xff]  ;;  %v4941_v61 = vld [vmem:[%s8332_s2 + $0x1a8] sm:$0xff]  ;;  %v6482_v45 = vpack.c.bf16 %v4943_v5, %v4942_v9 }
  0xb9   : > { %6463 = vmatprep.subr.bf16.mxu1 %v6462_v10  ;;  %6607 = vmatprep.subr.bf16.mxu0 %v6606_v11  ;;  %v8411_v24 = vld [vmem:[#allocation20_spill] sm:$0xff] }
  0xba   : > { %5837 = vmatmul.mubr.msk.f32.gmra.mrb[4].mxu1 %vm283_vm0, %v7285_v27  ;;  %6197 = vmatmul.mubr.msk.f32.gmra.mrb[4].mxu0 %vm283_vm0, %v7466_v52  ;;  %v5144_v27 = vld [vmem:[%s8333_s3 + $0x180] sm:$0xff] }
  0xbb   : > { %5839 = vmatprep.mubr.msk.f32.mxu1 %vm283_vm0, %v7292_v29  ;;  %6199 = vmatprep.mubr.msk.f32.mxu0 %vm283_vm0, %v7470_v54  ;;  %v6614_v29 = vpack.c.bf16 %v5145_v26, %v5144_v27  ;;  %v8396_v52 = vld [vmem:[#allocation8_spill] sm:$0xff]  ;;  %v8398_v54 = vld [vmem:[#allocation9_spill] sm:$0xff] }
  0xbc   : > { %6465 = vmatpush3.bf16.msra.mxu1 %v6462_v10  ;;  %6609 = vmatpush3.bf16.msra.mxu0 %v6606_v11  ;;  %v6478_v10 = vpack.c.bf16 %v4941_v61, %v4940_v60  ;;  %v8408_v11 = vld [vmem:[#allocation17_spill] sm:$0xff]  ;;  %v4960_v26 = vld [vmem:[%s8332_s2 + $0x1c0] sm:$0xff]  ;;  %v5171_v60 = vld [vmem:[%s8333_s3 + $0x1d8] sm:$0xff] }
  0xbd   : > { %6467 = vmatprep.subr.bf16.mxu1 %v6466_v13  ;;  %6611 = vmatprep.subr.bf16.mxu0 %v6610_v18  ;;  %v3890_v61 = vld [vmem:[#allocation3 + $0x38] sm:$0xff] }
  0xbe   : > { %5840 = vmatmul.mubr.msk.f32.gmra.mrb[6].mxu1 %vm283_vm0, %v7314_v36  ;;  %6200 = vmatmul.mubr.msk.f32.gmra.mrb[6].mxu0 %vm283_vm0, %v7486_v59  ;;  %v8395_v36 = vld [vmem:[#allocation4_spill] sm:$0xff]  ;;  %v8399_v59 = vld [vmem:[#allocation6_spill] sm:$0xff] }
  0xbf   : > { %5842 = vmatprep.mubr.msk.f32.mxu1 %vm283_vm0, %v7320_v39  ;;  %6202 = vmatprep.mubr.msk.f32.mxu0 %vm283_vm0, %v7490_v0  ;;  %v8397_v39 = vld [vmem:[#allocation5_spill] sm:$0xff] }
  0xc0   : > { %6469 = vmatpush3.bf16.msra.mxu1 %v6466_v13  ;;  %6613 = vmatpush3.bf16.msra.mxu0 %v6610_v18  ;;  %v7936_v0 = vld [vmem:[#allocation2 + $0xc1] sm:$0xff]  ;;  %v8410_v13 = vld [vmem:[#allocation19_spill] sm:$0xff] }
  0xc1   : > { %6471 = vmatprep.subr.bf16.mxu1 %v6470_v6  ;;  %6615 = vmatprep.subr.bf16.mxu0 %v6614_v29  ;;  %v5151_v18 = vld [vmem:[%s8333_s3 + $0x1b8] sm:$0xff] }
  0xc2   : > { %5843 = vmatmul.mubr.msk.f32.gmra.mrb[8].mxu1 %vm283_vm0, %v7330_v41  ;;  %6203 = vmatmul.mubr.msk.f32.gmra.mrb[8].mxu0 %vm283_vm0, %v7507_v14  ;;  %v8400_v41 = vld [vmem:[#allocation10_spill] sm:$0xff] }
  0xc3   : > { %5845 = vmatprep.mubr.msk.f32.mxu1 %vm283_vm0, %v8395_v36  ;;  %6205 = vmatprep.mubr.msk.f32.mxu0 %vm283_vm0, %v8396_v52  ;;  %v7938_v14 = vld [vmem:[#allocation3 + $0xc1] sm:$0xff] }
  0xc4   : > { %v8413_v52 = vld [vmem:[#allocation22_spill] sm:$0xff] }
  0xc6   : > { %5846 = vmatmul.mubr.msk.f32.gmra.mrb[10].mxu1 %vm283_vm0, %v8397_v39  ;;  %6206 = vmatmul.mubr.msk.f32.gmra.mrb[10].mxu0 %vm283_vm0, %v8398_v54  ;;  %v8414_v39 = vld [vmem:[#allocation23_spill] sm:$0xff]  ;;  %v8417_v54 = vld [vmem:[#allocation26_spill] sm:$0xff] }
  0xc7   : > { %5848 = vmatprep.mubr.msk.f32.mxu1 %vm283_vm0, %v8399_v59  ;;  %6208 = vmatprep.mubr.msk.f32.mxu0 %vm283_vm0, %v8400_v41  ;;  %v8418_v59 = vld [vmem:[#allocation27_spill] sm:$0xff]  ;;  %v8419_v41 = vld [vmem:[#allocation28_spill] sm:$0xff] }
  0xca   : > { %5849 = vmatmul.mubr.msk.f32.gmra.mrb[12].mxu1 %vm283_vm0, %v8401_v43  ;;  %6209 = vmatmul.mubr.msk.f32.gmra.mrb[12].mxu0 %vm283_vm0, %v8402_v37  ;;  %v8420_v43 = vld [vmem:[#allocation29_spill] sm:$0xff] }
  0xcb   : > { %5851 = vmatprep.mubr.msk.f32.mxu1 %vm283_vm0, %v7936_v0  ;;  %6211 = vmatprep.mubr.msk.f32.mxu0 %vm283_vm0, %v7938_v14  ;;  %v8056_v37 = vld [vmem:[#allocation2 + $0xc2] sm:$0xff] }
  0xce   : > { %5852 = vmatmul.mubr.msk.f32.gmra.mrb[14].mxu1 %vm283_vm0, %v7946_v15  ;;  %6212 = vmatmul.mubr.msk.f32.gmra.mrb[14].mxu0 %vm283_vm0, %v7950_v34 }
  0xcf   : > { %5870 = vmatprep.mubr.msk.f32.mxu1 %vm283_vm0, %v8403_v17  ;;  %6230 = vmatprep.mubr.msk.f32.mxu0 %vm283_vm0, %v8404_v44  ;;  %v8423_v17 = vld [vmem:[#allocation32_spill] sm:$0xff] }
  0xd0   : > { %v3889_v44 = vld [vmem:[#allocation3 + $0x30] sm:$0xff] }
  0xd2   : > { %5871 = vmatmul.mubr.msk.f32.vlgmr.msra.gmra.mrb[0].mxu1 %vm283_vm0, %v8405_v48  ;;  %6231 = vmatmul.mubr.msk.f32.vlgmr.msra.gmra.mrb[0].mxu0 %vm283_vm0, %v8406_v57  ;;  %v4963_v48 = vld [vmem:[%s8332_s2 + $0x1d8] sm:$0xff] }
  0xd3   : > { %6473 = vmatpush3.bf16.msra.mxu1 %v6470_v6  ;;  %6617 = vmatpush3.bf16.msra.mxu0 %v6614_v29  ;;  %v4961_v6 = vld [vmem:[%s8332_s2 + $0x1c8] sm:$0xff] }
  0xd4   : > { %5873 = vmatprep.mubr.msk.f32.mxu1 %vm283_vm0, %v8407_v1  ;;  %6233 = vmatprep.mubr.msk.f32.mxu0 %vm283_vm0, %v7594_v55  ;;  %v5150_v55 = vld [vmem:[%s8333_s3 + $0x1b0] sm:$0xff]  ;;  %v5169_v29 = vld [vmem:[%s8333_s3 + $0x1c8] sm:$0xff]  ;;  %v6486_v36 = vpack.c.bf16 %v4961_v6, %v4960_v26  ;;  %v5192_v26 = vld [vmem:[%s8333_s3 + $0x200] sm:$0xff] }
  0xd5   : > { %6475 = vmatprep.subr.bf16.mxu1 %v6474_v46  ;;  %6619 = vmatprep.subr.bf16.mxu0 %v6618_v50  ;;  %v6626_v27 = vpack.c.bf16 %v5151_v18, %v5150_v55  ;;  %v4965_v1 = vld [vmem:[%s8332_s2 + $0x1e8] sm:$0xff]  ;;  %v3894_v55 = vld [vmem:[#allocation3 + $0x68] sm:$0xff]  ;;  %v3896_v6 = vld [vmem:[#allocation3 + $0x80] sm:$0xff] }
  0xd6   : > { %5874 = vmatmul.mubr.msk.f32.gmra.mrb[2].mxu1 %vm283_vm0, %v8408_v11  ;;  %6234 = vmatmul.mubr.msk.f32.gmra.mrb[2].mxu0 %vm283_vm0, %v8409_v7  ;;  %v3892_v11 = vld [vmem:[#allocation3 + $0x50] sm:$0xff]  ;;  %v4966_v7 = vld [vmem:[%s8332_s2 + $0x1f0] sm:$0xff]  ;;  %v3895_v18 = vld [vmem:[#allocation3 + $0x78] sm:$0xff] }
  0xd7   : > { %5876 = vmatprep.mubr.msk.f32.mxu1 %vm283_vm0, %v8410_v13  ;;  %6236 = vmatprep.mubr.msk.f32.mxu0 %vm283_vm0, %v8411_v24  ;;  %v4967_v13 = vld [vmem:[%s8332_s2 + $0x1f8] sm:$0xff] }
  0xd8   : > { %6477 = vmatpush3.bf16.msra.mxu1 %v6474_v46  ;;  %6621 = vmatpush3.bf16.msra.mxu0 %v6618_v50  ;;  %v4962_v46 = vld [vmem:[%s8332_s2 + $0x1d0] sm:$0xff]  ;;  %v6498_v24 = vpack.c.bf16 %v4967_v13, %v4966_v7 }
  0xd9   : > { %6479 = vmatprep.subr.bf16.mxu1 %v6478_v10  ;;  %6623 = vmatprep.subr.bf16.mxu0 %v6622_v4  ;;  %v5170_v50 = vld [vmem:[%s8333_s3 + $0x1d0] sm:$0xff]  ;;  %v6490_v57 = vpack.c.bf16 %v4963_v48, %v4962_v46  ;;  %v4126_v46 = vld [vmem:[#allocation3 + $0x51] sm:$0xff] }
  0xda   : > { %5877 = vmatmul.mubr.msk.f32.gmra.mrb[4].mxu1 %vm283_vm0, %v7636_v47  ;;  %6237 = vmatmul.mubr.msk.f32.gmra.mrb[4].mxu0 %vm283_vm0, %v7646_v19  ;;  %v5168_v47 = vld [vmem:[%s8333_s3 + $0x1c0] sm:$0xff]  ;;  %v6634_v63 = vpack.c.bf16 %v5171_v60, %v5170_v50  ;;  %v4127_v50 = vld [vmem:[#allocation3 + $0x61] sm:$0xff] }
  0xdb   : > { %5879 = vmatprep.mubr.msk.f32.mxu1 %vm283_vm0, %v7648_v3  ;;  %6239 = vmatprep.mubr.msk.f32.mxu0 %vm283_vm0, %v7650_v49  ;;  %v6630_v19 = vpack.c.bf16 %v5169_v29, %v5168_v47  ;;  %v8412_v3 = vld [vmem:[#allocation21_spill] sm:$0xff]  ;;  %v8415_v49 = vld [vmem:[#allocation24_spill] sm:$0xff]  ;;  %v4130_v7 = vld [vmem:[#allocation3 + $0x81] sm:$0xff] }
  0xdc   : > { %6481 = vmatpush3.bf16.msra.mxu1 %v6478_v10  ;;  %6625 = vmatpush3.bf16.msra.mxu0 %v6622_v4  ;;  %v5172_v10 = vld [vmem:[%s8333_s3 + $0x1e0] sm:$0xff]  ;;  %v3893_v4 = vld [vmem:[#allocation3 + $0x60] sm:$0xff] }
  0xdd   : > { %6483 = vmatprep.subr.bf16.mxu1 %v6482_v45  ;;  %6627 = vmatprep.subr.bf16.mxu0 %v6626_v27  ;;  %v3897_v47 = vld [vmem:[#allocation3 + $0x90] sm:$0xff]  ;;  %v2025_v13 = vld [vmem:[#allocation2 + $0x91] sm:$0xff] }
  0xde   : > { %5880 = vmatmul.mubr.msk.f32.gmra.mrb[6].mxu1 %vm283_vm0, %v7658_v31  ;;  %6240 = vmatmul.mubr.msk.f32.gmra.mrb[6].mxu0 %vm283_vm0, %v8412_v3  ;;  %v8416_v31 = vld [vmem:[#allocation25_spill] sm:$0xff]  ;;  %v2017_v3 = vld [vmem:[#allocation2 + $0x31] sm:$0xff] }
  0xdf   : > { %5882 = vmatprep.mubr.msk.f32.mxu1 %vm283_vm0, %v8413_v52  ;;  %6242 = vmatprep.mubr.msk.f32.mxu0 %vm283_vm0, %v8414_v39  ;;  %v4123_v52 = vld [vmem:[#allocation3 + $0x31] sm:$0xff]  ;;  %v5195_v39 = vld [vmem:[%s8333_s3 + $0x218] sm:$0xff] }
  0xe0   : > { %6485 = vmatpush3.bf16.msra.mxu1 %v6482_v45  ;;  %6629 = vmatpush3.bf16.msra.mxu0 %v6626_v27  ;;  %v4984_v45 = vld [vmem:[%s8332_s2 + $0x200] sm:$0xff]  ;;  %v4985_v27 = vld [vmem:[%s8332_s2 + $0x208] sm:$0xff] }
  0xe1   : > { %6487 = vmatprep.subr.bf16.mxu1 %v6486_v36  ;;  %6631 = vmatprep.subr.bf16.mxu0 %v6630_v19  ;;  %v6502_v29 = vpack.c.bf16 %v4985_v27, %v4984_v45  ;;  %v2021_v48 = vld [vmem:[#allocation2 + $0x61] sm:$0xff]  ;;  %v2031_v27 = vld [vmem:[#allocation2 + $0xd9] sm:$0xff] }
  0xe2   : > { %5883 = vmatmul.mubr.msk.f32.gmra.mrb[8].mxu1 %vm283_vm0, %v7674_v23  ;;  %6243 = vmatmul.mubr.msk.f32.gmra.mrb[8].mxu0 %vm283_vm0, %v8415_v49  ;;  %v8421_v23 = vld [vmem:[#allocation30_spill] sm:$0xff]  ;;  %v4134_v45 = vld [vmem:[#allocation3 + $0xb1] sm:$0xff] }
  0xe3   : > { %5885 = vmatprep.mubr.msk.f32.mxu1 %vm283_vm0, %v8416_v31  ;;  %6245 = vmatprep.mubr.msk.f32.mxu0 %vm283_vm0, %v8417_v54  ;;  %v4124_v49 = vld [vmem:[#allocation3 + $0x39] sm:$0xff] }
  0xe4   : > { %v2019_v31 = vld [vmem:[#allocation2 + $0x49] sm:$0xff] }
  0xe6   : > { %5886 = vmatmul.mubr.msk.f32.gmra.mrb[10].mxu1 %vm283_vm0, %v8418_v59  ;;  %6246 = vmatmul.mubr.msk.f32.gmra.mrb[10].mxu0 %vm283_vm0, %v8419_v41  ;;  %v4125_v59 = vld [vmem:[#allocation3 + $0x49] sm:$0xff] }
  0xe7   : > { %5888 = vmatprep.mubr.msk.f32.mxu1 %vm283_vm0, %v8420_v43  ;;  %6248 = vmatprep.mubr.msk.f32.mxu0 %vm283_vm0, %v8421_v23  ;;  %v4988_v43 = vld [vmem:[%s8332_s2 + $0x220] sm:$0xff]  ;;  %v4989_v23 = vld [vmem:[%s8332_s2 + $0x228] sm:$0xff] }
  0xe8   : > { %v6510_v60 = vpack.c.bf16 %v4989_v23, %v4988_v43  ;;  %v2266_v43 = vld [vmem:[#allocation2 + $0xe2] sm:$0xff]  ;;  %v4372_v23 = vld [vmem:[#allocation3 + $0xe2] sm:$0xff] }
  0xea   : > { %5889 = vmatmul.mubr.msk.f32.gmra.mrb[12].mxu1 %vm283_vm0, %v8422_v21  ;;  %6249 = vmatmul.mubr.msk.f32.gmra.mrb[12].mxu0 %vm283_vm0, %v8423_v17  ;;  %v2020_v21 = vld [vmem:[#allocation2 + $0x51] sm:$0xff]  ;;  %v5196_v17 = vld [vmem:[%s8333_s3 + $0x220] sm:$0xff] }
  0xeb   : > { %5891 = vmatprep.mubr.msk.f32.mxu1 %vm283_vm0, %v8056_v37  ;;  %6251 = vmatprep.mubr.msk.f32.mxu0 %vm283_vm0, %v8058_v56 }
  0xee   : > { %5892 = vmatmul.mubr.msk.f32.gmra.mrb[14].mxu1 %vm283_vm0, %v8066_v51  ;;  %6252 = vmatmul.mubr.msk.f32.gmra.mrb[14].mxu0 %vm283_vm0, %v8070_v28 }
  0xef   : > { %5910 = vmatprep.mubr.msk.f32.mxu1 %vm283_vm0, %v7410_v12  ;;  %6270 = vmatprep.mubr.msk.f32.mxu0 %vm283_vm0, %v3889_v44  ;;  %v4964_v12 = vld [vmem:[%s8332_s2 + $0x1e0] sm:$0xff]  ;;  %v5197_v44 = vld [vmem:[%s8333_s3 + $0x228] sm:$0xff] }
  0xf0   : > { %v6494_v9 = vpack.c.bf16 %v4965_v1, %v4964_v12  ;;  %v5198_v12 = vld [vmem:[%s8333_s3 + $0x230] sm:$0xff]  ;;  %v5199_v1 = vld [vmem:[%s8333_s3 + $0x238] sm:$0xff] }
  0xf2   : > { %5911 = vmatmul.mubr.msk.f32.vlgmr.msra.gmra.mrb[0].mxu1 %vm283_vm0, %v7428_v20  ;;  %6271 = vmatmul.mubr.msk.f32.vlgmr.msra.gmra.mrb[0].mxu0 %vm283_vm0, %v3890_v61  ;;  %v5173_v20 = vld [vmem:[%s8333_s3 + $0x1e8] sm:$0xff]  ;;  %v6654_v61 = vpack.c.bf16 %v5197_v44, %v5196_v17 }
  0xf3   : > { %6489 = vmatpush3.bf16.msra.mxu1 %v6486_v36  ;;  %6633 = vmatpush3.bf16.msra.mxu0 %v6630_v19  ;;  %v6638_v5 = vpack.c.bf16 %v5173_v20, %v5172_v10  ;;  %v3898_v36 = vld [vmem:[#allocation3 + $0x98] sm:$0xff]  ;;  %v3899_v19 = vld [vmem:[#allocation3 + $0xa8] sm:$0xff] }
  0xf4   : > { %5913 = vmatprep.mubr.msk.f32.mxu1 %vm283_vm0, %v7440_v25  ;;  %6273 = vmatprep.mubr.msk.f32.mxu0 %vm283_vm0, %v3891_v8  ;;  %v5174_v25 = vld [vmem:[%s8333_s3 + $0x1f0] sm:$0xff]  ;;  %v4991_v8 = vld [vmem:[%s8332_s2 + $0x238] sm:$0xff] }
  0xf5   : > { %6491 = vmatprep.subr.bf16.mxu1 %v6490_v57  ;;  %6635 = vmatprep.subr.bf16.mxu0 %v6634_v63  ;;  %v4128_v10 = vld [vmem:[#allocation3 + $0x69] sm:$0xff] }
  0xf6   : > { %5914 = vmatmul.mubr.msk.f32.gmra.mrb[2].mxu1 %vm283_vm0, %v7456_v35  ;;  %6274 = vmatmul.mubr.msk.f32.gmra.mrb[2].mxu0 %vm283_vm0, %v3892_v11  ;;  %v5175_v35 = vld [vmem:[%s8333_s3 + $0x1f8] sm:$0xff]  ;;  %v4129_v11 = vld [vmem:[#allocation3 + $0x79] sm:$0xff] }
  0xf7   : > { %5916 = vmatprep.mubr.msk.f32.mxu1 %vm283_vm0, %v7468_v53  ;;  %6276 = vmatprep.mubr.msk.f32.mxu0 %vm283_vm0, %v3893_v4  ;;  %v6642_v53 = vpack.c.bf16 %v5175_v35, %v5174_v25  ;;  %v2023_v20 = vld [vmem:[#allocation2 + $0x79] sm:$0xff]  ;;  %v4131_v25 = vld [vmem:[#allocation3 + $0x91] sm:$0xff] }
  0xf8   : > { %6493 = vmatpush3.bf16.msra.mxu1 %v6490_v57  ;;  %6637 = vmatpush3.bf16.msra.mxu0 %v6634_v63  ;;  %v4990_v57 = vld [vmem:[%s8332_s2 + $0x230] sm:$0xff]  ;;  %v2026_v35 = vld [vmem:[#allocation2 + $0x99] sm:$0xff] }
  0xf9   : > { %6495 = vmatprep.subr.bf16.mxu1 %v6494_v9  ;;  %6639 = vmatprep.subr.bf16.mxu0 %v6638_v5  ;;  %v2022_v63 = vld [vmem:[#allocation2 + $0x69] sm:$0xff]  ;;  %v6514_v4 = vpack.c.bf16 %v4991_v8, %v4990_v57 }
  0xfa   : > { %5917 = vmatmul.mubr.msk.f32.gmra.mrb[4].mxu1 %vm283_vm0, %v7482_v58  ;;  %6277 = vmatmul.mubr.msk.f32.gmra.mrb[4].mxu0 %vm283_vm0, %v3894_v55  ;;  %v5193_v58 = vld [vmem:[%s8333_s3 + $0x208] sm:$0xff] }
  0xfb   : > { %5919 = vmatprep.mubr.msk.f32.mxu1 %vm283_vm0, %v7488_v62  ;;  %6279 = vmatprep.mubr.msk.f32.mxu0 %vm283_vm0, %v3895_v18  ;;  %v6646_v62 = vpack.c.bf16 %v5193_v58, %v5192_v26  ;;  %v4132_v55 = vld [vmem:[#allocation3 + $0x99] sm:$0xff]  ;;  %v2032_v58 = vld [vmem:[#allocation2 + $0xe1] sm:$0xff] }
  0xfc   : > { %6497 = vmatpush3.bf16.msra.mxu1 %v6494_v9  ;;  %6641 = vmatpush3.bf16.msra.mxu0 %v6638_v5  ;;  %v6658_v9 = vpack.c.bf16 %v5199_v1, %v5198_v12  ;;  %v2024_v5 = vld [vmem:[#allocation2 + $0x81] sm:$0xff]  ;;  %v2027_v18 = vld [vmem:[#allocation2 + $0xa9] sm:$0xff] }
  0xfd   : > { %6499 = vmatprep.subr.bf16.mxu1 %v6498_v24  ;;  %6643 = vmatprep.subr.bf16.mxu0 %v6642_v53  ;;  %v4137_v26 = vld [vmem:[#allocation3 + $0xd9] sm:$0xff] }
  0xfe   : > { %5920 = vmatmul.mubr.msk.f32.gmra.mrb[6].mxu1 %vm283_vm0, %v7495_v2  ;;  %6280 = vmatmul.mubr.msk.f32.gmra.mrb[6].mxu0 %vm283_vm0, %v3896_v6  ;;  %v3900_v2 = vld [vmem:[#allocation3 + $0xb0] sm:$0xff]  ;;  %v4138_v6 = vld [vmem:[#allocation3 + $0xe1] sm:$0xff] }
  0xff   : > { %5922 = vmatprep.mubr.msk.f32.mxu1 %vm283_vm0, %v7509_v16  ;;  %6282 = vmatprep.mubr.msk.f32.mxu0 %vm283_vm0, %v3897_v47  ;;  %v1797_v16 = vld [vmem:[#allocation2 + $0xd8] sm:$0xff] }
 0x100   : > { %6501 = vmatpush3.bf16.msra.mxu1 %v6498_v24  ;;  %6645 = vmatpush3.bf16.msra.mxu0 %v6642_v53  ;;  %v4133_v24 = vld [vmem:[#allocation3 + $0xa9] sm:$0xff]  ;;  %v2028_v53 = vld [vmem:[#allocation2 + $0xb1] sm:$0xff] }
 0x101   : > { %6503 = vmatprep.subr.bf16.mxu1 %v6502_v29  ;;  %6647 = vmatprep.subr.bf16.mxu0 %v6646_v62  ;;  %v2251_v47 = vld [vmem:[#allocation2 + $0x32] sm:$0xff] }
 0x102   : > { %5923 = vmatmul.mubr.msk.f32.gmra.mrb[8].mxu1 %vm283_vm0, %v7524_v22  ;;  %6283 = vmatmul.mubr.msk.f32.gmra.mrb[8].mxu0 %vm283_vm0, %v3898_v36  ;;  %v3903_v22 = vld [vmem:[#allocation3 + $0xd8] sm:$0xff] }
 0x103   : > { %5925 = vmatprep.mubr.msk.f32.mxu1 %vm283_vm0, %v7530_v30  ;;  %6285 = vmatprep.mubr.msk.f32.mxu0 %vm283_vm0, %v3899_v19  ;;  %v1798_v30 = vld [vmem:[#allocation2 + $0xe0] sm:$0xff] }
 0x104   : > { %v4360_v36 = vld [vmem:[#allocation3 + $0x52] sm:$0xff] }
 0x105   : > { %v2255_v19 = vld [vmem:[#allocation2 + $0x62] sm:$0xff] }
 0x106   : > { %5926 = vmatmul.mubr.msk.f32.gmra.mrb[10].mxu1 %vm283_vm0, %v7540_v33  ;;  %6286 = vmatmul.mubr.msk.f32.gmra.mrb[10].mxu0 %vm283_vm0, %v3900_v2  ;;  %v3904_v33 = vld [vmem:[#allocation3 + $0xe0] sm:$0xff] }
 0x107   : > { %5928 = vmatprep.mubr.msk.f32.mxu1 %vm283_vm0, %v7816_v32  ;;  %6288 = vmatprep.mubr.msk.f32.mxu0 %vm283_vm0, %v7818_v38  ;;  %v4986_v32 = vld [vmem:[%s8332_s2 + $0x210] sm:$0xff]  ;;  %v4987_v38 = vld [vmem:[%s8332_s2 + $0x218] sm:$0xff] }
 0x108   : > { %v6506_v54 = vpack.c.bf16 %v4987_v38, %v4986_v32  ;;  %v4361_v2 = vld [vmem:[#allocation3 + $0x62] sm:$0xff]  ;;  %v4365_v38 = vld [vmem:[#allocation3 + $0x92] sm:$0xff] }
 0x109   : > { %v2259_v32 = vld [vmem:[#allocation2 + $0x92] sm:$0xff] }
 0x10a   : > { %5929 = vmatmul.mubr.msk.f32.gmra.mrb[12].mxu1 %vm283_vm0, %v7826_v40  ;;  %6289 = vmatmul.mubr.msk.f32.gmra.mrb[12].mxu0 %vm283_vm0, %v7830_v42  ;;  %v2018_v40 = vld [vmem:[#allocation2 + $0x39] sm:$0xff]  ;;  %v5194_v42 = vld [vmem:[%s8333_s3 + $0x210] sm:$0xff] }
 0x10b   : > { %5931 = vmatprep.mubr.msk.f32.mxu1 %vm283_vm0, %v1797_v16  ;;  %6291 = vmatprep.mubr.msk.f32.mxu0 %vm283_vm0, %v3903_v22  ;;  %v6650_v41 = vpack.c.bf16 %v5195_v39, %v5194_v42  ;;  %v2256_v16 = vld [vmem:[#allocation2 + $0x6a] sm:$0xff]  ;;  %v4362_v22 = vld [vmem:[#allocation3 + $0x6a] sm:$0xff] }
 0x10c   : > { %v4366_v42 = vld [vmem:[#allocation3 + $0x9a] sm:$0xff] }
 0x10d   : > { %v2261_v39 = vld [vmem:[#allocation2 + $0xaa] sm:$0xff] }
 0x10e   : > { %5932 = vmatmul.mubr.msk.f32.gmra.mrb[14].mxu1 %vm283_vm0, %v1798_v30  ;;  %6292 = vmatmul.mubr.msk.f32.gmra.mrb[14].mxu0 %vm283_vm0, %v3904_v33  ;;  %v2257_v30 = vld [vmem:[#allocation2 + $0x7a] sm:$0xff]  ;;  %v4363_v33 = vld [vmem:[#allocation3 + $0x7a] sm:$0xff] }
 0x10f   : > { %5950 = vmatprep.mubr.msk.f32.mxu1 %vm283_vm0, %v2017_v3  ;;  %6310 = vmatprep.mubr.msk.f32.mxu0 %vm283_vm0, %v4123_v52  ;;  %v2258_v3 = vld [vmem:[#allocation2 + $0x82] sm:$0xff]  ;;  %v4364_v52 = vld [vmem:[#allocation3 + $0x82] sm:$0xff] }
 0x112   : > { %5951 = vmatmul.mubr.msk.f32.vlgmr.msra.gmra.mrb[0].mxu1 %vm283_vm0, %v2018_v40  ;;  %6311 = vmatmul.mubr.msk.f32.vlgmr.msra.gmra.mrb[0].mxu0 %vm283_vm0, %v4124_v49  ;;  %v2260_v40 = vld [vmem:[#allocation2 + $0x9a] sm:$0xff] }
 0x113   : > { %6505 = vmatpush3.bf16.msra.mxu1 %v6502_v29  ;;  %6649 = vmatpush3.bf16.msra.mxu0 %v6646_v62  ;;  %v4357_v29 = vld [vmem:[#allocation3 + $0x32] sm:$0xff]  ;;  %v2254_v62 = vld [vmem:[#allocation2 + $0x52] sm:$0xff]  ;;  %v4367_v49 = vld [vmem:[#allocation3 + $0xaa] sm:$0xff] }
 0x114   : > { %5953 = vmatprep.mubr.msk.f32.mxu1 %vm283_vm0, %v2019_v31  ;;  %6313 = vmatprep.mubr.msk.f32.mxu0 %vm283_vm0, %v4125_v59  ;;  %v2262_v31 = vld [vmem:[#allocation2 + $0xb2] sm:$0xff]  ;;  %v2265_v59 = vld [vmem:[#allocation2 + $0xda] sm:$0xff] }
 0x115   : > { %6507 = vmatprep.subr.bf16.mxu1 %v6506_v54  ;;  %6651 = vmatprep.subr.bf16.mxu0 %v6650_v41 }
 0x116   : > { %5954 = vmatmul.mubr.msk.f32.gmra.mrb[2].mxu1 %vm283_vm0, %v2020_v21  ;;  %6314 = vmatmul.mubr.msk.f32.gmra.mrb[2].mxu0 %vm283_vm0, %v4126_v46  ;;  %v8283_v21 = vld [vmem:[%s8334_s4] ss:$0 sm:$0xff] }
 0x117   : > { %5956 = vmatprep.mubr.msk.f32.mxu1 %vm283_vm0, %v2021_v48  ;;  %6316 = vmatprep.mubr.msk.f32.mxu0 %vm283_vm0, %v4127_v50 }
 0x118   : > { %6509 = vmatpush3.bf16.msra.mxu1 %v6506_v54  ;;  %6653 = vmatpush3.bf16.msra.mxu0 %v6650_v41  ;;  %v4368_v54 = vld [vmem:[#allocation3 + $0xb2] sm:$0xff]  ;;  %v4371_v41 = vld [vmem:[#allocation3 + $0xda] sm:$0xff] }
 0x119   : > { %6511 = vmatprep.subr.bf16.mxu1 %v6510_v60  ;;  %6655 = vmatprep.subr.bf16.mxu0 %v6654_v61 }
 0x11a   : > { %5957 = vmatmul.mubr.msk.f32.gmra.mrb[4].mxu1 %vm283_vm0, %v2022_v63  ;;  %6317 = vmatmul.mubr.msk.f32.gmra.mrb[4].mxu0 %vm283_vm0, %v4128_v10 }
 0x11b   : > { %5959 = vmatprep.mubr.msk.f32.mxu1 %vm283_vm0, %v2023_v20  ;;  %6319 = vmatprep.mubr.msk.f32.mxu0 %vm283_vm0, %v4129_v11 }
 0x11c   : > { %6513 = vmatpush3.bf16.msra.mxu1 %v6510_v60  ;;  %6657 = vmatpush3.bf16.msra.mxu0 %v6654_v61 }
 0x11d   : > { %6515 = vmatprep.subr.bf16.mxu1 %v6514_v4  ;;  %6659 = vmatprep.subr.bf16.mxu0 %v6658_v9 }
 0x11e   : > { %5960 = vmatmul.mubr.msk.f32.gmra.mrb[6].mxu1 %vm283_vm0, %v2024_v5  ;;  %6320 = vmatmul.mubr.msk.f32.gmra.mrb[6].mxu0 %vm283_vm0, %v4130_v7 }
 0x11f   : > { %5962 = vmatprep.mubr.msk.f32.mxu1 %vm283_vm0, %v2025_v13  ;;  %6322 = vmatprep.mubr.msk.f32.mxu0 %vm283_vm0, %v4131_v25 }
 0x120   : > { %6517 = vmatpush3.bf16.msra.mxu1 %v6514_v4  ;;  %6661 = vmatpush3.bf16.msra.mxu0 %v6658_v9 }
 0x122   : > { %5963 = vmatmul.mubr.msk.f32.gmra.mrb[8].mxu1 %vm283_vm0, %v2026_v35  ;;  %6323 = vmatmul.mubr.msk.f32.gmra.mrb[8].mxu0 %vm283_vm0, %v4132_v55 }
 0x123   : > { %5965 = vmatprep.mubr.msk.f32.mxu1 %vm283_vm0, %v2027_v18  ;;  %6325 = vmatprep.mubr.msk.f32.mxu0 %vm283_vm0, %v4133_v24 }
 0x126   : > { %5966 = vmatmul.mubr.msk.f32.gmra.mrb[10].mxu1 %vm283_vm0, %v2028_v53  ;;  %6326 = vmatmul.mubr.msk.f32.gmra.mrb[10].mxu0 %vm283_vm0, %v4134_v45 }
 0x127   : > { %5968 = vmatprep.mubr.msk.f32.mxu1 %vm283_vm0, %v7936_v0  ;;  %6328 = vmatprep.mubr.msk.f32.mxu0 %vm283_vm0, %v7938_v14  ;;  %v2252_v0 = vld [vmem:[#allocation2 + $0x3a] sm:$0xff]  ;;  %v4358_v14 = vld [vmem:[#allocation3 + $0x3a] sm:$0xff] }
 0x12a   : > { %5969 = vmatmul.mubr.msk.f32.gmra.mrb[12].mxu1 %vm283_vm0, %v7946_v15  ;;  %6329 = vmatmul.mubr.msk.f32.gmra.mrb[12].mxu0 %vm283_vm0, %v7950_v34  ;;  %v2253_v15 = vld [vmem:[#allocation2 + $0x4a] sm:$0xff]  ;;  %v4359_v34 = vld [vmem:[#allocation3 + $0x4a] sm:$0xff] }
 0x12b   : > { %5971 = vmatprep.mubr.msk.f32.mxu1 %vm283_vm0, %v2031_v27  ;;  %6331 = vmatprep.mubr.msk.f32.mxu0 %vm283_vm0, %v4137_v26 }
 0x12e   : > { %5972 = vmatmul.mubr.msk.f32.gmra.mrb[14].mxu1 %vm283_vm0, %v2032_v58  ;;  %6332 = vmatmul.mubr.msk.f32.gmra.mrb[14].mxu0 %vm283_vm0, %v4138_v6 }
 0x12f   : > { %5990 = vmatprep.mubr.msk.f32.mxu1 %vm283_vm0, %v2251_v47  ;;  %6350 = vmatprep.mubr.msk.f32.mxu0 %vm283_vm0, %v4357_v29 }
 0x132   : > { %5991 = vmatmul.mubr.msk.f32.vlgmr.msra.gmra.mrb[0].mxu1 %vm283_vm0, %v2252_v0  ;;  %6351 = vmatmul.mubr.msk.f32.vlgmr.msra.gmra.mrb[0].mxu0 %vm283_vm0, %v4358_v14 }
 0x133   : > { %5993 = vmatprep.mubr.msk.f32.mxu1 %vm283_vm0, %v2253_v15  ;;  %6353 = vmatprep.mubr.msk.f32.mxu0 %vm283_vm0, %v4359_v34 }
 0x136   : > { %5994 = vmatmul.mubr.msk.f32.gmra.mrb[2].mxu1 %vm283_vm0, %v2254_v62  ;;  %6354 = vmatmul.mubr.msk.f32.gmra.mrb[2].mxu0 %vm283_vm0, %v4360_v36 }
 0x137   : > { %5996 = vmatprep.mubr.msk.f32.mxu1 %vm283_vm0, %v2255_v19  ;;  %6356 = vmatprep.mubr.msk.f32.mxu0 %vm283_vm0, %v4361_v2 }
 0x13a   : > { %5997 = vmatmul.mubr.msk.f32.gmra.mrb[4].mxu1 %vm283_vm0, %v2256_v16  ;;  %6357 = vmatmul.mubr.msk.f32.gmra.mrb[4].mxu0 %vm283_vm0, %v4362_v22 }
 0x13b   : > { %5999 = vmatprep.mubr.msk.f32.mxu1 %vm283_vm0, %v2257_v30  ;;  %6359 = vmatprep.mubr.msk.f32.mxu0 %vm283_vm0, %v4363_v33 }
 0x13e   : > { %6000 = vmatmul.mubr.msk.f32.gmra.mrb[6].mxu1 %vm283_vm0, %v2258_v3  ;;  %6360 = vmatmul.mubr.msk.f32.gmra.mrb[6].mxu0 %vm283_vm0, %v4364_v52 }
 0x13f   : > { %6002 = vmatprep.mubr.msk.f32.mxu1 %vm283_vm0, %v2259_v32  ;;  %6362 = vmatprep.mubr.msk.f32.mxu0 %vm283_vm0, %v4365_v38 }
 0x142   : > { %6003 = vmatmul.mubr.msk.f32.gmra.mrb[8].mxu1 %vm283_vm0, %v2260_v40  ;;  %6363 = vmatmul.mubr.msk.f32.gmra.mrb[8].mxu0 %vm283_vm0, %v4366_v42 }
 0x143   : > { %6005 = vmatprep.mubr.msk.f32.mxu1 %vm283_vm0, %v2261_v39  ;;  %6365 = vmatprep.mubr.msk.f32.mxu0 %vm283_vm0, %v4367_v49 }
 0x146   : > { %6006 = vmatmul.mubr.msk.f32.gmra.mrb[10].mxu1 %vm283_vm0, %v2262_v31  ;;  %6366 = vmatmul.mubr.msk.f32.gmra.mrb[10].mxu0 %vm283_vm0, %v4368_v54 }
 0x147   : > { %6008 = vmatprep.mubr.msk.f32.mxu1 %vm283_vm0, %v8056_v37  ;;  %6368 = vmatprep.mubr.msk.f32.mxu0 %vm283_vm0, %v8058_v56 }
 0x14a   : > { %6009 = vmatmul.mubr.msk.f32.gmra.mrb[12].mxu1 %vm283_vm0, %v8066_v51  ;;  %6369 = vmatmul.mubr.msk.f32.gmra.mrb[12].mxu0 %vm283_vm0, %v8070_v28 }
 0x14b   : > { %6011 = vmatprep.mubr.msk.f32.mxu1 %vm283_vm0, %v2265_v59  ;;  %6371 = vmatprep.mubr.msk.f32.mxu0 %vm283_vm0, %v4371_v41 }
 0x14e   : > { %6012 = vmatmul.mubr.msk.f32.gmra.mrb[14].mxu1 %vm283_vm0, %v2266_v43  ;;  %6372 = vmatmul.mubr.msk.f32.gmra.mrb[14].mxu0 %vm283_vm0, %v4372_v23 }
 0x205   : > { %v5992_v37 = vpop.f32.mrb[0].mxu1  ;;  %v6352_v56 = vpop.f32.mrb[0].mxu0 }
 0x206   : > { %v2390_v51 = vpop.f32.mrb[1].mxu1  ;;  %v6662_v17 = vadd.f32 %v6352_v56, %v5992_v37  ;;  %v4496_v28 = vpop.f32.mrb[1].mxu0 }
 0x207   : > { %v6663_v44 = vadd.f32 %v4496_v28, %v2390_v51 }
 0x208   : > { %v4599_v46 = vadd.f32 %v6662_v17, %v8283_v21 }
 0x209   : > { %v5995_v48 = vpop.f32.mrb[2].mxu1  ;;  %v4598_v50 = vadd.f32 %v6663_v44, %v8283_v21  ;;  %v6355_v60 = vpop.f32.mrb[2].mxu0 }
 0x20a   : > { %v2400_v61 = vpop.f32.mrb[3].mxu1  ;;  %4615 = vst [vmem:[%s8289_s9 + $0x8] sm:$0xff] %v4599_v46  ;;  %v4653_v57 = vmul.f32 %v4599_v46, %v4599_v46  ;;  %v6664_v8 = vadd.f32 %v6355_v60, %v5995_v48  ;;  %v4506_v63 = vpop.f32.mrb[3].mxu0 }
 0x20b   : > { %4614 = vst [vmem:[%s8289_s9] sm:$0xff] %v4598_v50  ;;  %v4630_v12 = vadd.f32 %v4599_v46, %v4598_v50  ;;  %v4652_v1 = vmul.f32 %v4598_v50, %v4598_v50  ;;  %v6665_v10 = vadd.f32 %v4506_v63, %v2400_v61 }
 0x20c   : > { %v4601_v20 = vadd.f32 %v6664_v8, %v8283_v21 }
 0x20d   : > { %v5998_v11 = vpop.f32.mrb[4].mxu1  ;;  %v4668_v4 = vadd.f32 %v4653_v57, %v4652_v1  ;;  %v4600_v9 = vadd.f32 %v6665_v10, %v8283_v21  ;;  %v6358_v5 = vpop.f32.mrb[4].mxu0 }
 0x20e   : > { %v2410_v7 = vpop.f32.mrb[5].mxu1  ;;  %4617 = vst [vmem:[%s8289_s9 + $0x18] sm:$0xff] %v4601_v20  ;;  %v6666_v13 = vadd.f32 %v6358_v5, %v5998_v11  ;;  %v4516_v25 = vpop.f32.mrb[5].mxu0  ;;  %v4655_v45 = vmul.f32 %v4601_v20, %v4601_v20 }
 0x20f   : > { %4616 = vst [vmem:[%s8289_s9 + $0x10] sm:$0xff] %v4600_v9  ;;  %v4631_v35 = vadd.f32 %v4630_v12, %v4600_v9  ;;  %v4654_v55 = vmul.f32 %v4600_v9, %v4600_v9  ;;  %v6667_v18 = vadd.f32 %v4516_v25, %v2410_v7 }
 0x210   : > { %v4603_v24 = vadd.f32 %v6666_v13, %v8283_v21 }
 0x211   : > { %v6001_v53 = vpop.f32.mrb[6].mxu1  ;;  %v4669_v27 = vadd.f32 %v4668_v4, %v4654_v55  ;;  %v4602_v26 = vadd.f32 %v6667_v18, %v8283_v21  ;;  %v4632_v58 = vadd.f32 %v4631_v35, %v4601_v20  ;;  %v6361_v6 = vpop.f32.mrb[6].mxu0 }
 0x212   : > { %v2420_v47 = vpop.f32.mrb[7].mxu1  ;;  %4619 = vst [vmem:[%s8289_s9 + $0x28] sm:$0xff] %v4603_v24  ;;  %v6668_v29 = vadd.f32 %v6361_v6, %v6001_v53  ;;  %v4526_v0 = vpop.f32.mrb[7].mxu0  ;;  %v4657_v2 = vmul.f32 %v4603_v24, %v4603_v24 }
 0x213   : > { %4618 = vst [vmem:[%s8289_s9 + $0x20] sm:$0xff] %v4602_v26  ;;  %v4633_v14 = vadd.f32 %v4632_v58, %v4602_v26  ;;  %v4656_v15 = vmul.f32 %v4602_v26, %v4602_v26  ;;  %v4670_v34 = vadd.f32 %v4669_v27, %v4655_v45  ;;  %v6669_v62 = vadd.f32 %v4526_v0, %v2420_v47 }
 0x214   : > { %v4605_v36 = vadd.f32 %v6668_v29, %v8283_v21 }
 0x215   : > { %v6004_v19 = vpop.f32.mrb[8].mxu1  ;;  %v4671_v16 = vadd.f32 %v4670_v34, %v4656_v15  ;;  %v4604_v22 = vadd.f32 %v6669_v62, %v8283_v21  ;;  %v4634_v30 = vadd.f32 %v4633_v14, %v4603_v24  ;;  %v6364_v33 = vpop.f32.mrb[8].mxu0 }
 0x216   : > { %v2430_v3 = vpop.f32.mrb[9].mxu1  ;;  %4621 = vst [vmem:[%s8289_s9 + $0x38] sm:$0xff] %v4605_v36  ;;  %v6670_v52 = vadd.f32 %v6364_v33, %v6004_v19  ;;  %v4536_v32 = vpop.f32.mrb[9].mxu0  ;;  %v4659_v54 = vmul.f32 %v4605_v36, %v4605_v36 }
 0x217   : > { %4620 = vst [vmem:[%s8289_s9 + $0x30] sm:$0xff] %v4604_v22  ;;  %v4635_v38 = vadd.f32 %v4634_v30, %v4604_v22  ;;  %v4658_v40 = vmul.f32 %v4604_v22, %v4604_v22  ;;  %v4672_v42 = vadd.f32 %v4671_v16, %v4657_v2  ;;  %v6671_v39 = vadd.f32 %v4536_v32, %v2430_v3 }
 0x218   : > { %v4607_v49 = vadd.f32 %v6670_v52, %v8283_v21 }
 0x219   : > { %v6007_v31 = vpop.f32.mrb[10].mxu1  ;;  %v4673_v59 = vadd.f32 %v4672_v42, %v4658_v40  ;;  %v4606_v41 = vadd.f32 %v6671_v39, %v8283_v21  ;;  %v4636_v43 = vadd.f32 %v4635_v38, %v4605_v36  ;;  %v6367_v23 = vpop.f32.mrb[10].mxu0 }
 0x21a   : > { %v2440_v37 = vpop.f32.mrb[11].mxu1  ;;  %4623 = vst [vmem:[%s8289_s9 + $0x48] sm:$0xff] %v4607_v49  ;;  %v6672_v56 = vadd.f32 %v6367_v23, %v6007_v31  ;;  %v4546_v51 = vpop.f32.mrb[11].mxu0  ;;  %v4661_v60 = vmul.f32 %v4607_v49, %v4607_v49 }
 0x21b   : > { %4622 = vst [vmem:[%s8289_s9 + $0x40] sm:$0xff] %v4606_v41  ;;  %v4637_v17 = vadd.f32 %v4636_v43, %v4606_v41  ;;  %v4660_v28 = vmul.f32 %v4606_v41, %v4606_v41  ;;  %v4674_v44 = vadd.f32 %v4673_v59, %v4659_v54  ;;  %v6673_v46 = vadd.f32 %v4546_v51, %v2440_v37 }
 0x21c   : > { %v4609_v48 = vadd.f32 %v6672_v56, %v8283_v21 }
 0x21d   : > { %v6010_v50 = vpop.f32.mrb[12].mxu1  ;;  %v4675_v61 = vadd.f32 %v4674_v44, %v4660_v28  ;;  %v4608_v57 = vadd.f32 %v6673_v46, %v8283_v21  ;;  %v4638_v8 = vadd.f32 %v4637_v17, %v4607_v49  ;;  %v6370_v63 = vpop.f32.mrb[12].mxu0 }
 0x21e   : > { %v2450_v12 = vpop.f32.mrb[13].mxu1  ;;  %4625 = vst [vmem:[%s8289_s9 + $0x58] sm:$0xff] %v4609_v48  ;;  %v6674_v1 = vadd.f32 %v6370_v63, %v6010_v50  ;;  %v4556_v10 = vpop.f32.mrb[13].mxu0  ;;  %v4663_v13 = vmul.f32 %v4609_v48, %v4609_v48 }
 0x21f   : > { %4624 = vst [vmem:[%s8289_s9 + $0x50] sm:$0xff] %v4608_v57  ;;  %v4639_v20 = vadd.f32 %v4638_v8, %v4608_v57  ;;  %v4662_v11 = vmul.f32 %v4608_v57, %v4608_v57  ;;  %v4676_v4 = vadd.f32 %v4675_v61, %v4661_v60  ;;  %v6675_v9 = vadd.f32 %v4556_v10, %v2450_v12 }
 0x220   : > { %v4611_v5 = vadd.f32 %v6674_v1, %v8283_v21 }
 0x221   : > { %v6013_v7 = vpop.f32.mrb[14].mxu1  ;;  %v4677_v25 = vadd.f32 %v4676_v4, %v4662_v11  ;;  %v4610_v35 = vadd.f32 %v6675_v9, %v8283_v21  ;;  %v4640_v55 = vadd.f32 %v4639_v20, %v4609_v48  ;;  %v6373_v18 = vpop.f32.mrb[14].mxu0 }
 0x222   : > { %v2460_v24 = vpop.f32.mrb[15].mxu1  ;;  %4627 = vst [vmem:[%s8289_s9 + $0x68] sm:$0xff] %v4611_v5  ;;  %v6676_v53 = vadd.f32 %v6373_v18, %v6013_v7  ;;  %v4566_v45 = vpop.f32.mrb[15].mxu0  ;;  %v4665_v29 = vmul.f32 %v4611_v5, %v4611_v5 }
 0x223   : > { %4626 = vst [vmem:[%s8289_s9 + $0x60] sm:$0xff] %v4610_v35  ;;  %v4641_v27 = vadd.f32 %v4640_v55, %v4610_v35  ;;  %v4664_v26 = vmul.f32 %v4610_v35, %v4610_v35  ;;  %v4678_v58 = vadd.f32 %v4677_v25, %v4663_v13  ;;  %v6677_v6 = vadd.f32 %v4566_v45, %v2460_v24 }
 0x224   : > { %v4613_v47 = vadd.f32 %v6676_v53, %v8283_v21 }
 0x225   : > { %v4679_v0 = vadd.f32 %v4678_v58, %v4664_v26  ;;  %v4612_v14 = vadd.f32 %v6677_v6, %v8283_v21  ;;  %v4642_v15 = vadd.f32 %v4641_v27, %v4611_v5 }
 0x226   : > { %4629 = vst [vmem:[%s8289_s9 + $0x78] sm:$0xff] %v4613_v47  ;;  %v4667_v19 = vmul.f32 %v4613_v47, %v4613_v47 }
 0x227   : > { %4628 = vst [vmem:[%s8289_s9 + $0x70] sm:$0xff] %v4612_v14  ;;  %v4643_v34 = vadd.f32 %v4642_v15, %v4612_v14  ;;  %v4666_v62 = vmul.f32 %v4612_v14, %v4612_v14  ;;  %v4680_v36 = vadd.f32 %v4679_v0, %v4665_v29 }
 0x229   : > { %v4644_v2 = vadd.f32 %v4643_v34, %v4613_v47  ;;  %v4681_v16 = vadd.f32 %v4680_v36, %v4666_v62 }
 0x22b   : > { %v4645_v22 = vrot.slane %v4644_v2, 4  ;;  %v4682_v30 = vadd.f32 %v4681_v16, %v4667_v19 }
 0x22d   : > { %v4646_v33 = vadd.f32 %v4645_v22, %v4644_v2  ;;  %v4683_v3 = vrot.slane %v4682_v30, 4 }
 0x22f   : > { %v4647_v52 = vrot.slane %v4646_v33, 2  ;;  %v4684_v32 = vadd.f32 %v4683_v3, %v4682_v30 }
 0x231   : > { %v4648_v38 = vadd.f32 %v4647_v52, %v4646_v33  ;;  %v4685_v40 = vrot.slane %v4684_v32, 2 }
 0x233   : > { %v4649_v21 = vrot.slane %v4648_v38, 1  ;;  %v4686_v42 = vadd.f32 %v4685_v40, %v4684_v32 }
 0x235   : > { %v4650_v39 = vadd.f32 %v4649_v21, %v4648_v38  ;;  %v4687_v49 = vrot.slane %v4686_v42, 1 }
 0x237   : > { %4651 = vst [vmem:[%s282_s10] sm:$0x1] %v4650_v39  ;;  %v4688_v31 = vadd.f32 %v4687_v49, %v4686_v42 }
 0x239   : > { %4689 = vst [vmem:[%s282_s10 + $0x1] sm:$0x1] %v4688_v31 }
 0x23a PF: > { %s17_s21 = sadd.s32 1, %s6949_s21  }
 0x23b   : > { %p14_p4 = scmp.ge.s32.totalorder %s17_s21, 4  }
 0x23d   :  { %16 = sbr.rel (!%p14_p4) target bundleno = 1 (0x1), region = 105 }

// kernel: tile.38
= control target key start
LH: loop header
LB: loop body
LE: loop exit
PB: predicated region body
PF: predicated region fallthrough
CT: control target
= control target key end

     0   :  { %s28_s0 = inlined_call_operand.vmem [shape: f32[4], index: 0, kind: input, shape index: {}]   ;;  %s29_s1 = inlined_call_operand.vmem [shape: f32[16,4], index: 1, kind: output, shape index: {}]  }
   0x1   :  { %v4_v0 = vld [vmem:[%s28_s0] ss:$0 sm:$0xff] }
   0x2   :  { %5 = vst [vmem:[%s29_s1] sm:$0xff] %v4_v0  ;;  %8 = vst [vmem:[%s29_s1 + $0x8] sm:$0xff] %v4_v0 }

// kernel: tile.39
= control target key start
LH: loop header
LB: loop body
LE: loop exit
PB: predicated region body
PF: predicated region fallthrough
CT: control target
= control target key end

     0   :  { %s131_s10 = smov 60   ;;  %s132_s11 = smov 52   ;;  %vm3_vm0 = vcmask 31744   ;;  %vm9_vm1 = vcmask 523744   ;;  %vm15_vm2 = vcmask 490944   ;;  %vm21_vm3 = vcmask 458144   ;;  %s207_s0 = inlined_call_operand.vmem [shape: f32[16,4], index: 0, kind: input, shape index: {}]   ;;  %s208_s1 = inlined_call_operand.vmem [shape: f32[1,64], index: 1, kind: output, shape index: {}]  }
   0x1   :  { %v101_v0 = vld [vmem:[%s207_s0 + $0xf] sm:$0x1]   ;;  %v103_v1 = vld [vmem:[%s207_s0 + $0xd] sm:$0x1]   ;;  %v102_v2 = vld [vmem:[%s207_s0 + $0xe] sm:$0x1]  }
   0x2   :  { %7 = vrot.lane.b32.xlu0 %v101_v0, %s131_s10  ;;  %19 = vrot.lane.b32.xlu1 %v103_v1, %s132_s11  ;;  %v104_v3 = vld [vmem:[%s207_s0 + $0xc] sm:$0x1]   ;;  %s133_s16 = smov 56   ;;  %s134_s17 = smov 48   ;;  %v105_v4 = vld [vmem:[%s207_s0 + $0xb] sm:$0x1]  }
   0x3   :  { %v106_v5 = vld [vmem:[%s207_s0 + $0xa] sm:$0x1]   ;;  %v2_v6 = vld [vmem:[%s207_s0] sm:$0x1]   ;;  %s135_s24 = smov 44   ;;  %s136_s25 = smov 40  }
   0x4   :  { %4 = vst.msk [vmem:[#allocation0] sm:$0x1] %vm3_vm0, %v2_v6   ;;  %v107_v7 = vld [vmem:[%s207_s0 + $0x9] sm:$0x1]   ;;  %v108_v8 = vld [vmem:[%s207_s0 + $0x8] sm:$0x1]  }
   0x5   :  { %s137_s30 = smov 36   ;;  %s138_s2 = smov 32   ;;  %v109_v9 = vld [vmem:[%s207_s0 + $0x7] sm:$0x1]   ;;  %v110_v10 = vld [vmem:[%s207_s0 + $0x6] sm:$0x1]  }
   0x6   :  { %13 = vrot.lane.b32.xlu0 %v102_v2, %s133_s16  ;;  %25 = vrot.lane.b32.xlu1 %v104_v3, %s134_s17  ;;  %s139_s7 = smov 28   ;;  %s140_s8 = smov 24   ;;  %v111_v11 = vld [vmem:[%s207_s0 + $0x5] sm:$0x1]   ;;  %v112_v12 = vld [vmem:[%s207_s0 + $0x4] sm:$0x1]  }
   0x7   :  { %s141_s13 = smov 20   ;;  %s142_s14 = smov 16   ;;  %v113_v13 = vld [vmem:[%s207_s0 + $0x3] sm:$0x1]   ;;  %v114_v14 = vld [vmem:[%s207_s0 + $0x2] sm:$0x1]  }
   0x8   :  { %s143_s19 = smov 12   ;;  %s144_s20 = smov 8   ;;  %v115_v15 = vld [vmem:[%s207_s0 + $0x1] sm:$0x1]   ;;  %vm27_vm4 = vcmask 425344   ;;  %vm33_vm5 = vcmask 392544  }
   0x9   :  { %s145_s0 = smov 4   ;;  %vm39_vm6 = vcmask 359744   ;;  %vm45_vm7 = vcmask 326944   ;;  %vm51_vm8 = vcmask 294144   ;;  %vm57_vm9 = vcmask 261344  }
   0xa   :  { %31 = vrot.lane.b32.xlu0 %v105_v4, %s135_s24  ;;  %37 = vrot.lane.b32.xlu1 %v106_v5, %s136_s25  ;;  %vm63_vm10 = vcmask 228544   ;;  %vm69_vm11 = vcmask 195744   ;;  %vm75_vm12 = vcmask 162944   ;;  %vm81_vm13 = vcmask 130144  }
   0xb   :  { %vm87_vm14 = vcmask 97344   ;;  %vm93_vm15 = vcmask 64544  }
   0xe   :  { %43 = vrot.lane.b32.xlu0 %v107_v7, %s137_s30  ;;  %49 = vrot.lane.b32.xlu1 %v108_v8, %s138_s2 }
  0x12   :  { %55 = vrot.lane.b32.xlu0 %v109_v9, %s139_s7  ;;  %61 = vrot.lane.b32.xlu1 %v110_v10, %s140_s8 }
  0x16   :  { %67 = vrot.lane.b32.xlu0 %v111_v11, %s141_s13  ;;  %73 = vrot.lane.b32.xlu1 %v112_v12, %s142_s14 }
  0x1a   :  { %79 = vrot.lane.b32.xlu0 %v113_v13, %s143_s19  ;;  %85 = vrot.lane.b32.xlu1 %v114_v14, %s144_s20 }
  0x1e   :  { %91 = vrot.lane.b32.xlu0 %v115_v15, %s145_s0 }
  0x74   :  { %v8_v16 = vpop.permute.xlu0 %7   ;;  %v20_v17 = vpop.permute.xlu1 %19  }
  0x75   :  { %10 = vst.msk [vmem:[#allocation0] sm:$0x1] %vm9_vm1, %v8_v16  }
  0x78   :  { %v14_v18 = vpop.permute.xlu0 %13   ;;  %v26_v19 = vpop.permute.xlu1 %25  }
  0x79   :  { %16 = vst.msk [vmem:[#allocation0] sm:$0x1] %vm15_vm2, %v14_v18  }
  0x7a   :  { %22 = vst.msk [vmem:[#allocation0] sm:$0x1] %vm21_vm3, %v20_v17  }
  0x7b   :  { %28 = vst.msk [vmem:[#allocation0] sm:$0x1] %vm27_vm4, %v26_v19  }
  0x7c   :  { %v32_v20 = vpop.permute.xlu0 %31   ;;  %v38_v21 = vpop.permute.xlu1 %37  }
  0x7d   :  { %34 = vst.msk [vmem:[#allocation0] sm:$0x1] %vm33_vm5, %v32_v20  }
  0x7e   :  { %40 = vst.msk [vmem:[#allocation0] sm:$0x1] %vm39_vm6, %v38_v21  }
  0x80   :  { %v44_v22 = vpop.permute.xlu0 %43   ;;  %v50_v23 = vpop.permute.xlu1 %49  }
  0x81   :  { %46 = vst.msk [vmem:[#allocation0] sm:$0x1] %vm45_vm7, %v44_v22  }
  0x82   :  { %52 = vst.msk [vmem:[#allocation0] sm:$0x1] %vm51_vm8, %v50_v23  }
  0x84   :  { %v56_v24 = vpop.permute.xlu0 %55   ;;  %v62_v25 = vpop.permute.xlu1 %61  }
  0x85   :  { %58 = vst.msk [vmem:[#allocation0] sm:$0x1] %vm57_vm9, %v56_v24  }
  0x86   :  { %64 = vst.msk [vmem:[#allocation0] sm:$0x1] %vm63_vm10, %v62_v25  }
  0x88   :  { %v68_v26 = vpop.permute.xlu0 %67   ;;  %v74_v27 = vpop.permute.xlu1 %73  }
  0x89   :  { %70 = vst.msk [vmem:[#allocation0] sm:$0x1] %vm69_vm11, %v68_v26  }
  0x8a   :  { %76 = vst.msk [vmem:[#allocation0] sm:$0x1] %vm75_vm12, %v74_v27  }
  0x8c   :  { %v80_v28 = vpop.permute.xlu0 %79   ;;  %v86_v29 = vpop.permute.xlu1 %85  }
  0x8d   :  { %82 = vst.msk [vmem:[#allocation0] sm:$0x1] %vm81_vm13, %v80_v28  }
  0x8e   :  { %88 = vst.msk [vmem:[#allocation0] sm:$0x1] %vm87_vm14, %v86_v29  }
  0x90   :  { %v92_v30 = vpop.permute.xlu0 %91  }
  0x91   :  { %94 = vst.msk [vmem:[#allocation0] sm:$0x1] %vm93_vm15, %v92_v30  }
  0x98   :  { %v98_v31 = vld [vmem:[#allocation0] sm:$0x1] }
  0x99   :  { %100 = vst [vmem:[%s208_s1] sm:$0x1] %v98_v31 }

// kernel: tile.53
= control target key start
LH: loop header
LB: loop body
LE: loop exit
PB: predicated region body
PF: predicated region fallthrough
CT: control target
= control target key end

     0   :  { %s208_s0 = inlined_call_operand.vmem [shape: f32[4], index: 0, kind: input, shape index: {}]   ;;  %s209_s1 = inlined_call_operand.vmem [shape: f32[256,4], index: 1, kind: output, shape index: {}]  }
   0x1   :  { %v4_v0 = vld [vmem:[%s208_s0] ss:$0 sm:$0xff] }
   0x2   :  { %5 = vst [vmem:[%s209_s1] sm:$0xff] %v4_v0  ;;  %68 = vst [vmem:[%s209_s1 + $0x8] sm:$0xff] %v4_v0 }
   0x3   :  { %69 = vst [vmem:[%s209_s1 + $0x10] sm:$0xff] %v4_v0  ;;  %70 = vst [vmem:[%s209_s1 + $0x18] sm:$0xff] %v4_v0 }
   0x4   :  { %71 = vst [vmem:[%s209_s1 + $0x20] sm:$0xff] %v4_v0  ;;  %72 = vst [vmem:[%s209_s1 + $0x28] sm:$0xff] %v4_v0 }
   0x5   :  { %73 = vst [vmem:[%s209_s1 + $0x30] sm:$0xff] %v4_v0  ;;  %74 = vst [vmem:[%s209_s1 + $0x38] sm:$0xff] %v4_v0 }
   0x6   :  { %75 = vst [vmem:[%s209_s1 + $0x40] sm:$0xff] %v4_v0  ;;  %76 = vst [vmem:[%s209_s1 + $0x48] sm:$0xff] %v4_v0 }
   0x7   :  { %77 = vst [vmem:[%s209_s1 + $0x50] sm:$0xff] %v4_v0  ;;  %78 = vst [vmem:[%s209_s1 + $0x58] sm:$0xff] %v4_v0 }
   0x8   :  { %79 = vst [vmem:[%s209_s1 + $0x60] sm:$0xff] %v4_v0  ;;  %80 = vst [vmem:[%s209_s1 + $0x68] sm:$0xff] %v4_v0 }
   0x9   :  { %81 = vst [vmem:[%s209_s1 + $0x70] sm:$0xff] %v4_v0  ;;  %82 = vst [vmem:[%s209_s1 + $0x78] sm:$0xff] %v4_v0 }
   0xa   :  { %83 = vst [vmem:[%s209_s1 + $0x80] sm:$0xff] %v4_v0  ;;  %84 = vst [vmem:[%s209_s1 + $0x88] sm:$0xff] %v4_v0 }
   0xb   :  { %85 = vst [vmem:[%s209_s1 + $0x90] sm:$0xff] %v4_v0  ;;  %86 = vst [vmem:[%s209_s1 + $0x98] sm:$0xff] %v4_v0 }
   0xc   :  { %87 = vst [vmem:[%s209_s1 + $0xa0] sm:$0xff] %v4_v0  ;;  %88 = vst [vmem:[%s209_s1 + $0xa8] sm:$0xff] %v4_v0 }
   0xd   :  { %89 = vst [vmem:[%s209_s1 + $0xb0] sm:$0xff] %v4_v0  ;;  %90 = vst [vmem:[%s209_s1 + $0xb8] sm:$0xff] %v4_v0 }
   0xe   :  { %91 = vst [vmem:[%s209_s1 + $0xc0] sm:$0xff] %v4_v0  ;;  %92 = vst [vmem:[%s209_s1 + $0xc8] sm:$0xff] %v4_v0 }
   0xf   :  { %93 = vst [vmem:[%s209_s1 + $0xd0] sm:$0xff] %v4_v0  ;;  %94 = vst [vmem:[%s209_s1 + $0xd8] sm:$0xff] %v4_v0 }
  0x10   :  { %95 = vst [vmem:[%s209_s1 + $0xe0] sm:$0xff] %v4_v0  ;;  %96 = vst [vmem:[%s209_s1 + $0xe8] sm:$0xff] %v4_v0 }
  0x11   :  { %97 = vst [vmem:[%s209_s1 + $0xf0] sm:$0xff] %v4_v0  ;;  %98 = vst [vmem:[%s209_s1 + $0xf8] sm:$0xff] %v4_v0 }

// kernel: tile.54
= control target key start
LH: loop header
LB: loop body
LE: loop exit
PB: predicated region body
PF: predicated region fallthrough
CT: control target
= control target key end

     0   :  { %vm5_vm0 = vcmask 1041409   ;;  %vm9_vm1 = vcmask 1042434   ;;  %vm13_vm2 = vcmask 1043459   ;;  %vm17_vm3 = vcmask 1044484   ;;  %s1465_s19 = smov 124   ;;  %s1466_s9 = smov 116   ;;  %s2522_s0 = inlined_call_operand.vmem [shape: f32[256,4], index: 0, kind: input, shape index: {}]   ;;  %s2523_s1 = inlined_call_operand.vmem [shape: f32[1,1024], index: 1, kind: output, shape index: {}]  }
   0x1   :  { %v1179_v0 = vld [vmem:[%s2522_s0 + $0x1f] sm:$0x1]   ;;  %vm21_vm4 = vcmask 1045509   ;;  %vm25_vm5 = vcmask 1046534   ;;  %vm29_vm6 = vcmask 1047559   ;;  %s1467_s26 = smov 120  }
   0x2   :  { %v1180_v1 = vld [vmem:[%s2522_s0 + $0x3e] sm:$0x2]   ;;  %v1195_v10 = vld [vmem:[%s2522_s0 + $0x1d] sm:$0x1]   ;;  %v1187_v25 = vld [vmem:[%s2522_s0 + $0x1e] sm:$0x1]  }
   0x3   :  { %v39_v2 = vsel %vm5_vm0, %v1180_v1, %v1179_v0  ;;  %v1181_v3 = vld [vmem:[%s2522_s0 + $0x5d] sm:$0x4]   ;;  %v1196_v11 = vld [vmem:[%s2522_s0 + $0x3c] sm:$0x2]   ;;  %v1188_v26 = vld [vmem:[%s2522_s0 + $0x3d] sm:$0x2]  }
   0x4   :  { %v1182_v4 = vld [vmem:[%s2522_s0 + $0x7c] sm:$0x8]   ;;  %v43_v6 = vsel %vm9_vm1, %v1181_v3, %v39_v2  ;;  %v1197_v12 = vld [vmem:[%s2522_s0 + $0x5b] sm:$0x4]   ;;  %v109_v15 = vsel %vm5_vm0, %v1196_v11, %v1195_v10  ;;  %v1189_v27 = vld [vmem:[%s2522_s0 + $0x5c] sm:$0x4]   ;;  %v74_v30 = vsel %vm5_vm0, %v1188_v26, %v1187_v25 }
   0x5   :  { %v1183_v5 = vld [vmem:[%s2522_s0 + $0x9b] sm:$0x10]   ;;  %v47_v9 = vsel %vm13_vm2, %v1182_v4, %v43_v6  ;;  %v1198_v16 = vld [vmem:[%s2522_s0 + $0x7a] sm:$0x8]   ;;  %v113_v19 = vsel %vm9_vm1, %v1197_v12, %v109_v15  ;;  %v1190_v31 = vld [vmem:[%s2522_s0 + $0x7b] sm:$0x8]   ;;  %v78_v34 = vsel %vm9_vm1, %v1189_v27, %v74_v30 }
   0x6   :  { %v1184_v7 = vld [vmem:[%s2522_s0 + $0xba] sm:$0x20]   ;;  %v51_v13 = vsel %vm17_vm3, %v1183_v5, %v47_v9  ;;  %v1199_v17 = vld [vmem:[%s2522_s0 + $0x99] sm:$0x10]   ;;  %v117_v24 = vsel %vm13_vm2, %v1198_v16, %v113_v19  ;;  %v1191_v32 = vld [vmem:[%s2522_s0 + $0x9a] sm:$0x10]   ;;  %v82_v39 = vsel %vm13_vm2, %v1190_v31, %v78_v34 }
   0x7   :  { %v1185_v8 = vld [vmem:[%s2522_s0 + $0xd9] sm:$0x40]   ;;  %v55_v18 = vsel %vm21_vm4, %v1184_v7, %v51_v13  ;;  %v1200_v20 = vld [vmem:[%s2522_s0 + $0xb8] sm:$0x20]   ;;  %v121_v29 = vsel %vm17_vm3, %v1199_v17, %v117_v24  ;;  %v1192_v35 = vld [vmem:[%s2522_s0 + $0xb9] sm:$0x20]   ;;  %v86_v44 = vsel %vm17_vm3, %v1191_v32, %v82_v39 }
   0x8   :  { %v1186_v14 = vld [vmem:[%s2522_s0 + $0xf8] sm:$0x80]   ;;  %v1201_v21 = vld [vmem:[%s2522_s0 + $0xd7] sm:$0x40]   ;;  %v59_v23 = vsel %vm25_vm5, %v1185_v8, %v55_v18  ;;  %v125_v33 = vsel %vm21_vm4, %v1200_v20, %v121_v29  ;;  %v1193_v36 = vld [vmem:[%s2522_s0 + $0xd8] sm:$0x40]   ;;  %v90_v49 = vsel %vm21_vm4, %v1192_v35, %v86_v44 }
   0x9   :  { %v1202_v22 = vld [vmem:[%s2522_s0 + $0xf6] sm:$0x80]   ;;  %v63_v28 = vsel %vm29_vm6, %v1186_v14, %v59_v23  ;;  %v1203_v37 = vld [vmem:[%s2522_s0 + $0x1c] sm:$0x1]   ;;  %v129_v38 = vsel %vm25_vm5, %v1201_v21, %v125_v33  ;;  %v1194_v45 = vld [vmem:[%s2522_s0 + $0xf7] sm:$0x80]   ;;  %v94_v54 = vsel %vm25_vm5, %v1193_v36, %v90_v49 }
   0xa   :  { %64 = vrot.lane.b32.xlu0 %v63_v28, %s1465_s19  ;;  %v1204_v40 = vld [vmem:[%s2522_s0 + $0x3b] sm:$0x2]   ;;  %v133_v43 = vsel %vm29_vm6, %v1202_v22, %v129_v38  ;;  %v1211_v53 = vld [vmem:[%s2522_s0 + $0x1b] sm:$0x1]   ;;  %v98_v59 = vsel %vm29_vm6, %v1194_v45, %v94_v54  ;;  %v1219_v3 = vld [vmem:[%s2522_s0 + $0x1a] sm:$0x1]  }
   0xb   :  { %v1205_v41 = vld [vmem:[%s2522_s0 + $0x5a] sm:$0x4]   ;;  %v144_v46 = vsel %vm5_vm0, %v1204_v40, %v1203_v37  ;;  %134 = vrot.lane.b32.xlu1 %v133_v43, %s1466_s9  ;;  %v1212_v56 = vld [vmem:[%s2522_s0 + $0x3a] sm:$0x2]   ;;  %v1220_v4 = vld [vmem:[%s2522_s0 + $0x39] sm:$0x2]  }
   0xc   :  { %v1206_v42 = vld [vmem:[%s2522_s0 + $0x79] sm:$0x8]   ;;  %v148_v50 = vsel %vm9_vm1, %v1205_v41, %v144_v46  ;;  %v1213_v57 = vld [vmem:[%s2522_s0 + $0x59] sm:$0x4]   ;;  %v179_v61 = vsel %vm5_vm0, %v1212_v56, %v1211_v53  ;;  %v214_v7 = vsel %vm5_vm0, %v1220_v4, %v1219_v3  ;;  %v1221_v8 = vld [vmem:[%s2522_s0 + $0x58] sm:$0x4]  }
   0xd   :  { %v1207_v47 = vld [vmem:[%s2522_s0 + $0x98] sm:$0x10]   ;;  %v152_v55 = vsel %vm13_vm2, %v1206_v42, %v148_v50  ;;  %v1214_v58 = vld [vmem:[%s2522_s0 + $0x78] sm:$0x8]   ;;  %v183_v1 = vsel %vm9_vm1, %v1213_v57, %v179_v61  ;;  %v1222_v9 = vld [vmem:[%s2522_s0 + $0x77] sm:$0x8]   ;;  %v218_v14 = vsel %vm9_vm1, %v1221_v8, %v214_v7 }
   0xe   :  { %v1208_v48 = vld [vmem:[%s2522_s0 + $0xb7] sm:$0x20]   ;;  %v156_v60 = vsel %vm17_vm3, %v1207_v47, %v152_v55  ;;  %v1215_v62 = vld [vmem:[%s2522_s0 + $0x97] sm:$0x10]   ;;  %99 = vrot.lane.b32.xlu0 %v98_v59, %s1467_s26  ;;  %v187_v6 = vsel %vm13_vm2, %v1214_v58, %v183_v1  ;;  %v1223_v10 = vld [vmem:[%s2522_s0 + $0x96] sm:$0x10]   ;;  %v222_v18 = vsel %vm13_vm2, %v1222_v9, %v218_v14 }
   0xf   :  { %v1209_v51 = vld [vmem:[%s2522_s0 + $0xd6] sm:$0x40]   ;;  %v1216_v63 = vld [vmem:[%s2522_s0 + $0xb6] sm:$0x20]   ;;  %v160_v0 = vsel %vm21_vm4, %v1208_v48, %v156_v60  ;;  %v191_v12 = vsel %vm17_vm3, %v1215_v62, %v187_v6  ;;  %v1224_v15 = vld [vmem:[%s2522_s0 + $0xb5] sm:$0x20]   ;;  %v226_v23 = vsel %vm17_vm3, %v1223_v10, %v222_v18 }
  0x10   :  { %v1210_v52 = vld [vmem:[%s2522_s0 + $0xf5] sm:$0x80]   ;;  %v1217_v2 = vld [vmem:[%s2522_s0 + $0xd5] sm:$0x40]   ;;  %v164_v5 = vsel %vm25_vm5, %v1209_v51, %v160_v0  ;;  %v1225_v16 = vld [vmem:[%s2522_s0 + $0xd4] sm:$0x40]   ;;  %v195_v17 = vsel %vm21_vm4, %v1216_v63, %v191_v12  ;;  %v230_v29 = vsel %vm21_vm4, %v1224_v15, %v226_v23 }
  0x11   :  { %v168_v11 = vsel %vm29_vm6, %v1210_v52, %v164_v5  ;;  %v1218_v13 = vld [vmem:[%s2522_s0 + $0xf4] sm:$0x80]   ;;  %s1468_s16 = smov 112   ;;  %v1226_v19 = vld [vmem:[%s2522_s0 + $0xf3] sm:$0x80]   ;;  %v199_v22 = vsel %vm25_vm5, %v1217_v2, %v195_v17  ;;  %s1469_s4 = smov 108   ;;  %v234_v33 = vsel %vm25_vm5, %v1225_v16, %v230_v29 }
  0x12   :  { %169 = vrot.lane.b32.xlu1 %v168_v11, %s1468_s16  ;;  %v1227_v20 = vld [vmem:[%s2522_s0 + $0x19] sm:$0x1]   ;;  %v203_v28 = vsel %vm29_vm6, %v1218_v13, %v199_v22  ;;  %v1235_v35 = vld [vmem:[%s2522_s0 + $0x18] sm:$0x1]   ;;  %v238_v38 = vsel %vm29_vm6, %v1226_v19, %v234_v33  ;;  %s1470_s17 = smov 104   ;;  %s1471_s5 = smov 100  }
  0x13   :  { %v1228_v21 = vld [vmem:[%s2522_s0 + $0x38] sm:$0x2]   ;;  %204 = vrot.lane.b32.xlu0 %v203_v28, %s1469_s4  ;;  %v1236_v36 = vld [vmem:[%s2522_s0 + $0x37] sm:$0x2]   ;;  %v1243_v51 = vld [vmem:[%s2522_s0 + $0x17] sm:$0x1]  }
  0x14   :  { %v249_v24 = vsel %vm5_vm0, %v1228_v21, %v1227_v20  ;;  %v1229_v25 = vld [vmem:[%s2522_s0 + $0x57] sm:$0x4]   ;;  %v1237_v37 = vld [vmem:[%s2522_s0 + $0x56] sm:$0x4]   ;;  %v284_v41 = vsel %vm5_vm0, %v1236_v36, %v1235_v35  ;;  %v1244_v52 = vld [vmem:[%s2522_s0 + $0x36] sm:$0x2]  }
  0x15   :  { %v1230_v26 = vld [vmem:[%s2522_s0 + $0x76] sm:$0x8]   ;;  %v253_v30 = vsel %vm9_vm1, %v1229_v25, %v249_v24  ;;  %v1238_v42 = vld [vmem:[%s2522_s0 + $0x75] sm:$0x8]   ;;  %v288_v45 = vsel %vm9_vm1, %v1237_v37, %v284_v41  ;;  %v1245_v53 = vld [vmem:[%s2522_s0 + $0x55] sm:$0x4]   ;;  %v319_v56 = vsel %vm5_vm0, %v1244_v52, %v1243_v51 }
  0x16   :  { %v1231_v27 = vld [vmem:[%s2522_s0 + $0x95] sm:$0x10]   ;;  %v257_v34 = vsel %vm13_vm2, %v1230_v26, %v253_v30  ;;  %v1239_v43 = vld [vmem:[%s2522_s0 + $0x94] sm:$0x10]   ;;  %239 = vrot.lane.b32.xlu1 %v238_v38, %s1470_s17  ;;  %v292_v50 = vsel %vm13_vm2, %v1238_v42, %v288_v45  ;;  %v1246_v57 = vld [vmem:[%s2522_s0 + $0x74] sm:$0x8]   ;;  %v323_v60 = vsel %vm9_vm1, %v1245_v53, %v319_v56 }
  0x17   :  { %v1232_v31 = vld [vmem:[%s2522_s0 + $0xb4] sm:$0x20]   ;;  %v261_v39 = vsel %vm17_vm3, %v1231_v27, %v257_v34  ;;  %v1240_v46 = vld [vmem:[%s2522_s0 + $0xb3] sm:$0x20]   ;;  %v296_v55 = vsel %vm17_vm3, %v1239_v43, %v292_v50  ;;  %v1247_v58 = vld [vmem:[%s2522_s0 + $0x93] sm:$0x10]   ;;  %v327_v1 = vsel %vm13_vm2, %v1246_v57, %v323_v60 }
  0x18   :  { %v1233_v32 = vld [vmem:[%s2522_s0 + $0xd3] sm:$0x40]   ;;  %v265_v44 = vsel %vm21_vm4, %v1232_v31, %v261_v39  ;;  %v1241_v47 = vld [vmem:[%s2522_s0 + $0xd2] sm:$0x40]   ;;  %v300_v59 = vsel %vm21_vm4, %v1240_v46, %v296_v55  ;;  %v1248_v61 = vld [vmem:[%s2522_s0 + $0xb2] sm:$0x20]   ;;  %v331_v6 = vsel %vm17_vm3, %v1247_v58, %v327_v1 }
  0x19   :  { %v1234_v40 = vld [vmem:[%s2522_s0 + $0xf2] sm:$0x80]   ;;  %v1242_v48 = vld [vmem:[%s2522_s0 + $0xf1] sm:$0x80]   ;;  %v269_v49 = vsel %vm25_vm5, %v1233_v32, %v265_v44  ;;  %v1249_v62 = vld [vmem:[%s2522_s0 + $0xd1] sm:$0x40]   ;;  %v304_v0 = vsel %vm25_vm5, %v1241_v47, %v300_v59  ;;  %v335_v11 = vsel %vm21_vm4, %v1248_v61, %v331_v6 }
  0x1a   :  { %v273_v54 = vsel %vm29_vm6, %v1234_v40, %v269_v49  ;;  %v1251_v63 = vld [vmem:[%s2522_s0 + $0x16] sm:$0x1]   ;;  %v308_v5 = vsel %vm29_vm6, %v1242_v48, %v304_v0  ;;  %v1250_v7 = vld [vmem:[%s2522_s0 + $0xf0] sm:$0x80]   ;;  %s1472_s24 = smov 96   ;;  %v339_v16 = vsel %vm25_vm5, %v1249_v62, %v335_v11  ;;  %s1473_s12 = smov 92  }
  0x1b   :  { %274 = vrot.lane.b32.xlu0 %v273_v54, %s1471_s5  ;;  %v1252_v2 = vld [vmem:[%s2522_s0 + $0x35] sm:$0x2]   ;;  %309 = vrot.lane.b32.xlu1 %v308_v5, %s1472_s24  ;;  %v1259_v15 = vld [vmem:[%s2522_s0 + $0x15] sm:$0x1]   ;;  %v343_v21 = vsel %vm29_vm6, %v1250_v7, %v339_v16  ;;  %s1474_s2 = smov 88   ;;  %s1475_s19 = smov 84  }
  0x1c   :  { %v1253_v3 = vld [vmem:[%s2522_s0 + $0x54] sm:$0x4]   ;;  %v354_v8 = vsel %vm5_vm0, %v1252_v2, %v1251_v63  ;;  %v1260_v18 = vld [vmem:[%s2522_s0 + $0x34] sm:$0x2]   ;;  %v1267_v29 = vld [vmem:[%s2522_s0 + $0x14] sm:$0x1]  }
  0x1d   :  { %v1254_v4 = vld [vmem:[%s2522_s0 + $0x73] sm:$0x8]   ;;  %v358_v12 = vsel %vm9_vm1, %v1253_v3, %v354_v8  ;;  %v1261_v19 = vld [vmem:[%s2522_s0 + $0x53] sm:$0x4]   ;;  %v389_v23 = vsel %vm5_vm0, %v1260_v18, %v1259_v15  ;;  %v1268_v30 = vld [vmem:[%s2522_s0 + $0x33] sm:$0x2]  }
  0x1e   :  { %v1255_v9 = vld [vmem:[%s2522_s0 + $0x92] sm:$0x10]   ;;  %v362_v17 = vsel %vm13_vm2, %v1254_v4, %v358_v12  ;;  %v1262_v20 = vld [vmem:[%s2522_s0 + $0x72] sm:$0x8]   ;;  %v393_v27 = vsel %vm9_vm1, %v1261_v19, %v389_v23  ;;  %v424_v33 = vsel %vm5_vm0, %v1268_v30, %v1267_v29  ;;  %v1269_v34 = vld [vmem:[%s2522_s0 + $0x52] sm:$0x4]  }
  0x1f   :  { %v1256_v10 = vld [vmem:[%s2522_s0 + $0xb1] sm:$0x20]   ;;  %v366_v22 = vsel %vm17_vm3, %v1255_v9, %v362_v17  ;;  %v1263_v24 = vld [vmem:[%s2522_s0 + $0x91] sm:$0x10]   ;;  %344 = vrot.lane.b32.xlu0 %v343_v21, %s1473_s12  ;;  %v397_v32 = vsel %vm13_vm2, %v1262_v20, %v393_v27  ;;  %v1270_v35 = vld [vmem:[%s2522_s0 + $0x71] sm:$0x8]   ;;  %v428_v40 = vsel %vm9_vm1, %v1269_v34, %v424_v33 }
  0x20   :  { %v1257_v13 = vld [vmem:[%s2522_s0 + $0xd0] sm:$0x40]   ;;  %v1264_v25 = vld [vmem:[%s2522_s0 + $0xb0] sm:$0x20]   ;;  %v370_v26 = vsel %vm21_vm4, %v1256_v10, %v366_v22  ;;  %v1271_v36 = vld [vmem:[%s2522_s0 + $0x90] sm:$0x10]   ;;  %v401_v38 = vsel %vm17_vm3, %v1263_v24, %v397_v32  ;;  %v432_v44 = vsel %vm13_vm2, %v1270_v35, %v428_v40 }
  0x21   :  { %v1258_v14 = vld [vmem:[%s2522_s0 + $0xef] sm:$0x80]   ;;  %v1265_v28 = vld [vmem:[%s2522_s0 + $0xcf] sm:$0x40]   ;;  %v374_v31 = vsel %vm25_vm5, %v1257_v13, %v370_v26  ;;  %v1272_v41 = vld [vmem:[%s2522_s0 + $0xaf] sm:$0x20]   ;;  %v405_v43 = vsel %vm21_vm4, %v1264_v25, %v401_v38  ;;  %v436_v49 = vsel %vm17_vm3, %v1271_v36, %v432_v44 }
  0x22   :  { %v378_v37 = vsel %vm29_vm6, %v1258_v14, %v374_v31  ;;  %v1266_v39 = vld [vmem:[%s2522_s0 + $0xee] sm:$0x80]   ;;  %v1273_v42 = vld [vmem:[%s2522_s0 + $0xce] sm:$0x40]   ;;  %v1275_v46 = vld [vmem:[%s2522_s0 + $0x13] sm:$0x1]   ;;  %v409_v48 = vsel %vm25_vm5, %v1265_v28, %v405_v43  ;;  %v440_v55 = vsel %vm21_vm4, %v1272_v41, %v436_v49 }
  0x23   :  { %379 = vrot.lane.b32.xlu1 %v378_v37, %s1474_s2  ;;  %v1274_v45 = vld [vmem:[%s2522_s0 + $0xed] sm:$0x80]   ;;  %v1276_v47 = vld [vmem:[%s2522_s0 + $0x32] sm:$0x2]   ;;  %v413_v54 = vsel %vm29_vm6, %v1266_v39, %v409_v48  ;;  %v444_v59 = vsel %vm25_vm5, %v1273_v42, %v440_v55  ;;  %v1283_v61 = vld [vmem:[%s2522_s0 + $0x12] sm:$0x1]  }
  0x24   :  { %v459_v50 = vsel %vm5_vm0, %v1276_v47, %v1275_v46  ;;  %v1277_v51 = vld [vmem:[%s2522_s0 + $0x51] sm:$0x4]   ;;  %414 = vrot.lane.b32.xlu0 %v413_v54, %s1475_s19  ;;  %v1284_v62 = vld [vmem:[%s2522_s0 + $0x31] sm:$0x2]   ;;  %v448_v0 = vsel %vm29_vm6, %v1274_v45, %v444_v59  ;;  %s1476_s3 = smov 80   ;;  %s1477_s20 = smov 76  }
  0x25   :  { %v1278_v52 = vld [vmem:[%s2522_s0 + $0x70] sm:$0x8]   ;;  %v463_v56 = vsel %vm9_vm1, %v1277_v51, %v459_v50  ;;  %v1285_v63 = vld [vmem:[%s2522_s0 + $0x50] sm:$0x4]   ;;  %v494_v3 = vsel %vm5_vm0, %v1284_v62, %v1283_v61  ;;  %v1291_v13 = vld [vmem:[%s2522_s0 + $0x11] sm:$0x1]  }
  0x26   :  { %v1279_v53 = vld [vmem:[%s2522_s0 + $0x8f] sm:$0x10]   ;;  %v467_v60 = vsel %vm13_vm2, %v1278_v52, %v463_v56  ;;  %v1286_v4 = vld [vmem:[%s2522_s0 + $0x6f] sm:$0x8]   ;;  %v498_v7 = vsel %vm9_vm1, %v1285_v63, %v494_v3  ;;  %v1292_v14 = vld [vmem:[%s2522_s0 + $0x30] sm:$0x2]  }
  0x27   :  { %v1280_v57 = vld [vmem:[%s2522_s0 + $0xae] sm:$0x20]   ;;  %v471_v1 = vsel %vm17_vm3, %v1279_v53, %v467_v60  ;;  %v1287_v5 = vld [vmem:[%s2522_s0 + $0x8e] sm:$0x10]   ;;  %449 = vrot.lane.b32.xlu1 %v448_v0, %s1476_s3  ;;  %v502_v12 = vsel %vm13_vm2, %v1286_v4, %v498_v7  ;;  %v1293_v15 = vld [vmem:[%s2522_s0 + $0x4f] sm:$0x4]   ;;  %v529_v18 = vsel %vm5_vm0, %v1292_v14, %v1291_v13 }
  0x28   :  { %v1281_v58 = vld [vmem:[%s2522_s0 + $0xcd] sm:$0x40]   ;;  %v475_v6 = vsel %vm21_vm4, %v1280_v57, %v471_v1  ;;  %v1288_v8 = vld [vmem:[%s2522_s0 + $0xad] sm:$0x20]   ;;  %v506_v17 = vsel %vm17_vm3, %v1287_v5, %v502_v12  ;;  %v1294_v19 = vld [vmem:[%s2522_s0 + $0x6e] sm:$0x8]   ;;  %v533_v22 = vsel %vm9_vm1, %v1293_v15, %v529_v18 }
  0x29   :  { %v1282_v2 = vld [vmem:[%s2522_s0 + $0xec] sm:$0x80]   ;;  %v1289_v9 = vld [vmem:[%s2522_s0 + $0xcc] sm:$0x40]   ;;  %v479_v11 = vsel %vm25_vm5, %v1281_v58, %v475_v6  ;;  %v1295_v20 = vld [vmem:[%s2522_s0 + $0x8d] sm:$0x10]   ;;  %v510_v21 = vsel %vm21_vm4, %v1288_v8, %v506_v17  ;;  %v537_v27 = vsel %vm13_vm2, %v1294_v19, %v533_v22 }
  0x2a   :  { %v1290_v10 = vld [vmem:[%s2522_s0 + $0xeb] sm:$0x80]   ;;  %v483_v16 = vsel %vm29_vm6, %v1282_v2, %v479_v11  ;;  %v1296_v23 = vld [vmem:[%s2522_s0 + $0xac] sm:$0x20]   ;;  %v1299_v25 = vld [vmem:[%s2522_s0 + $0x10] sm:$0x1]   ;;  %v514_v26 = vsel %vm25_vm5, %v1289_v9, %v510_v21  ;;  %v541_v32 = vsel %vm17_vm3, %v1295_v20, %v537_v27 }
  0x2b   :  { %484 = vrot.lane.b32.xlu0 %v483_v16, %s1477_s20  ;;  %v1297_v24 = vld [vmem:[%s2522_s0 + $0xcb] sm:$0x40]   ;;  %v1300_v28 = vld [vmem:[%s2522_s0 + $0x2f] sm:$0x2]   ;;  %v518_v31 = vsel %vm29_vm6, %v1290_v10, %v514_v26  ;;  %s1478_s10 = smov 72   ;;  %v545_v37 = vsel %vm21_vm4, %v1296_v23, %v541_v32  ;;  %s1479_s27 = smov 68  }
  0x2c   :  { %v1301_v29 = vld [vmem:[%s2522_s0 + $0x4e] sm:$0x4]   ;;  %v1298_v33 = vld [vmem:[%s2522_s0 + $0xea] sm:$0x80]   ;;  %v564_v34 = vsel %vm5_vm0, %v1300_v28, %v1299_v25  ;;  %519 = vrot.lane.b32.xlu1 %v518_v31, %s1478_s10  ;;  %v1307_v41 = vld [vmem:[%s2522_s0 + $0xf] sm:$0x1]   ;;  %v549_v42 = vsel %vm25_vm5, %v1297_v24, %v545_v37 }
  0x2d   :  { %v1302_v30 = vld [vmem:[%s2522_s0 + $0x6d] sm:$0x8]   ;;  %v568_v38 = vsel %vm9_vm1, %v1301_v29, %v564_v34  ;;  %v1308_v44 = vld [vmem:[%s2522_s0 + $0x2e] sm:$0x2]   ;;  %v553_v47 = vsel %vm29_vm6, %v1298_v33, %v549_v42  ;;  %v1315_v55 = vld [vmem:[%s2522_s0 + $0xe] sm:$0x1]  }
  0x2e   :  { %v1303_v35 = vld [vmem:[%s2522_s0 + $0x8c] sm:$0x10]   ;;  %v572_v43 = vsel %vm13_vm2, %v1302_v30, %v568_v38  ;;  %v1309_v45 = vld [vmem:[%s2522_s0 + $0x4d] sm:$0x4]   ;;  %v599_v49 = vsel %vm5_vm0, %v1308_v44, %v1307_v41  ;;  %v1316_v56 = vld [vmem:[%s2522_s0 + $0x2d] sm:$0x2]  }
  0x2f   :  { %v1304_v36 = vld [vmem:[%s2522_s0 + $0xab] sm:$0x20]   ;;  %v1310_v46 = vld [vmem:[%s2522_s0 + $0x6c] sm:$0x8]   ;;  %v576_v48 = vsel %vm17_vm3, %v1303_v35, %v572_v43  ;;  %554 = vrot.lane.b32.xlu0 %v553_v47, %s1479_s27  ;;  %v603_v53 = vsel %vm9_vm1, %v1309_v45, %v599_v49  ;;  %v634_v59 = vsel %vm5_vm0, %v1316_v56, %v1315_v55  ;;  %v1317_v60 = vld [vmem:[%s2522_s0 + $0x4c] sm:$0x4]  }
  0x30   :  { %v1305_v39 = vld [vmem:[%s2522_s0 + $0xca] sm:$0x40]   ;;  %v1311_v50 = vld [vmem:[%s2522_s0 + $0x8b] sm:$0x10]   ;;  %v580_v52 = vsel %vm21_vm4, %v1304_v36, %v576_v48  ;;  %v607_v58 = vsel %vm13_vm2, %v1310_v46, %v603_v53  ;;  %v1318_v61 = vld [vmem:[%s2522_s0 + $0x6b] sm:$0x8]   ;;  %v638_v2 = vsel %vm9_vm1, %v1317_v60, %v634_v59 }
  0x31   :  { %v1306_v40 = vld [vmem:[%s2522_s0 + $0xe9] sm:$0x80]   ;;  %v1312_v51 = vld [vmem:[%s2522_s0 + $0xaa] sm:$0x20]   ;;  %v584_v57 = vsel %vm25_vm5, %v1305_v39, %v580_v52  ;;  %v1319_v62 = vld [vmem:[%s2522_s0 + $0x8a] sm:$0x10]   ;;  %v611_v0 = vsel %vm17_vm3, %v1311_v50, %v607_v58  ;;  %v642_v6 = vsel %vm13_vm2, %v1318_v61, %v638_v2 }
  0x32   :  { %v1313_v54 = vld [vmem:[%s2522_s0 + $0xc9] sm:$0x40]   ;;  %v588_v63 = vsel %vm29_vm6, %v1306_v40, %v584_v57  ;;  %v1320_v3 = vld [vmem:[%s2522_s0 + $0xa9] sm:$0x20]   ;;  %s1480_s17 = smov 64   ;;  %v615_v5 = vsel %vm21_vm4, %v1312_v51, %v611_v0  ;;  %v646_v11 = vsel %vm17_vm3, %v1319_v62, %v642_v6  ;;  %s1481_s5 = smov 60  }
  0x33   :  { %v1314_v1 = vld [vmem:[%s2522_s0 + $0xe8] sm:$0x80]   ;;  %v1321_v4 = vld [vmem:[%s2522_s0 + $0xc8] sm:$0x40]   ;;  %589 = vrot.lane.b32.xlu1 %v588_v63, %s1480_s17  ;;  %v1323_v8 = vld [vmem:[%s2522_s0 + $0xd] sm:$0x1]   ;;  %v619_v10 = vsel %vm25_vm5, %v1313_v54, %v615_v5  ;;  %v650_v17 = vsel %vm21_vm4, %v1320_v3, %v646_v11 }
  0x34   :  { %v1322_v7 = vld [vmem:[%s2522_s0 + $0xe7] sm:$0x80]   ;;  %v1324_v9 = vld [vmem:[%s2522_s0 + $0x2c] sm:$0x2]   ;;  %v623_v16 = vsel %vm29_vm6, %v1314_v1, %v619_v10  ;;  %v654_v21 = vsel %vm25_vm5, %v1321_v4, %v650_v17  ;;  %v1331_v23 = vld [vmem:[%s2522_s0 + $0xc] sm:$0x1]  }
  0x35   :  { %v669_v12 = vsel %vm5_vm0, %v1324_v9, %v1323_v8  ;;  %v1325_v13 = vld [vmem:[%s2522_s0 + $0x4b] sm:$0x4]   ;;  %624 = vrot.lane.b32.xlu0 %v623_v16, %s1481_s5  ;;  %v1332_v24 = vld [vmem:[%s2522_s0 + $0x2b] sm:$0x2]   ;;  %v658_v26 = vsel %vm29_vm6, %v1322_v7, %v654_v21  ;;  %s1482_s18 = smov 56   ;;  %s1483_s6 = smov 52  }
  0x36   :  { %v1326_v14 = vld [vmem:[%s2522_s0 + $0x6a] sm:$0x8]   ;;  %v673_v18 = vsel %vm9_vm1, %v1325_v13, %v669_v12  ;;  %v1333_v25 = vld [vmem:[%s2522_s0 + $0x4a] sm:$0x4]   ;;  %v704_v29 = vsel %vm5_vm0, %v1332_v24, %v1331_v23  ;;  %v1339_v39 = vld [vmem:[%s2522_s0 + $0xb] sm:$0x1]  }
  0x37   :  { %v1327_v15 = vld [vmem:[%s2522_s0 + $0x89] sm:$0x10]   ;;  %v677_v22 = vsel %vm13_vm2, %v1326_v14, %v673_v18  ;;  %v1334_v30 = vld [vmem:[%s2522_s0 + $0x69] sm:$0x8]   ;;  %659 = vrot.lane.b32.xlu1 %v658_v26, %s1482_s18  ;;  %v708_v33 = vsel %vm9_vm1, %v1333_v25, %v704_v29  ;;  %v1340_v40 = vld [vmem:[%s2522_s0 + $0x2a] sm:$0x2]  }
  0x38   :  { %v1328_v19 = vld [vmem:[%s2522_s0 + $0xa8] sm:$0x20]   ;;  %v681_v27 = vsel %vm17_vm3, %v1327_v15, %v677_v22  ;;  %v1335_v31 = vld [vmem:[%s2522_s0 + $0x88] sm:$0x10]   ;;  %v712_v38 = vsel %vm13_vm2, %v1334_v30, %v708_v33  ;;  %v1341_v41 = vld [vmem:[%s2522_s0 + $0x49] sm:$0x4]   ;;  %v739_v44 = vsel %vm5_vm0, %v1340_v40, %v1339_v39 }
  0x39   :  { %v1329_v20 = vld [vmem:[%s2522_s0 + $0xc7] sm:$0x40]   ;;  %v685_v32 = vsel %vm21_vm4, %v1328_v19, %v681_v27  ;;  %v1336_v34 = vld [vmem:[%s2522_s0 + $0xa7] sm:$0x20]   ;;  %v716_v43 = vsel %vm17_vm3, %v1335_v31, %v712_v38  ;;  %v1342_v45 = vld [vmem:[%s2522_s0 + $0x68] sm:$0x8]   ;;  %v743_v48 = vsel %vm9_vm1, %v1341_v41, %v739_v44 }
  0x3a   :  { %v1330_v28 = vld [vmem:[%s2522_s0 + $0xe6] sm:$0x80]   ;;  %v1337_v35 = vld [vmem:[%s2522_s0 + $0xc6] sm:$0x40]   ;;  %v689_v37 = vsel %vm25_vm5, %v1329_v20, %v685_v32  ;;  %v1343_v46 = vld [vmem:[%s2522_s0 + $0x87] sm:$0x10]   ;;  %v720_v47 = vsel %vm21_vm4, %v1336_v34, %v716_v43  ;;  %v747_v53 = vsel %vm13_vm2, %v1342_v45, %v743_v48 }
  0x3b   :  { %v1338_v36 = vld [vmem:[%s2522_s0 + $0xe5] sm:$0x80]   ;;  %v693_v42 = vsel %vm29_vm6, %v1330_v28, %v689_v37  ;;  %v1344_v49 = vld [vmem:[%s2522_s0 + $0xa6] sm:$0x20]   ;;  %v1347_v51 = vld [vmem:[%s2522_s0 + $0xa] sm:$0x1]   ;;  %v724_v52 = vsel %vm25_vm5, %v1337_v35, %v720_v47  ;;  %v751_v58 = vsel %vm17_vm3, %v1343_v46, %v747_v53 }
  0x3c   :  { %694 = vrot.lane.b32.xlu0 %v693_v42, %s1483_s6  ;;  %v1345_v50 = vld [vmem:[%s2522_s0 + $0xc5] sm:$0x40]   ;;  %v1348_v54 = vld [vmem:[%s2522_s0 + $0x29] sm:$0x2]   ;;  %v728_v57 = vsel %vm29_vm6, %v1338_v36, %v724_v52  ;;  %s1484_s25 = smov 48   ;;  %v755_v63 = vsel %vm21_vm4, %v1344_v49, %v751_v58  ;;  %s1485_s13 = smov 44  }
  0x3d   :  { %v1349_v55 = vld [vmem:[%s2522_s0 + $0x48] sm:$0x4]   ;;  %v1346_v59 = vld [vmem:[%s2522_s0 + $0xe4] sm:$0x80]   ;;  %v774_v60 = vsel %vm5_vm0, %v1348_v54, %v1347_v51  ;;  %729 = vrot.lane.b32.xlu1 %v728_v57, %s1484_s25  ;;  %v1355_v3 = vld [vmem:[%s2522_s0 + $0x9] sm:$0x1]   ;;  %v759_v4 = vsel %vm25_vm5, %v1345_v50, %v755_v63 }
  0x3e   :  { %v1350_v56 = vld [vmem:[%s2522_s0 + $0x67] sm:$0x8]   ;;  %v778_v0 = vsel %vm9_vm1, %v1349_v55, %v774_v60  ;;  %v1356_v6 = vld [vmem:[%s2522_s0 + $0x28] sm:$0x2]   ;;  %v763_v9 = vsel %vm29_vm6, %v1346_v59, %v759_v4  ;;  %v1363_v17 = vld [vmem:[%s2522_s0 + $0x8] sm:$0x1]  }
  0x3f   :  { %v1351_v61 = vld [vmem:[%s2522_s0 + $0x86] sm:$0x10]   ;;  %v782_v5 = vsel %vm13_vm2, %v1350_v56, %v778_v0  ;;  %v1357_v7 = vld [vmem:[%s2522_s0 + $0x47] sm:$0x4]   ;;  %v809_v11 = vsel %vm5_vm0, %v1356_v6, %v1355_v3  ;;  %v1364_v18 = vld [vmem:[%s2522_s0 + $0x27] sm:$0x2]  }
  0x40   :  { %v1352_v62 = vld [vmem:[%s2522_s0 + $0xa5] sm:$0x20]   ;;  %v1358_v8 = vld [vmem:[%s2522_s0 + $0x66] sm:$0x8]   ;;  %v786_v10 = vsel %vm17_vm3, %v1351_v61, %v782_v5  ;;  %764 = vrot.lane.b32.xlu0 %v763_v9, %s1485_s13  ;;  %v813_v15 = vsel %vm9_vm1, %v1357_v7, %v809_v11  ;;  %v844_v21 = vsel %vm5_vm0, %v1364_v18, %v1363_v17  ;;  %v1365_v22 = vld [vmem:[%s2522_s0 + $0x46] sm:$0x4]  }
  0x41   :  { %v1353_v1 = vld [vmem:[%s2522_s0 + $0xc4] sm:$0x40]   ;;  %v1359_v12 = vld [vmem:[%s2522_s0 + $0x85] sm:$0x10]   ;;  %v790_v14 = vsel %vm21_vm4, %v1352_v62, %v786_v10  ;;  %v817_v20 = vsel %vm13_vm2, %v1358_v8, %v813_v15  ;;  %v1366_v23 = vld [vmem:[%s2522_s0 + $0x65] sm:$0x8]   ;;  %v848_v28 = vsel %vm9_vm1, %v1365_v22, %v844_v21 }
  0x42   :  { %v1354_v2 = vld [vmem:[%s2522_s0 + $0xe3] sm:$0x80]   ;;  %v1360_v13 = vld [vmem:[%s2522_s0 + $0xa4] sm:$0x20]   ;;  %v794_v19 = vsel %vm25_vm5, %v1353_v1, %v790_v14  ;;  %v1367_v24 = vld [vmem:[%s2522_s0 + $0x84] sm:$0x10]   ;;  %v821_v26 = vsel %vm17_vm3, %v1359_v12, %v817_v20  ;;  %v852_v32 = vsel %vm13_vm2, %v1366_v23, %v848_v28 }
  0x43   :  { %v1361_v16 = vld [vmem:[%s2522_s0 + $0xc3] sm:$0x40]   ;;  %v798_v25 = vsel %vm29_vm6, %v1354_v2, %v794_v19  ;;  %v1368_v29 = vld [vmem:[%s2522_s0 + $0xa3] sm:$0x20]   ;;  %s1486_s3 = smov 40   ;;  %v825_v31 = vsel %vm21_vm4, %v1360_v13, %v821_v26  ;;  %v856_v37 = vsel %vm17_vm3, %v1367_v24, %v852_v32  ;;  %s1487_s20 = smov 36  }
  0x44   :  { %v1362_v27 = vld [vmem:[%s2522_s0 + $0xe2] sm:$0x80]   ;;  %v1369_v30 = vld [vmem:[%s2522_s0 + $0xc2] sm:$0x40]   ;;  %799 = vrot.lane.b32.xlu1 %v798_v25, %s1486_s3  ;;  %v1371_v34 = vld [vmem:[%s2522_s0 + $0x7] sm:$0x1]   ;;  %v829_v36 = vsel %vm25_vm5, %v1361_v16, %v825_v31  ;;  %v860_v43 = vsel %vm21_vm4, %v1368_v29, %v856_v37 }
  0x45   :  { %v1370_v33 = vld [vmem:[%s2522_s0 + $0xe1] sm:$0x80]   ;;  %v1372_v35 = vld [vmem:[%s2522_s0 + $0x26] sm:$0x2]   ;;  %v833_v42 = vsel %vm29_vm6, %v1362_v27, %v829_v36  ;;  %v864_v47 = vsel %vm25_vm5, %v1369_v30, %v860_v43  ;;  %v1379_v49 = vld [vmem:[%s2522_s0 + $0x6] sm:$0x1]  }
  0x46   :  { %v879_v38 = vsel %vm5_vm0, %v1372_v35, %v1371_v34  ;;  %v1373_v39 = vld [vmem:[%s2522_s0 + $0x45] sm:$0x4]   ;;  %834 = vrot.lane.b32.xlu0 %v833_v42, %s1487_s20  ;;  %v1380_v50 = vld [vmem:[%s2522_s0 + $0x25] sm:$0x2]   ;;  %v868_v52 = vsel %vm29_vm6, %v1370_v33, %v864_v47  ;;  %s1488_s4 = smov 32   ;;  %s1489_s21 = smov 28  }
  0x47   :  { %v1374_v40 = vld [vmem:[%s2522_s0 + $0x64] sm:$0x8]   ;;  %v883_v44 = vsel %vm9_vm1, %v1373_v39, %v879_v38  ;;  %v1381_v51 = vld [vmem:[%s2522_s0 + $0x44] sm:$0x4]   ;;  %v914_v55 = vsel %vm5_vm0, %v1380_v50, %v1379_v49  ;;  %v1387_v1 = vld [vmem:[%s2522_s0 + $0x5] sm:$0x1]  }
  0x48   :  { %v1375_v41 = vld [vmem:[%s2522_s0 + $0x83] sm:$0x10]   ;;  %v887_v48 = vsel %vm13_vm2, %v1374_v40, %v883_v44  ;;  %v1382_v56 = vld [vmem:[%s2522_s0 + $0x63] sm:$0x8]   ;;  %869 = vrot.lane.b32.xlu1 %v868_v52, %s1488_s4  ;;  %v918_v59 = vsel %vm9_vm1, %v1381_v51, %v914_v55  ;;  %v1388_v2 = vld [vmem:[%s2522_s0 + $0x24] sm:$0x2]  }
  0x49   :  { %v1376_v45 = vld [vmem:[%s2522_s0 + $0xa2] sm:$0x20]   ;;  %v891_v53 = vsel %vm17_vm3, %v1375_v41, %v887_v48  ;;  %v1383_v57 = vld [vmem:[%s2522_s0 + $0x82] sm:$0x10]   ;;  %v922_v0 = vsel %vm13_vm2, %v1382_v56, %v918_v59  ;;  %v1389_v3 = vld [vmem:[%s2522_s0 + $0x43] sm:$0x4]   ;;  %v949_v6 = vsel %vm5_vm0, %v1388_v2, %v1387_v1 }
  0x4a   :  { %v1377_v46 = vld [vmem:[%s2522_s0 + $0xc1] sm:$0x40]   ;;  %v895_v58 = vsel %vm21_vm4, %v1376_v45, %v891_v53  ;;  %v1384_v60 = vld [vmem:[%s2522_s0 + $0xa1] sm:$0x20]   ;;  %v926_v5 = vsel %vm17_vm3, %v1383_v57, %v922_v0  ;;  %v1390_v7 = vld [vmem:[%s2522_s0 + $0x62] sm:$0x8]   ;;  %v953_v10 = vsel %vm9_vm1, %v1389_v3, %v949_v6 }
  0x4b   :  { %v1378_v54 = vld [vmem:[%s2522_s0 + $0xe0] sm:$0x80]   ;;  %v1385_v61 = vld [vmem:[%s2522_s0 + $0xc0] sm:$0x40]   ;;  %v899_v63 = vsel %vm25_vm5, %v1377_v46, %v895_v58  ;;  %v1391_v8 = vld [vmem:[%s2522_s0 + $0x81] sm:$0x10]   ;;  %v930_v9 = vsel %vm21_vm4, %v1384_v60, %v926_v5  ;;  %v957_v15 = vsel %vm13_vm2, %v1390_v7, %v953_v10 }
  0x4c   :  { %v1386_v62 = vld [vmem:[%s2522_s0 + $0xdf] sm:$0x80]   ;;  %v903_v4 = vsel %vm29_vm6, %v1378_v54, %v899_v63  ;;  %v1392_v11 = vld [vmem:[%s2522_s0 + $0xa0] sm:$0x20]   ;;  %v1395_v13 = vld [vmem:[%s2522_s0 + $0x4] sm:$0x1]   ;;  %v934_v14 = vsel %vm25_vm5, %v1385_v61, %v930_v9  ;;  %v961_v20 = vsel %vm17_vm3, %v1391_v8, %v957_v15 }
  0x4d   :  { %904 = vrot.lane.b32.xlu0 %v903_v4, %s1489_s21  ;;  %v1393_v12 = vld [vmem:[%s2522_s0 + $0xbf] sm:$0x40]   ;;  %v1396_v16 = vld [vmem:[%s2522_s0 + $0x23] sm:$0x2]   ;;  %v938_v19 = vsel %vm29_vm6, %v1386_v62, %v934_v14  ;;  %s1490_s11 = smov 24   ;;  %v965_v25 = vsel %vm21_vm4, %v1392_v11, %v961_v20  ;;  %s1491_s28 = smov 20  }
  0x4e   :  { %v1397_v17 = vld [vmem:[%s2522_s0 + $0x42] sm:$0x4]   ;;  %v1394_v21 = vld [vmem:[%s2522_s0 + $0xde] sm:$0x80]   ;;  %v984_v22 = vsel %vm5_vm0, %v1396_v16, %v1395_v13  ;;  %939 = vrot.lane.b32.xlu1 %v938_v19, %s1490_s11  ;;  %v1403_v29 = vld [vmem:[%s2522_s0 + $0x3] sm:$0x1]   ;;  %v969_v30 = vsel %vm25_vm5, %v1393_v12, %v965_v25 }
  0x4f   :  { %v1398_v18 = vld [vmem:[%s2522_s0 + $0x61] sm:$0x8]   ;;  %v988_v26 = vsel %vm9_vm1, %v1397_v17, %v984_v22  ;;  %v1404_v32 = vld [vmem:[%s2522_s0 + $0x22] sm:$0x2]   ;;  %v973_v35 = vsel %vm29_vm6, %v1394_v21, %v969_v30  ;;  %v1411_v43 = vld [vmem:[%s2522_s0 + $0x2] sm:$0x1]  }
  0x50   :  { %v1399_v23 = vld [vmem:[%s2522_s0 + $0x80] sm:$0x10]   ;;  %v992_v31 = vsel %vm13_vm2, %v1398_v18, %v988_v26  ;;  %v1405_v33 = vld [vmem:[%s2522_s0 + $0x41] sm:$0x4]   ;;  %v1019_v37 = vsel %vm5_vm0, %v1404_v32, %v1403_v29  ;;  %v1412_v44 = vld [vmem:[%s2522_s0 + $0x21] sm:$0x2]  }
  0x51   :  { %v1400_v24 = vld [vmem:[%s2522_s0 + $0x9f] sm:$0x20]   ;;  %v1406_v34 = vld [vmem:[%s2522_s0 + $0x60] sm:$0x8]   ;;  %v996_v36 = vsel %vm17_vm3, %v1399_v23, %v992_v31  ;;  %974 = vrot.lane.b32.xlu0 %v973_v35, %s1491_s28  ;;  %v1023_v41 = vsel %vm9_vm1, %v1405_v33, %v1019_v37  ;;  %v1054_v47 = vsel %vm5_vm0, %v1412_v44, %v1411_v43  ;;  %v1413_v48 = vld [vmem:[%s2522_s0 + $0x40] sm:$0x4]  }
  0x52   :  { %v1401_v27 = vld [vmem:[%s2522_s0 + $0xbe] sm:$0x40]   ;;  %v1407_v38 = vld [vmem:[%s2522_s0 + $0x7f] sm:$0x10]   ;;  %v1000_v40 = vsel %vm21_vm4, %v1400_v24, %v996_v36  ;;  %v1027_v46 = vsel %vm13_vm2, %v1406_v34, %v1023_v41  ;;  %v1414_v49 = vld [vmem:[%s2522_s0 + $0x5f] sm:$0x8]   ;;  %v1058_v54 = vsel %vm9_vm1, %v1413_v48, %v1054_v47 }
  0x53   :  { %v1402_v28 = vld [vmem:[%s2522_s0 + $0xdd] sm:$0x80]   ;;  %v1408_v39 = vld [vmem:[%s2522_s0 + $0x9e] sm:$0x20]   ;;  %v1004_v45 = vsel %vm25_vm5, %v1401_v27, %v1000_v40  ;;  %v1415_v50 = vld [vmem:[%s2522_s0 + $0x7e] sm:$0x10]   ;;  %v1031_v52 = vsel %vm17_vm3, %v1407_v38, %v1027_v46  ;;  %v1062_v58 = vsel %vm13_vm2, %v1414_v49, %v1058_v54 }
  0x54   :  { %v1409_v42 = vld [vmem:[%s2522_s0 + $0xbd] sm:$0x40]   ;;  %v1008_v51 = vsel %vm29_vm6, %v1402_v28, %v1004_v45  ;;  %v1416_v55 = vld [vmem:[%s2522_s0 + $0x9d] sm:$0x20]   ;;  %s1492_s18 = smov 16   ;;  %v1035_v57 = vsel %vm21_vm4, %v1408_v39, %v1031_v52  ;;  %v1066_v63 = vsel %vm17_vm3, %v1415_v50, %v1062_v58  ;;  %s1493_s4 = smov 12  }
  0x55   :  { %v1410_v53 = vld [vmem:[%s2522_s0 + $0xdc] sm:$0x80]   ;;  %v1417_v56 = vld [vmem:[%s2522_s0 + $0xbc] sm:$0x40]   ;;  %1009 = vrot.lane.b32.xlu1 %v1008_v51, %s1492_s18  ;;  %v1419_v60 = vld [vmem:[%s2522_s0 + $0x1] sm:$0x1]   ;;  %v1039_v62 = vsel %vm25_vm5, %v1409_v42, %v1035_v57  ;;  %v1070_v5 = vsel %vm21_vm4, %v1416_v55, %v1066_v63 }
  0x56   :  { %v1418_v59 = vld [vmem:[%s2522_s0 + $0xdb] sm:$0x80]   ;;  %v1420_v61 = vld [vmem:[%s2522_s0 + $0x20] sm:$0x2]   ;;  %v1043_v4 = vsel %vm29_vm6, %v1410_v53, %v1039_v62  ;;  %v1074_v8 = vsel %vm25_vm5, %v1417_v56, %v1070_v5  ;;  %v1173_v14 = vld [vmem:[%s2522_s0 + $0x3e] sm:$0x4]  }
  0x57   :  { %v1089_v0 = vsel %vm5_vm0, %v1420_v61, %v1419_v60  ;;  %v1421_v1 = vld [vmem:[%s2522_s0 + $0x3f] sm:$0x4]   ;;  %1044 = vrot.lane.b32.xlu0 %v1043_v4, %s1493_s4  ;;  %v1078_v11 = vsel %vm29_vm6, %v1418_v59, %v1074_v8  ;;  %s1494_s11 = smov 8   ;;  %v1174_v16 = vld [vmem:[%s2522_s0 + $0x5d] sm:$0x8]   ;;  %s1495_s22 = smov 4  }
  0x58   :  { %v1422_v2 = vld [vmem:[%s2522_s0 + $0x5e] sm:$0x8]   ;;  %v1093_v6 = vsel %vm9_vm1, %v1421_v1, %v1089_v0  ;;  %v2_v17 = vld [vmem:[%s2522_s0] sm:$0x1]   ;;  %vm31_vm7 = vcmask 31744   ;;  %vm66_vm8 = vcmask 1048544  }
  0x59   :  { %v1423_v3 = vld [vmem:[%s2522_s0 + $0x7d] sm:$0x10]   ;;  %v1097_v9 = vsel %vm13_vm2, %v1422_v2, %v1093_v6  ;;  %1079 = vrot.lane.b32.xlu1 %v1078_v11, %s1494_s11  ;;  %v1172_v18 = vld [vmem:[%s2522_s0 + $0x1f] sm:$0x2]   ;;  %vm101_vm9 = vcmask 1015744   ;;  %vm136_vm10 = vcmask 982944  }
  0x5a   :  { %v1424_v7 = vld [vmem:[%s2522_s0 + $0x9c] sm:$0x20]   ;;  %v1101_v12 = vsel %vm17_vm3, %v1423_v3, %v1097_v9  ;;  %v1175_v20 = vld [vmem:[%s2522_s0 + $0x7c] sm:$0x10]   ;;  %v6_v21 = vsel %vm5_vm0, %v1172_v18, %v2_v17  ;;  %vm171_vm11 = vcmask 950144   ;;  %vm206_vm12 = vcmask 917344  }
  0x5b   :  { %v1425_v10 = vld [vmem:[%s2522_s0 + $0xbb] sm:$0x40]   ;;  %v1105_v15 = vsel %vm21_vm4, %v1424_v7, %v1101_v12  ;;  %v1176_v23 = vld [vmem:[%s2522_s0 + $0x9b] sm:$0x20]   ;;  %v10_v24 = vsel %vm9_vm1, %v1173_v14, %v6_v21  ;;  %vm241_vm13 = vcmask 884544   ;;  %vm276_vm14 = vcmask 851744  }
  0x5c   :  { %v1426_v13 = vld [vmem:[%s2522_s0 + $0xda] sm:$0x80]   ;;  %v1109_v19 = vsel %vm25_vm5, %v1425_v10, %v1105_v15  ;;  %v1177_v25 = vld [vmem:[%s2522_s0 + $0xba] sm:$0x40]   ;;  %v14_v26 = vsel %vm13_vm2, %v1174_v16, %v10_v24  ;;  %vm311_vm15 = vcmask 818944   ;;  %vm346_vm0 = vcmask 786144  }
  0x5d   :  { %v1113_v22 = vsel %vm29_vm6, %v1426_v13, %v1109_v19  ;;  %v1178_v27 = vld [vmem:[%s2522_s0 + $0xd9] sm:$0x80]   ;;  %v18_v28 = vsel %vm17_vm3, %v1175_v20, %v14_v26  ;;  %vm381_vm1 = vcmask 753344   ;;  %vm416_vm2 = vcmask 720544  }
  0x5e   :  { %1114 = vrot.lane.b32.xlu0 %v1113_v22, %s1495_s22  ;;  %v22_v29 = vsel %vm21_vm4, %v1176_v23, %v18_v28  ;;  %vm451_vm3 = vcmask 687744   ;;  %vm486_vm4 = vcmask 654944  }
  0x5f   :  { %v26_v30 = vsel %vm25_vm5, %v1177_v25, %v22_v29  ;;  %vm521_vm5 = vcmask 622144  }
  0x60   :  { %v30_v31 = vsel %vm29_vm6, %v1178_v27, %v26_v30  ;;  %vm556_vm6 = vcmask 589344  }
  0x61   :  { %32 = vst.msk [vmem:[#allocation0] ss:$8 sm:$0xf] %vm31_vm7, %v30_v31   ;;  %33 = vst.msk [vmem:[#allocation0] ss:$8 sm:$0xf0] %vm31_vm7, %v30_v31  }
  0x62   :  { %vm591_vm7 = vcmask 556544  }
  0x7c   :  { %v65_v32 = vpop.permute.xlu0 %64  }
  0x7d   :  { %67 = vst.msk [vmem:[#allocation0] ss:$8 sm:$0xf] %vm66_vm8, %v65_v32   ;;  %68 = vst.msk [vmem:[#allocation0] ss:$8 sm:$0xf0] %vm66_vm8, %v65_v32   ;;  %v135_v33 = vpop.permute.xlu1 %134  }
  0x7e   :  { %vm626_vm8 = vcmask 523744  }
  0x80   :  { %v100_v34 = vpop.permute.xlu0 %99  }
  0x81   :  { %102 = vst.msk [vmem:[#allocation0] ss:$8 sm:$0xf] %vm101_vm9, %v100_v34   ;;  %103 = vst.msk [vmem:[#allocation0] ss:$8 sm:$0xf0] %vm101_vm9, %v100_v34  }
  0x82   :  { %137 = vst.msk [vmem:[#allocation0] ss:$8 sm:$0xf] %vm136_vm10, %v135_v33   ;;  %138 = vst.msk [vmem:[#allocation0] ss:$8 sm:$0xf0] %vm136_vm10, %v135_v33  }
  0x83   :  { %vm661_vm9 = vcmask 490944   ;;  %vm696_vm10 = vcmask 458144  }
  0x84   :  { %v170_v35 = vpop.permute.xlu1 %169  }
  0x85   :  { %172 = vst.msk [vmem:[#allocation0] ss:$8 sm:$0xf] %vm171_vm11, %v170_v35   ;;  %173 = vst.msk [vmem:[#allocation0] ss:$8 sm:$0xf0] %vm171_vm11, %v170_v35   ;;  %v205_v36 = vpop.permute.xlu0 %204  }
  0x86   :  { %207 = vst.msk [vmem:[#allocation0] ss:$8 sm:$0xf] %vm206_vm12, %v205_v36   ;;  %208 = vst.msk [vmem:[#allocation0] ss:$8 sm:$0xf0] %vm206_vm12, %v205_v36  }
  0x87   :  { %vm731_vm11 = vcmask 425344   ;;  %vm766_vm12 = vcmask 392544  }
  0x88   :  { %v240_v37 = vpop.permute.xlu1 %239  }
  0x89   :  { %242 = vst.msk [vmem:[#allocation0] ss:$8 sm:$0xf] %vm241_vm13, %v240_v37   ;;  %243 = vst.msk [vmem:[#allocation0] ss:$8 sm:$0xf0] %vm241_vm13, %v240_v37  }
  0x8a   :  { %vm801_vm13 = vcmask 359744  }
  0x8d   :  { %v275_v38 = vpop.permute.xlu0 %274   ;;  %v310_v39 = vpop.permute.xlu1 %309  }
  0x8e   :  { %277 = vst.msk [vmem:[#allocation0] ss:$8 sm:$0xf] %vm276_vm14, %v275_v38   ;;  %278 = vst.msk [vmem:[#allocation0] ss:$8 sm:$0xf0] %vm276_vm14, %v275_v38  }
  0x8f   :  { %312 = vst.msk [vmem:[#allocation0] ss:$8 sm:$0xf] %vm311_vm15, %v310_v39   ;;  %313 = vst.msk [vmem:[#allocation0] ss:$8 sm:$0xf0] %vm311_vm15, %v310_v39  }
  0x90   :  { %vm836_vm14 = vcmask 326944   ;;  %vm871_vm15 = vcmask 294144  }
  0x91   :  { %v345_v40 = vpop.permute.xlu0 %344  }
  0x92   :  { %347 = vst.msk [vmem:[#allocation0] ss:$8 sm:$0xf] %vm346_vm0, %v345_v40   ;;  %348 = vst.msk [vmem:[#allocation0] ss:$8 sm:$0xf0] %vm346_vm0, %v345_v40  }
  0x93   :  { %vm906_vm0 = vcmask 261344  }
  0x95   :  { %v380_v41 = vpop.permute.xlu1 %379  }
  0x96   :  { %382 = vst.msk [vmem:[#allocation0] ss:$8 sm:$0xf] %vm381_vm1, %v380_v41   ;;  %383 = vst.msk [vmem:[#allocation0] ss:$8 sm:$0xf0] %vm381_vm1, %v380_v41   ;;  %v415_v42 = vpop.permute.xlu0 %414  }
  0x97   :  { %417 = vst.msk [vmem:[#allocation0] ss:$8 sm:$0xf] %vm416_vm2, %v415_v42   ;;  %418 = vst.msk [vmem:[#allocation0] ss:$8 sm:$0xf0] %vm416_vm2, %v415_v42  }
  0x98   :  { %vm941_vm1 = vcmask 228544   ;;  %vm976_vm2 = vcmask 195744  }
  0x99   :  { %v450_v43 = vpop.permute.xlu1 %449  }
  0x9a   :  { %452 = vst.msk [vmem:[#allocation0] ss:$8 sm:$0xf] %vm451_vm3, %v450_v43   ;;  %453 = vst.msk [vmem:[#allocation0] ss:$8 sm:$0xf0] %vm451_vm3, %v450_v43  }
  0x9b   :  { %vm1011_vm3 = vcmask 162944  }
  0x9d   :  { %v485_v44 = vpop.permute.xlu0 %484  }
  0x9e   :  { %487 = vst.msk [vmem:[#allocation0] ss:$8 sm:$0xf] %vm486_vm4, %v485_v44   ;;  %488 = vst.msk [vmem:[#allocation0] ss:$8 sm:$0xf0] %vm486_vm4, %v485_v44   ;;  %v520_v45 = vpop.permute.xlu1 %519  }
  0x9f   :  { %522 = vst.msk [vmem:[#allocation0] ss:$8 sm:$0xf] %vm521_vm5, %v520_v45   ;;  %523 = vst.msk [vmem:[#allocation0] ss:$8 sm:$0xf0] %vm521_vm5, %v520_v45  }
  0xa0   :  { %vm1046_vm4 = vcmask 130144   ;;  %vm1081_vm5 = vcmask 97344  }
  0xa1   :  { %v555_v46 = vpop.permute.xlu0 %554  }
  0xa2   :  { %557 = vst.msk [vmem:[#allocation0] ss:$8 sm:$0xf] %vm556_vm6, %v555_v46   ;;  %558 = vst.msk [vmem:[#allocation0] ss:$8 sm:$0xf0] %vm556_vm6, %v555_v46  }
  0xa3   :  { %vm1116_vm6 = vcmask 64544  }
  0xa5   :  { %v590_v47 = vpop.permute.xlu1 %589  }
  0xa6   :  { %592 = vst.msk [vmem:[#allocation0] ss:$8 sm:$0xf] %vm591_vm7, %v590_v47   ;;  %593 = vst.msk [vmem:[#allocation0] ss:$8 sm:$0xf0] %vm591_vm7, %v590_v47  }
  0xa7   :  { %v625_v48 = vpop.permute.xlu0 %624  }
  0xa8   :  { %627 = vst.msk [vmem:[#allocation0] ss:$8 sm:$0xf] %vm626_vm8, %v625_v48   ;;  %628 = vst.msk [vmem:[#allocation0] ss:$8 sm:$0xf0] %vm626_vm8, %v625_v48  }
  0xa9   :  { %v660_v49 = vpop.permute.xlu1 %659  }
  0xaa   :  { %662 = vst.msk [vmem:[#allocation0] ss:$8 sm:$0xf] %vm661_vm9, %v660_v49   ;;  %663 = vst.msk [vmem:[#allocation0] ss:$8 sm:$0xf0] %vm661_vm9, %v660_v49  }
  0xae   :  { %v695_v50 = vpop.permute.xlu0 %694  }
  0xaf   :  { %697 = vst.msk [vmem:[#allocation0] ss:$8 sm:$0xf] %vm696_vm10, %v695_v50   ;;  %698 = vst.msk [vmem:[#allocation0] ss:$8 sm:$0xf0] %vm696_vm10, %v695_v50   ;;  %v730_v51 = vpop.permute.xlu1 %729  }
  0xb0   :  { %732 = vst.msk [vmem:[#allocation0] ss:$8 sm:$0xf] %vm731_vm11, %v730_v51   ;;  %733 = vst.msk [vmem:[#allocation0] ss:$8 sm:$0xf0] %vm731_vm11, %v730_v51  }
  0xb2   :  { %v765_v52 = vpop.permute.xlu0 %764  }
  0xb3   :  { %767 = vst.msk [vmem:[#allocation0] ss:$8 sm:$0xf] %vm766_vm12, %v765_v52   ;;  %768 = vst.msk [vmem:[#allocation0] ss:$8 sm:$0xf0] %vm766_vm12, %v765_v52  }
  0xb6   :  { %v800_v53 = vpop.permute.xlu1 %799  }
  0xb7   :  { %802 = vst.msk [vmem:[#allocation0] ss:$8 sm:$0xf] %vm801_vm13, %v800_v53   ;;  %803 = vst.msk [vmem:[#allocation0] ss:$8 sm:$0xf0] %vm801_vm13, %v800_v53  }
  0xb8   :  { %v835_v54 = vpop.permute.xlu0 %834  }
  0xb9   :  { %837 = vst.msk [vmem:[#allocation0] ss:$8 sm:$0xf] %vm836_vm14, %v835_v54   ;;  %838 = vst.msk [vmem:[#allocation0] ss:$8 sm:$0xf0] %vm836_vm14, %v835_v54  }
  0xba   :  { %v870_v55 = vpop.permute.xlu1 %869  }
  0xbb   :  { %872 = vst.msk [vmem:[#allocation0] ss:$8 sm:$0xf] %vm871_vm15, %v870_v55   ;;  %873 = vst.msk [vmem:[#allocation0] ss:$8 sm:$0xf0] %vm871_vm15, %v870_v55  }
  0xbf   :  { %v905_v56 = vpop.permute.xlu0 %904  }
  0xc0   :  { %907 = vst.msk [vmem:[#allocation0] ss:$8 sm:$0xf] %vm906_vm0, %v905_v56   ;;  %908 = vst.msk [vmem:[#allocation0] ss:$8 sm:$0xf0] %vm906_vm0, %v905_v56   ;;  %v940_v57 = vpop.permute.xlu1 %939  }
  0xc1   :  { %942 = vst.msk [vmem:[#allocation0] ss:$8 sm:$0xf] %vm941_vm1, %v940_v57   ;;  %943 = vst.msk [vmem:[#allocation0] ss:$8 sm:$0xf0] %vm941_vm1, %v940_v57  }
  0xc3   :  { %v975_v58 = vpop.permute.xlu0 %974  }
  0xc4   :  { %977 = vst.msk [vmem:[#allocation0] ss:$8 sm:$0xf] %vm976_vm2, %v975_v58   ;;  %978 = vst.msk [vmem:[#allocation0] ss:$8 sm:$0xf0] %vm976_vm2, %v975_v58  }
  0xc7   :  { %v1010_v59 = vpop.permute.xlu1 %1009  }
  0xc8   :  { %1012 = vst.msk [vmem:[#allocation0] ss:$8 sm:$0xf] %vm1011_vm3, %v1010_v59   ;;  %1013 = vst.msk [vmem:[#allocation0] ss:$8 sm:$0xf0] %vm1011_vm3, %v1010_v59  }
  0xc9   :  { %v1045_v60 = vpop.permute.xlu0 %1044  }
  0xca   :  { %1047 = vst.msk [vmem:[#allocation0] ss:$8 sm:$0xf] %vm1046_vm4, %v1045_v60   ;;  %1048 = vst.msk [vmem:[#allocation0] ss:$8 sm:$0xf0] %vm1046_vm4, %v1045_v60  }
  0xcb   :  { %v1080_v61 = vpop.permute.xlu1 %1079  }
  0xcc   :  { %1082 = vst.msk [vmem:[#allocation0] ss:$8 sm:$0xf] %vm1081_vm5, %v1080_v61   ;;  %1083 = vst.msk [vmem:[#allocation0] ss:$8 sm:$0xf0] %vm1081_vm5, %v1080_v61  }
  0xd0   :  { %v1115_v62 = vpop.permute.xlu0 %1114  }
  0xd1   :  { %1117 = vst.msk [vmem:[#allocation0] ss:$8 sm:$0xf] %vm1116_vm6, %v1115_v62   ;;  %1118 = vst.msk [vmem:[#allocation0] ss:$8 sm:$0xf0] %vm1116_vm6, %v1115_v62  }
  0xd8   :  { %v1122_v63 = vld [vmem:[#allocation0] sm:$0x1]  ;;  %v1126_v0 = vld [vmem:[#allocation0 + $0x8] sm:$0x1]  ;;  %v1131_v1 = vld [vmem:[#allocation0 + $0x10] sm:$0x1] }
  0xd9   :  { %1124 = vst [vmem:[%s2523_s1] sm:$0x1] %v1122_v63  ;;  %1427 = vst [vmem:[%s2523_s1 + $0x1] sm:$0x1] %v1126_v0  ;;  %v1137_v2 = vld [vmem:[#allocation0 + $0x18] sm:$0x1] }
  0xda   :  { %1428 = vst [vmem:[%s2523_s1 + $0x2] sm:$0x1] %v1131_v1  ;;  %v1143_v3 = vld [vmem:[#allocation0 + $0x20] sm:$0x1]  ;;  %v1149_v4 = vld [vmem:[#allocation0 + $0x28] sm:$0x1] }
  0xdb   :  { %1429 = vst [vmem:[%s2523_s1 + $0x3] sm:$0x1] %v1137_v2  ;;  %1430 = vst [vmem:[%s2523_s1 + $0x4] sm:$0x1] %v1143_v3  ;;  %v1155_v5 = vld [vmem:[#allocation0 + $0x30] sm:$0x1] }
  0xdc   :  { %1431 = vst [vmem:[%s2523_s1 + $0x5] sm:$0x1] %v1149_v4  ;;  %v1161_v6 = vld [vmem:[#allocation0 + $0x38] sm:$0x1]  ;;  %1432 = vst [vmem:[%s2523_s1 + $0x6] sm:$0x1] %v1155_v5 }
  0xdd   :  { %1433 = vst [vmem:[%s2523_s1 + $0x7] sm:$0x1] %v1161_v6 }

// kernel: up_forward.4
= control target key start
LH: loop header
LB: loop body
LE: loop exit
PB: predicated region body
PF: predicated region fallthrough
CT: control target
= control target key end

     0   :  { %s3744_s21 = smov 0   ;;  %s4691_s0 = inlined_call_operand.vmem [shape: f32[2,8,16,128], index: 0, kind: input, shape index: {}]   ;;  %s4692_s1 = inlined_call_operand.vmem [shape: f32[1,128], index: 1, kind: input, shape index: {}]   ;;  %s4693_s2 = inlined_call_operand.vmem [shape: f32[1,128], index: 2, kind: input, shape index: {}]   ;;  %s4694_s3 = inlined_call_operand.vmem [shape: f32[3,3,128,64], index: 3, kind: input, shape index: {}]   ;;  %s4695_s4 = inlined_call_operand.vmem [shape: f32[1,64], index: 4, kind: input, shape index: {}]   ;;  %s4696_s5 = inlined_call_operand.vmem [shape: f32[2,8,16,64], index: 5, kind: output, shape index: {0}]   ;;  %s4697_s6 = inlined_call_operand.vmem [shape: f32[2,2,64], index: 6, kind: output, shape index: {1}]  }
   0x1 LB: > { %s2321_s22 = sadd.s32 4294967295, %s3706_s21   ;;  %p2325_p0 = scmp.ge.s32.totalorder %s3706_s21, 1  ;;  %s3706_s21 = sphi %s3744_s21, %s17_s21  }
   0x2   : > { %p215_p1 = scmp.lt.s32.totalorder %s3706_s21, 3 }
   0x4   : > { %p216_p2 = pnand %p2325_p0, %p215_p1 }
   0x5   : > { %v2333_v0 = vld [vmem:[%s4694_s3 + $0x80] sm:$0xff] (!%p216_p2)  ;;  %v2334_v1 = vld [vmem:[%s4694_s3 + $0x88] sm:$0xff] (!%p216_p2)  ;;  %p3763_p3 = scmp.lt.s32.totalorder (!%p216_p2), %s2321_s22, 1  ;;  %v2335_v5 = vld [vmem:[%s4694_s3 + $0x90] sm:$0xff] (!%p216_p2)  ;;  %v3708_v7 = vmov (!%p216_p2), 0.0   ;;  %vm2125_vm0 = vcmask (!%p216_p2), 523264  }
   0x6   : > { %219 = sbr.rel (%p216_p2) target bundleno = 434 (0x1b2), region = 40  ;;  %v2381_v2 = vld [vmem:[%s4694_s3 + $0x200] sm:$0xff] (!%p216_p2)  ;;  %v3258_v3 = vpack.c.bf16 (!%p216_p2), %v2334_v1, %v2333_v0  ;;  %v2382_v4 = vld [vmem:[%s4694_s3 + $0x208] sm:$0xff] (!%p216_p2)  ;;  %v2336_v6 = vld [vmem:[%s4694_s3 + $0x98] sm:$0xff] (!%p216_p2)  ;;  %263 = vst [vmem:[#allocation2] sm:$0xff] (!%p216_p2), %v3708_v7  ;;  %vm2179_vm1 = vcmask (!%p216_p2), 516096  }
   0x7   : > { %264 = vst [vmem:[#allocation2 + $0x8] sm:$0xff] (!%p216_p2), %v3708_v7  ;;  %265 = vst [vmem:[#allocation2 + $0x10] sm:$0x3] (!%p216_p2), %v3708_v7  ;;  %v3386_v8 = vpack.c.bf16 (!%p216_p2), %v2382_v4, %v2381_v2  ;;  %v3262_v9 = vpack.c.bf16 (!%p216_p2), %v2336_v6, %v2335_v5  ;;  %v2383_v10 = vld [vmem:[%s4694_s3 + $0x210] sm:$0xff] (!%p216_p2)  ;;  %v2384_v11 = vld [vmem:[%s4694_s3 + $0x218] sm:$0xff] (!%p216_p2) }
   0x8   : > { %266 = vst [vmem:[#allocation2 + $0x18] sm:$0xff] (!%p216_p2), %v3708_v7  ;;  %267 = vst [vmem:[#allocation2 + $0x20] sm:$0xff] (!%p216_p2), %v3708_v7  ;;  %v2337_v12 = vld [vmem:[%s4694_s3 + $0xa0] sm:$0xff] (!%p216_p2)  ;;  %3259 = vmatprep.subr.bf16.mxu1 (!%p216_p2), %v3258_v3  ;;  %v3390_v13 = vpack.c.bf16 (!%p216_p2), %v2384_v11, %v2383_v10  ;;  %v2338_v14 = vld [vmem:[%s4694_s3 + $0xa8] sm:$0xff] (!%p216_p2) }
   0x9   : > { %268 = vst [vmem:[#allocation2 + $0x28] sm:$0x3] (!%p216_p2), %v3708_v7  ;;  %269 = vst [vmem:[#allocation2 + $0x30] sm:$0xff] (!%p216_p2), %v3708_v7  ;;  %v2385_v15 = vld [vmem:[%s4694_s3 + $0x220] sm:$0xff] (!%p216_p2)  ;;  %v2386_v16 = vld [vmem:[%s4694_s3 + $0x228] sm:$0xff] (!%p216_p2)  ;;  %3387 = vmatprep.subr.bf16.mxu0 (!%p216_p2), %v3386_v8  ;;  %3261 = vmatpush3.bf16.msra.mxu1 (!%p216_p2), %v3258_v3  ;;  %v3266_v17 = vpack.c.bf16 (!%p216_p2), %v2338_v14, %v2337_v12 }
   0xa   : > { %270 = vst [vmem:[#allocation2 + $0x38] sm:$0xff] (!%p216_p2), %v3708_v7  ;;  %271 = vst [vmem:[#allocation2 + $0x40] sm:$0x3] (!%p216_p2), %v3708_v7  ;;  %3389 = vmatpush3.bf16.msra.mxu0 (!%p216_p2), %v3386_v8  ;;  %3263 = vmatprep.subr.bf16.mxu1 (!%p216_p2), %v3262_v9  ;;  %v3394_v18 = vpack.c.bf16 (!%p216_p2), %v2386_v16, %v2385_v15  ;;  %v2339_v19 = vld [vmem:[%s4694_s3 + $0xb0] sm:$0xff] (!%p216_p2)  ;;  %v2340_v20 = vld [vmem:[%s4694_s3 + $0xb8] sm:$0xff] (!%p216_p2) }
   0xb   : > { %272 = vst [vmem:[#allocation2 + $0x48] sm:$0xff] (!%p216_p2), %v3708_v7  ;;  %273 = vst [vmem:[#allocation2 + $0x50] sm:$0xff] (!%p216_p2), %v3708_v7  ;;  %3391 = vmatprep.subr.bf16.mxu0 (!%p216_p2), %v3390_v13  ;;  %v2387_v21 = vld [vmem:[%s4694_s3 + $0x230] sm:$0xff] (!%p216_p2)  ;;  %v2388_v22 = vld [vmem:[%s4694_s3 + $0x238] sm:$0xff] (!%p216_p2)  ;;  %v3270_v23 = vpack.c.bf16 (!%p216_p2), %v2340_v20, %v2339_v19 }
   0xc   : > { %274 = vst [vmem:[#allocation2 + $0x58] sm:$0x3] (!%p216_p2), %v3708_v7  ;;  %275 = vst [vmem:[#allocation2 + $0x60] sm:$0xff] (!%p216_p2), %v3708_v7  ;;  %v2341_v24 = vld [vmem:[%s4694_s3 + $0xc0] sm:$0xff] (!%p216_p2)  ;;  %v2342_v25 = vld [vmem:[%s4694_s3 + $0xc8] sm:$0xff] (!%p216_p2)  ;;  %v3398_v26 = vpack.c.bf16 (!%p216_p2), %v2388_v22, %v2387_v21 }
   0xd   : > { %276 = vst [vmem:[#allocation2 + $0x68] sm:$0xff] %v3708_v7  ;;  %277 = vst [vmem:[#allocation2 + $0x70] sm:$0x3] %v3708_v7  ;;  %s4700_s22 = smov (!%p3763_p3, %s2321_s22), 1  ;;  %3265 = vmatpush3.bf16.msra.mxu1 %v3262_v9  ;;  %v2389_v27 = vld [vmem:[%s4694_s3 + $0x240] sm:$0xff]  ;;  %v2390_v28 = vld [vmem:[%s4694_s3 + $0x248] sm:$0xff]  ;;  %v3274_v34 = vpack.c.bf16 %v2342_v25, %v2341_v24 }
   0xe   : > { %278 = vst [vmem:[#allocation2 + $0x78] sm:$0xff] %v3708_v7  ;;  %279 = vst [vmem:[#allocation2 + $0x80] sm:$0xff] %v3708_v7  ;;  %s2464_s26 = sshll.u32 %s4700_s22, 7  ;;  %3393 = vmatpush3.bf16.msra.mxu0 %v3390_v13  ;;  %3267 = vmatprep.subr.bf16.mxu1 %v3266_v17  ;;  %v420_v29 = vld [vmem:[#allocation2 + $0x1] sm:$0xff]  ;;  %v3866_v31 = vld [vmem:[%s4692_s1] ss:$0 sm:$0xff]  ;;  %v3402_v36 = vpack.c.bf16 %v2390_v28, %v2389_v27 }
   0xf   : > { %280 = vst [vmem:[#allocation2 + $0x88] sm:$0x3] %v3708_v7  ;;  %281 = vst [vmem:[#allocation2 + $0x90] sm:$0xff] %v3708_v7  ;;  %s3848_s13 = scalar_lea.vmem %s4691_s0, %s2464_s26  ;;  %3395 = vmatprep.subr.bf16.mxu0 %v3394_v18  ;;  %2786 = vmatprep.mubr.f32.mxu1 %v420_v29  ;;  %v3871_v32 = vld [vmem:[%s4693_s2] ss:$0 sm:$0xff]  ;;  %v2343_v37 = vld [vmem:[%s4694_s3 + $0xd0] sm:$0xff]  ;;  %s4564_s30 = scalar_lea.vmem %s4696_s5, %s2464_s26 }
  0x10   : > { %282 = vst [vmem:[#allocation2 + $0x98] sm:$0xff] %v3708_v7  ;;  %283 = vst [vmem:[#allocation2 + $0xa0] sm:$0x3] %v3708_v7  ;;  %v293_v30 = vld [vmem:[%s3848_s13] sm:$0xff]  ;;  %v294_v35 = vld [vmem:[%s3848_s13 + $0x8] sm:$0xff]  ;;  %s2330_s26 = sshll.u32 %s4700_s22, 1 }
  0x11   : > { %284 = vst [vmem:[#allocation2 + $0xa8] sm:$0xff] %v3708_v7  ;;  %285 = vst [vmem:[#allocation2 + $0xb0] sm:$0xff] %v3708_v7  ;;  %3269 = vmatpush3.bf16.msra.mxu1 %v3266_v17  ;;  %v316_v33 = vmul.f32 %v3866_v31, %v293_v30  ;;  %v2344_v38 = vld [vmem:[%s4694_s3 + $0xd8] sm:$0xff]  ;;  %v317_v40 = vmul.f32 %v3866_v31, %v294_v35  ;;  %v295_v41 = vld [vmem:[%s3848_s13 + $0x10] sm:$0xff]  ;;  %s262_s9 = scalar_lea.vmem %s4697_s6, %s2330_s26 }
  0x12   : > { %286 = vst [vmem:[#allocation2 + $0xb8] sm:$0x3] %v3708_v7  ;;  %287 = vst [vmem:[#allocation2 + $0xc0] sm:$0xff] %v3708_v7  ;;  %3397 = vmatpush3.bf16.msra.mxu0 %v3394_v18  ;;  %3271 = vmatprep.subr.bf16.mxu1 %v3270_v23  ;;  %v2391_v42 = vld [vmem:[%s4694_s3 + $0x250] sm:$0xff]  ;;  %v2392_v43 = vld [vmem:[%s4694_s3 + $0x258] sm:$0xff]  ;;  %v318_v44 = vmul.f32 %v3866_v31, %v295_v41  ;;  %v3278_v50 = vpack.c.bf16 %v2344_v38, %v2343_v37 }
  0x13   : > { %288 = vst [vmem:[#allocation2 + $0xc8] sm:$0xff] %v3708_v7  ;;  %289 = vst [vmem:[#allocation2 + $0xd0] sm:$0x3] %v3708_v7  ;;  %3399 = vmatprep.subr.bf16.mxu0 %v3398_v26  ;;  %v339_v39 = vadd.f32 %v3871_v32, %v316_v33  ;;  %v296_v45 = vld [vmem:[%s3848_s13 + $0x18] sm:$0xff]  ;;  %v340_v47 = vadd.f32 %v3871_v32, %v317_v40  ;;  %v297_v49 = vld [vmem:[%s3848_s13 + $0x20] sm:$0xff]  ;;  %v3406_v54 = vpack.c.bf16 %v2392_v43, %v2391_v42 }
  0x14   : > { %290 = vst [vmem:[#allocation2 + $0xd8] sm:$0xff] %v3708_v7  ;;  %291 = vst [vmem:[#allocation2 + $0xe0] sm:$0xff] %v3708_v7  ;;  %v319_v48 = vmul.f32 %v3866_v31, %v296_v45  ;;  %v341_v51 = vadd.f32 %v3871_v32, %v318_v44  ;;  %v320_v52 = vmul.f32 %v3866_v31, %v297_v49  ;;  %v298_v53 = vld [vmem:[%s3848_s13 + $0x28] sm:$0xff]  ;;  %v2345_v55 = vld [vmem:[%s4694_s3 + $0xe0] sm:$0xff] }
  0x15   : > { %292 = vst [vmem:[#allocation2 + $0xe8] sm:$0x3] %v3708_v7  ;;  %3273 = vmatpush3.bf16.msra.mxu1 %v3270_v23  ;;  %v3892_v46 = vmax.f32 %v339_v39, 0.0  ;;  %v2346_v56 = vld [vmem:[%s4694_s3 + $0xe8] sm:$0xff]  ;;  %v3908_v57 = vmax.f32 %v340_v47, 0.0  ;;  %v321_v59 = vmul.f32 %v3866_v31, %v298_v53  ;;  %v299_v60 = vld [vmem:[%s3848_s13 + $0x30] sm:$0xff] }
  0x16   : > { %3401 = vmatpush3.bf16.msra.mxu0 %v3398_v26  ;;  %3275 = vmatprep.subr.bf16.mxu1 %v3274_v34  ;;  %v342_v58 = vadd.f32 %v3871_v32, %v319_v48  ;;  %v2393_v61 = vld [vmem:[%s4694_s3 + $0x260] sm:$0xff]  ;;  %v2394_v62 = vld [vmem:[%s4694_s3 + $0x268] sm:$0xff]  ;;  %v3919_v63 = vmax.f32 %v341_v51, 0.0  ;;  %v343_v0 = vadd.f32 %v3871_v32, %v320_v52  ;;  %v322_v1 = vmul.f32 %v3866_v31, %v299_v60  ;;  %v300_v2 = vld [vmem:[%s3848_s13 + $0x38] sm:$0xff] }
  0x17   : > { %3403 = vmatprep.subr.bf16.mxu0 %v3402_v36  ;;  %372 = vst [vmem:[#allocation2 + $0x19] sm:$0xff] %v3892_v46  ;;  %3010 = vmatprep.mubr.f32.mxu0 %v3892_v46  ;;  %373 = vst [vmem:[#allocation2 + $0x21] sm:$0xff] %v3908_v57  ;;  %v344_v4 = vadd.f32 %v3871_v32, %v321_v59  ;;  %v323_v5 = vmul.f32 %v3866_v31, %v300_v2  ;;  %v301_v6 = vld [vmem:[%s3848_s13 + $0x40] sm:$0xff]  ;;  %v302_v12 = vld [vmem:[%s3848_s13 + $0x48] sm:$0xff] }
  0x18   : > { %v3925_v3 = vmax.f32 %v342_v58, 0.0  ;;  %v3282_v8 = vpack.c.bf16 %v2346_v56, %v2345_v55  ;;  %374 = vst [vmem:[#allocation2 + $0x31] sm:$0xff] %v3919_v63  ;;  %v3931_v9 = vmax.f32 %v343_v0, 0.0  ;;  %v345_v10 = vadd.f32 %v3871_v32, %v322_v1  ;;  %v2347_v14 = vld [vmem:[%s4694_s3 + $0xf0] sm:$0xff]  ;;  %v2348_v15 = vld [vmem:[%s4694_s3 + $0xf8] sm:$0xff]  ;;  %v305_v29 = vld [vmem:[%s3848_s13 + $0x60] sm:$0xff] }
  0x19   : > { %3277 = vmatpush3.bf16.msra.mxu1 %v3274_v34  ;;  %v324_v11 = vmul.f32 %v3866_v31, %v301_v6  ;;  %v3410_v13 = vpack.c.bf16 %v2394_v62, %v2393_v61  ;;  %v3943_v16 = vmax.f32 %v344_v4, 0.0  ;;  %v346_v17 = vadd.f32 %v3871_v32, %v323_v5  ;;  %v303_v19 = vld [vmem:[%s3848_s13 + $0x50] sm:$0xff]  ;;  %v2396_v21 = vld [vmem:[%s4694_s3 + $0x278] sm:$0xff]  ;;  %v404_v38 = vld [vmem:[%s4694_s3] sm:$0xff] }
  0x1a   : > { %3405 = vmatpush3.bf16.msra.mxu0 %v3402_v36  ;;  %3279 = vmatprep.subr.bf16.mxu1 %v3278_v50  ;;  %375 = vst [vmem:[#allocation2 + $0x39] sm:$0xff] %v3925_v3  ;;  %v325_v18 = vmul.f32 %v3866_v31, %v302_v12  ;;  %v2395_v20 = vld [vmem:[%s4694_s3 + $0x270] sm:$0xff]  ;;  %376 = vst [vmem:[#allocation2 + $0x49] sm:$0xff] %v3931_v9  ;;  %v3955_v22 = vmax.f32 %v345_v10, 0.0  ;;  %v326_v24 = vmul.f32 %v3866_v31, %v303_v19  ;;  %v304_v25 = vld [vmem:[%s3848_s13 + $0x58] sm:$0xff] }
  0x1b   : > { %3407 = vmatprep.subr.bf16.mxu0 %v3406_v54  ;;  %v347_v23 = vadd.f32 %v3871_v32, %v324_v11  ;;  %377 = vst [vmem:[#allocation2 + $0x51] sm:$0xff] %v3943_v16  ;;  %v3961_v26 = vmax.f32 %v346_v17, 0.0  ;;  %v327_v28 = vmul.f32 %v3866_v31, %v304_v25  ;;  %v3286_v30 = vpack.c.bf16 %v2348_v15, %v2347_v14  ;;  %v306_v36 = vld [vmem:[%s3848_s13 + $0x68] sm:$0xff]  ;;  %v307_v43 = vld [vmem:[%s3848_s13 + $0x70] sm:$0xff]  ;;  %v2397_v44 = vld [vmem:[%s4694_s3 + $0x280] sm:$0xff] }
  0x1c   : > { %v348_v27 = vadd.f32 %v3871_v32, %v325_v18  ;;  %378 = vst [vmem:[#allocation2 + $0x61] sm:$0xff] %v3955_v22  ;;  %v349_v34 = vadd.f32 %v3871_v32, %v326_v24  ;;  %v328_v35 = vmul.f32 %v3866_v31, %v305_v29  ;;  %v3414_v37 = vpack.c.bf16 %v2396_v21, %v2395_v20  ;;  %v405_v39 = vld [vmem:[%s4694_s3 + $0x8] sm:$0xff]  ;;  %v407_v61 = vld [vmem:[%s4694_s3 + $0x18] sm:$0xff]  ;;  %v2399_v1 = vld [vmem:[%s4694_s3 + $0x290] sm:$0xff] }
  0x1d   : > { %3281 = vmatpush3.bf16.msra.mxu1 %v3278_v50  ;;  %v3967_v33 = vmax.f32 %v347_v23, 0.0  ;;  %379 = vst [vmem:[#allocation2 + $0x69] sm:$0xff] %v3961_v26  ;;  %v350_v41 = vadd.f32 %v3871_v32, %v327_v28  ;;  %v329_v42 = vmul.f32 %v3866_v31, %v306_v36  ;;  %v2398_v45 = vld [vmem:[%s4694_s3 + $0x288] sm:$0xff]  ;;  %v330_v49 = vmul.f32 %v3866_v31, %v307_v43  ;;  %v308_v50 = vld [vmem:[%s3848_s13 + $0x78] sm:$0xff]  ;;  %v408_v6 = vld [vmem:[%s4694_s3 + $0x20] sm:$0xff] }
  0x1e   : > { %3409 = vmatpush3.bf16.msra.mxu0 %v3406_v54  ;;  %3283 = vmatprep.subr.bf16.mxu1 %v3282_v8  ;;  %v3979_v40 = vmax.f32 %v348_v27, 0.0  ;;  %v3991_v47 = vmax.f32 %v349_v34, 0.0  ;;  %v351_v48 = vadd.f32 %v3871_v32, %v328_v35  ;;  %v331_v53 = vmul.f32 %v3866_v31, %v308_v50  ;;  %v406_v31 = vld [vmem:[%s4694_s3 + $0x10] sm:$0xff]  ;;  %v2401_v10 = vld [vmem:[%s4694_s3 + $0x2a0] sm:$0xff]  ;;  %v2402_v11 = vld [vmem:[%s4694_s3 + $0x2a8] sm:$0xff] }
  0x1f   : > { %3411 = vmatprep.subr.bf16.mxu0 %v3410_v13  ;;  %380 = vst [vmem:[#allocation2 + $0x79] sm:$0xff] %v3967_v33  ;;  %v3997_v51 = vmax.f32 %v350_v41, 0.0  ;;  %v352_v52 = vadd.f32 %v3871_v32, %v329_v42  ;;  %v3290_v54 = vpack.c.bf16 %v405_v39, %v404_v38  ;;  %v353_v56 = vadd.f32 %v3871_v32, %v330_v49  ;;  %v421_v0 = vld [vmem:[#allocation2 + $0x9] sm:$0xff]  ;;  %v411_v15 = vld [vmem:[%s4694_s3 + $0x38] sm:$0xff]  ;;  %v412_v19 = vld [vmem:[%s4694_s3 + $0x40] sm:$0xff] }
  0x20   : > { %381 = vst [vmem:[#allocation2 + $0x81] sm:$0xff] %v3979_v40  ;;  %382 = vst [vmem:[#allocation2 + $0x91] sm:$0xff] %v3991_v47  ;;  %v4002_v55 = vmax.f32 %v351_v48, 0.0  ;;  %v3418_v58 = vpack.c.bf16 %v2398_v45, %v2397_v44  ;;  %v354_v60 = vadd.f32 %v3871_v32, %v331_v53  ;;  %v2400_v32 = vld [vmem:[%s4694_s3 + $0x298] sm:$0xff]  ;;  %v3294_v4 = vpack.c.bf16 %v407_v61, %v406_v31  ;;  %v410_v14 = vld [vmem:[%s4694_s3 + $0x30] sm:$0xff] }
  0x21   : > { %3285 = vmatpush3.bf16.msra.mxu1 %v3282_v8  ;;  %383 = vst [vmem:[#allocation2 + $0x99] sm:$0xff] %v3997_v51  ;;  %v4006_v59 = vmax.f32 %v352_v52, 0.0  ;;  %v4016_v62 = vmax.f32 %v353_v56, 0.0  ;;  %v3422_v5 = vpack.c.bf16 %v2400_v32, %v2399_v1  ;;  %v409_v8 = vld [vmem:[%s4694_s3 + $0x28] sm:$0xff]  ;;  %v3302_v17 = vpack.c.bf16 %v411_v15, %v410_v14  ;;  %v2405_v21 = vld [vmem:[%s4694_s3 + $0x2c0] sm:$0xff]  ;;  %v414_v27 = vld [vmem:[%s4694_s3 + $0x50] sm:$0xff] }
  0x22   : > { %3413 = vmatpush3.bf16.msra.mxu0 %v3410_v13  ;;  %3287 = vmatprep.subr.bf16.mxu1 %v3286_v30  ;;  %384 = vst [vmem:[#allocation2 + $0xa9] sm:$0xff] %v4002_v55  ;;  %v4025_v2 = vmax.f32 %v354_v60, 0.0  ;;  %v3298_v12 = vpack.c.bf16 %v409_v8, %v408_v6  ;;  %v3426_v13 = vpack.c.bf16 %v2402_v11, %v2401_v10  ;;  %v413_v20 = vld [vmem:[%s4694_s3 + $0x48] sm:$0xff]  ;;  %v415_v28 = vld [vmem:[%s4694_s3 + $0x58] sm:$0xff]  ;;  %v2407_v29 = vld [vmem:[%s4694_s3 + $0x2d0] sm:$0xff] }
  0x23   : > { %3415 = vmatprep.subr.bf16.mxu0 %v3414_v37  ;;  %385 = vst [vmem:[#allocation2 + $0xb1] sm:$0xff] %v4006_v59  ;;  %386 = vst [vmem:[#allocation2 + $0xc1] sm:$0xff] %v4016_v62  ;;  %v2406_v23 = vld [vmem:[%s4694_s3 + $0x2c8] sm:$0xff]  ;;  %v3306_v24 = vpack.c.bf16 %v413_v20, %v412_v19  ;;  %v3310_v34 = vpack.c.bf16 %v415_v28, %v414_v27  ;;  %v416_v36 = vld [vmem:[%s4694_s3 + $0x60] sm:$0xff] }
  0x24   : > { %387 = vst [vmem:[#allocation2 + $0xc9] sm:$0xff] %v4025_v2  ;;  %v3434_v25 = vpack.c.bf16 %v2406_v23, %v2405_v21  ;;  %v2409_v38 = vld [vmem:[%s4694_s3 + $0x2e0] sm:$0xff]  ;;  %v2410_v39 = vld [vmem:[%s4694_s3 + $0x2e8] sm:$0xff]  ;;  %v418_v43 = vld [vmem:[%s4694_s3 + $0x70] sm:$0xff] }
  0x25   : > { %3289 = vmatpush3.bf16.msra.mxu1 %v3286_v30  ;;  %v2408_v30 = vld [vmem:[%s4694_s3 + $0x2d8] sm:$0xff]  ;;  %v3442_v42 = vpack.c.bf16 %v2410_v39, %v2409_v38  ;;  %v2411_v45 = vld [vmem:[%s4694_s3 + $0x2f0] sm:$0xff]  ;;  %v2349_v52 = vld [vmem:[%s4694_s3 + $0x100] sm:$0xff] }
  0x26   : > { %3417 = vmatpush3.bf16.msra.mxu0 %v3414_v37  ;;  %3291 = vmatprep.subr.bf16.mxu1 %v3290_v54  ;;  %v3438_v35 = vpack.c.bf16 %v2408_v30, %v2407_v29  ;;  %v417_v37 = vld [vmem:[%s4694_s3 + $0x68] sm:$0xff]  ;;  %v419_v44 = vld [vmem:[%s4694_s3 + $0x78] sm:$0xff]  ;;  %v2351_v61 = vld [vmem:[%s4694_s3 + $0x110] sm:$0xff] }
  0x27   : > { %3419 = vmatprep.subr.bf16.mxu0 %v3418_v58  ;;  %v3314_v41 = vpack.c.bf16 %v417_v37, %v416_v36  ;;  %v2412_v48 = vld [vmem:[%s4694_s3 + $0x2f8] sm:$0xff]  ;;  %v3318_v49 = vpack.c.bf16 %v419_v44, %v418_v43  ;;  %v2350_v53 = vld [vmem:[%s4694_s3 + $0x108] sm:$0xff]  ;;  %v2415_v1 = vld [vmem:[%s4694_s3 + $0x310] sm:$0xff] }
  0x28   : > { %2787 = vmatmul.mubr.f32.vlgmr.msra.gmra.mrb[0].mxu1 %v421_v0  ;;  %v3446_v50 = vpack.c.bf16 %v2412_v48, %v2411_v45  ;;  %v2414_v56 = vld [vmem:[%s4694_s3 + $0x308] sm:$0xff]  ;;  %v4141_v60 = vld [vmem:[#allocation2 + $0x1a] sm:$0xff]  ;;  %v4163_v8 = vld [vmem:[#allocation2 + $0x32] sm:$0xff] }
  0x29   : > { %3011 = vmatmul.mubr.f32.vlgmr.msra.gmra.mrb[0].mxu0 %v3908_v57  ;;  %3293 = vmatpush3.bf16.msra.mxu1 %v3290_v54  ;;  %v2413_v54 = vld [vmem:[%s4694_s3 + $0x300] sm:$0xff]  ;;  %v2352_v0 = vld [vmem:[%s4694_s3 + $0x118] sm:$0xff]  ;;  %v2418_v14 = vld [vmem:[%s4694_s3 + $0x328] sm:$0xff] }
  0x2a   : > { %3421 = vmatpush3.bf16.msra.mxu0 %v3418_v58  ;;  %2789 = vmatprep.mubr.f32.mxu1 %v3892_v46  ;;  %v2403_v46 = vld [vmem:[%s4694_s3 + $0x2b0] sm:$0xff]  ;;  %v3322_v58 = vpack.c.bf16 %v2350_v53, %v2349_v52  ;;  %v3450_v31 = vpack.c.bf16 %v2414_v56, %v2413_v54  ;;  %v2416_v32 = vld [vmem:[%s4694_s3 + $0x318] sm:$0xff]  ;;  %v3326_v6 = vpack.c.bf16 %v2352_v0, %v2351_v61  ;;  %v2353_v11 = vld [vmem:[%s4694_s3 + $0x120] sm:$0xff] }
  0x2b   : > { %3013 = vmatprep.mubr.f32.mxu0 %v3919_v63  ;;  %3295 = vmatprep.subr.bf16.mxu1 %v3294_v4  ;;  %v3454_v10 = vpack.c.bf16 %v2416_v32, %v2415_v1  ;;  %v4181_v15 = vld [vmem:[#allocation2 + $0x3a] sm:$0xff]  ;;  %v2355_v19 = vld [vmem:[%s4694_s3 + $0x130] sm:$0xff]  ;;  %v4208_v27 = vld [vmem:[#allocation2 + $0x48] sm:$0xff] }
  0x2c   : > { %2790 = vmatmul.mubr.f32.gmra.mrb[2].mxu1 %v3908_v57  ;;  %3423 = vmatprep.subr.bf16.mxu0 %v3422_v5  ;;  %v2404_v57 = vld [vmem:[%s4694_s3 + $0x2b8] sm:$0xff]  ;;  %v2419_v23 = vld [vmem:[%s4694_s3 + $0x330] sm:$0xff]  ;;  %v4211_v29 = vld [vmem:[#allocation2 + $0x62] sm:$0xff] }
  0x2d   : > { %3014 = vmatmul.mubr.f32.gmra.mrb[2].mxu0 %v3925_v3  ;;  %3297 = vmatpush3.bf16.msra.mxu1 %v3294_v4  ;;  %v3430_v18 = vpack.c.bf16 %v2404_v57, %v2403_v46  ;;  %v4157_v4 = vld [vmem:[#allocation2 + $0x22] sm:$0xff]  ;;  %v4184_v46 = vld [vmem:[#allocation2 + $0x30] sm:$0xff]  ;;  %v2356_v20 = vld [vmem:[%s4694_s3 + $0x138] sm:$0xff] }
  0x2e   : > { %3425 = vmatpush3.bf16.msra.mxu0 %v3422_v5  ;;  %2792 = vmatprep.mubr.f32.mxu1 %v3919_v63  ;;  %v4160_v5 = vld [vmem:[#allocation2 + $0x18] sm:$0xff]  ;;  %v3334_v28 = vpack.c.bf16 %v2356_v20, %v2355_v19  ;;  %v4220_v36 = vld [vmem:[#allocation2 + $0x50] sm:$0xff]  ;;  %v2421_v37 = vld [vmem:[%s4694_s3 + $0x340] sm:$0xff] }
  0x2f   : > { %3016 = vmatprep.mubr.f32.mxu0 %v3931_v9  ;;  %3299 = vmatprep.subr.bf16.mxu1 %v3298_v12  ;;  %v4196_v21 = vld [vmem:[#allocation2 + $0x38] sm:$0xff]  ;;  %v2422_v38 = vld [vmem:[%s4694_s3 + $0x348] sm:$0xff]  ;;  %v2359_v45 = vld [vmem:[%s4694_s3 + $0x150] sm:$0xff] }
  0x30   : > { %2793 = vmatmul.mubr.f32.gmra.mrb[4].mxu1 %v3925_v3  ;;  %3427 = vmatprep.subr.bf16.mxu0 %v3426_v13  ;;  %v4229_v39 = vld [vmem:[#allocation2 + $0x6a] sm:$0xff]  ;;  %v4235_v43 = vld [vmem:[#allocation2 + $0x7a] sm:$0xff]  ;;  %v3466_v44 = vpack.c.bf16 %v2422_v38, %v2421_v37  ;;  %v4253_v53 = vld [vmem:[#allocation2 + $0x82] sm:$0xff] }
  0x31   : > { %3017 = vmatmul.mubr.f32.gmra.mrb[4].mxu0 %v3943_v16  ;;  %3301 = vmatpush3.bf16.msra.mxu1 %v3298_v12  ;;  %v2354_v12 = vld [vmem:[%s4694_s3 + $0x128] sm:$0xff]  ;;  %v2360_v48 = vld [vmem:[%s4694_s3 + $0x158] sm:$0xff]  ;;  %v2361_v61 = vld [vmem:[%s4694_s3 + $0x160] sm:$0xff] }
  0x32   : > { %3429 = vmatpush3.bf16.msra.mxu0 %v3426_v13  ;;  %2795 = vmatprep.mubr.f32.mxu1 %v3931_v9  ;;  %v4172_v13 = vld [vmem:[#allocation2 + $0x20] sm:$0xff]  ;;  %v3330_v57 = vpack.c.bf16 %v2354_v12, %v2353_v11  ;;  %v2424_v52 = vld [vmem:[%s4694_s3 + $0x358] sm:$0xff]  ;;  %v3342_v56 = vpack.c.bf16 %v2360_v48, %v2359_v45  ;;  %v2362_v0 = vld [vmem:[%s4694_s3 + $0x168] sm:$0xff] }
  0x33   : > { %3019 = vmatprep.mubr.f32.mxu0 %v3955_v22  ;;  %3303 = vmatprep.subr.bf16.mxu1 %v3302_v17  ;;  %v4256_v54 = vld [vmem:[#allocation2 + $0x78] sm:$0xff]  ;;  %v4268_v1 = vld [vmem:[#allocation2 + $0x80] sm:$0xff]  ;;  %v4280_v11 = vld [vmem:[#allocation2 + $0x90] sm:$0xff]  ;;  %v3346_v12 = vpack.c.bf16 %v2362_v0, %v2361_v61 }
  0x34   : > { %2796 = vmatmul.mubr.f32.gmra.mrb[6].mxu1 %v3943_v16  ;;  %3431 = vmatprep.subr.bf16.mxu0 %v3430_v18  ;;  %v2425_v32 = vld [vmem:[%s4694_s3 + $0x360] sm:$0xff]  ;;  %v4292_v19 = vld [vmem:[#allocation2 + $0x98] sm:$0xff]  ;;  %v2427_v20 = vld [vmem:[%s4694_s3 + $0x370] sm:$0xff] }
  0x35   : > { %3020 = vmatmul.mubr.f32.gmra.mrb[6].mxu0 %v3961_v26  ;;  %3305 = vmatpush3.bf16.msra.mxu1 %v3302_v17  ;;  %v4187_v17 = vld [vmem:[#allocation2 + $0x4a] sm:$0xff]  ;;  %v2365_v37 = vld [vmem:[%s4694_s3 + $0x180] sm:$0xff]  ;;  %v2368_v61 = vld [vmem:[%s4694_s3 + $0x198] sm:$0xff] }
  0x36   : > { %3433 = vmatpush3.bf16.msra.mxu0 %v3430_v18  ;;  %2798 = vmatprep.mubr.f32.mxu1 %v3955_v22  ;;  %v2366_v38 = vld [vmem:[%s4694_s3 + $0x188] sm:$0xff] }
  0x37   : > { %3022 = vmatprep.mubr.f32.mxu0 %v3967_v33  ;;  %3307 = vmatprep.subr.bf16.mxu1 %v3306_v24  ;;  %v2430_v45 = vld [vmem:[%s4694_s3 + $0x388] sm:$0xff] }
  0x38   : > { %2799 = vmatmul.mubr.f32.gmra.mrb[8].mxu1 %v3961_v26  ;;  %3435 = vmatprep.subr.bf16.mxu0 %v3434_v25  ;;  %v4325_v48 = vld [vmem:[#allocation2 + $0xca] sm:$0xff] }
  0x39   : > { %3023 = vmatmul.mubr.f32.gmra.mrb[8].mxu0 %v3979_v40  ;;  %3309 = vmatpush3.bf16.msra.mxu1 %v3306_v24  ;;  %v2420_v24 = vld [vmem:[%s4694_s3 + $0x338] sm:$0xff]  ;;  %v744_v0 = vld [vmem:[#allocation2 + $0xa] sm:$0xff] }
  0x3a   : > { %3437 = vmatpush3.bf16.msra.mxu0 %v3434_v25  ;;  %2801 = vmatprep.mubr.f32.mxu1 %v3967_v33  ;;  %v4205_v25 = vld [vmem:[#allocation2 + $0x52] sm:$0xff]  ;;  %v3462_v30 = vpack.c.bf16 %v2420_v24, %v2419_v23 }
  0x3b   : > { %3025 = vmatprep.mubr.f32.mxu0 %v3991_v47  ;;  %3311 = vmatprep.subr.bf16.mxu1 %v3310_v34  ;;  %v2428_v23 = vld [vmem:[%s4694_s3 + $0x378] sm:$0xff] }
  0x3c   : > { %2802 = vmatmul.mubr.f32.gmra.mrb[10].mxu1 %v3979_v40  ;;  %3439 = vmatprep.subr.bf16.mxu0 %v3438_v35  ;;  %v4301_v24 = vld [vmem:[#allocation2 + $0xb2] sm:$0xff] }
  0x3d   : > { %3026 = vmatmul.mubr.f32.gmra.mrb[10].mxu0 %v3997_v51  ;;  %3313 = vmatpush3.bf16.msra.mxu1 %v3310_v34  ;;  %v2357_v34 = vld [vmem:[%s4694_s3 + $0x140] sm:$0xff] }
  0x3e   : > { %3441 = vmatpush3.bf16.msra.mxu0 %v3438_v35  ;;  %2804 = vmatprep.mubr.f32.mxu1 %v3991_v47  ;;  %v2358_v35 = vld [vmem:[%s4694_s3 + $0x148] sm:$0xff] }
  0x3f   : > { %3028 = vmatprep.mubr.f32.mxu0 %v4002_v55  ;;  %3315 = vmatprep.subr.bf16.mxu1 %v3314_v41 }
  0x40   : > { %2805 = vmatmul.mubr.f32.gmra.mrb[12].mxu1 %v3997_v51  ;;  %3443 = vmatprep.subr.bf16.mxu0 %v3442_v42 }
  0x41   : > { %3029 = vmatmul.mubr.f32.gmra.mrb[12].mxu0 %v4006_v59  ;;  %3317 = vmatpush3.bf16.msra.mxu1 %v3314_v41  ;;  %v4232_v41 = vld [vmem:[#allocation2 + $0x60] sm:$0xff] }
  0x42   : > { %3445 = vmatpush3.bf16.msra.mxu0 %v3442_v42  ;;  %2807 = vmatprep.mubr.f32.mxu1 %v4002_v55  ;;  %v3338_v42 = vpack.c.bf16 %v2358_v35, %v2357_v34  ;;  %v4307_v34 = vld [vmem:[#allocation2 + $0xc2] sm:$0xff]  ;;  %v3478_v35 = vpack.c.bf16 %v2428_v23, %v2427_v20 }
  0x43   : > { %3031 = vmatprep.mubr.f32.mxu0 %v4016_v62  ;;  %3319 = vmatprep.subr.bf16.mxu1 %v3318_v49  ;;  %v2433_v20 = vld [vmem:[%s4694_s3 + $0x3a0] sm:$0xff]  ;;  %v2434_v23 = vld [vmem:[%s4694_s3 + $0x3a8] sm:$0xff] }
  0x44   : > { %2808 = vmatmul.mubr.f32.gmra.mrb[14].mxu1 %v4006_v59  ;;  %3447 = vmatprep.subr.bf16.mxu0 %v3446_v50 }
  0x45   : > { %3032 = vmatmul.mubr.f32.gmra.mrb[14].mxu0 %v4025_v2  ;;  %3321 = vmatpush3.bf16.msra.mxu1 %v3318_v49  ;;  %v4244_v49 = vld [vmem:[#allocation2 + $0x68] sm:$0xff] }
  0x46   : > { %3449 = vmatpush3.bf16.msra.mxu0 %v3446_v50  ;;  %2842 = vmatprep.mubr.f32.mxu1 %v3708_v7  ;;  %v2423_v50 = vld [vmem:[%s4694_s3 + $0x350] sm:$0xff] }
  0x47   : > { %3066 = vmatprep.mubr.f32.mxu0 %v4141_v60  ;;  %3323 = vmatprep.subr.bf16.mxu1 %v3322_v58 }
  0x48   : > { %2843 = vmatmul.mubr.f32.vlgmr.msra.gmra.mrb[0].mxu1 %v3708_v7  ;;  %3451 = vmatprep.subr.bf16.mxu0 %v3450_v31  ;;  %v2417_v7 = vld [vmem:[%s4694_s3 + $0x320] sm:$0xff] }
  0x49   : > { %3067 = vmatmul.mubr.f32.vlgmr.msra.gmra.mrb[0].mxu0 %v4157_v4  ;;  %3325 = vmatpush3.bf16.msra.mxu1 %v3322_v58  ;;  %v3458_v18 = vpack.c.bf16 %v2418_v14, %v2417_v7  ;;  %v4259_v58 = vld [vmem:[#allocation2 + $0x92] sm:$0xff]  ;;  %v4283_v7 = vld [vmem:[#allocation2 + $0xaa] sm:$0xff] }
  0x4a   : > { %3453 = vmatpush3.bf16.msra.mxu0 %v3450_v31  ;;  %2845 = vmatprep.mubr.f32.mxu1 %v4160_v5  ;;  %v3470_v31 = vpack.c.bf16 %v2424_v52, %v2423_v50  ;;  %v743_v50 = vld [vmem:[#allocation2 + $0x2] sm:$0xff]  ;;  %v3354_v52 = vpack.c.bf16 %v2366_v38, %v2365_v37  ;;  %v2371_v37 = vld [vmem:[%s4694_s3 + $0x1b0] sm:$0xff]  ;;  %v2372_v38 = vld [vmem:[%s4694_s3 + $0x1b8] sm:$0xff] }
  0x4b   : > { %3069 = vmatprep.mubr.f32.mxu0 %v4163_v8  ;;  %3327 = vmatprep.subr.bf16.mxu1 %v3326_v6 }
  0x4c   : > { %2846 = vmatmul.mubr.f32.gmra.mrb[2].mxu1 %v4172_v13  ;;  %3455 = vmatprep.subr.bf16.mxu0 %v3454_v10 }
  0x4d   : > { %3070 = vmatmul.mubr.f32.gmra.mrb[2].mxu0 %v4181_v15  ;;  %3329 = vmatpush3.bf16.msra.mxu1 %v3326_v6  ;;  %v2426_v6 = vld [vmem:[%s4694_s3 + $0x368] sm:$0xff] }
  0x4e   : > { %3457 = vmatpush3.bf16.msra.mxu0 %v3454_v10  ;;  %2848 = vmatprep.mubr.f32.mxu1 %v4184_v46  ;;  %v4277_v10 = vld [vmem:[#allocation2 + $0x9a] sm:$0xff]  ;;  %v3474_v14 = vpack.c.bf16 %v2426_v6, %v2425_v32  ;;  %v2431_v32 = vld [vmem:[%s4694_s3 + $0x390] sm:$0xff] }
  0x4f   : > { %3072 = vmatprep.mubr.f32.mxu0 %v4187_v17  ;;  %3331 = vmatprep.subr.bf16.mxu1 %v3330_v57  ;;  %v2432_v6 = vld [vmem:[%s4694_s3 + $0x398] sm:$0xff] }
  0x50   : > { %2849 = vmatmul.mubr.f32.gmra.mrb[4].mxu1 %v4196_v21  ;;  %3459 = vmatprep.subr.bf16.mxu0 %v3458_v18 }
  0x51   : > { %3073 = vmatmul.mubr.f32.gmra.mrb[4].mxu0 %v4205_v25  ;;  %3333 = vmatpush3.bf16.msra.mxu1 %v3330_v57  ;;  %v2363_v57 = vld [vmem:[%s4694_s3 + $0x170] sm:$0xff] }
  0x52   : > { %3461 = vmatpush3.bf16.msra.mxu0 %v3458_v18  ;;  %2851 = vmatprep.mubr.f32.mxu1 %v4208_v27  ;;  %v2364_v18 = vld [vmem:[%s4694_s3 + $0x178] sm:$0xff] }
  0x53   : > { %3075 = vmatprep.mubr.f32.mxu0 %v4211_v29  ;;  %3335 = vmatprep.subr.bf16.mxu1 %v3334_v28 }
  0x54   : > { %2852 = vmatmul.mubr.f32.gmra.mrb[6].mxu1 %v4220_v36  ;;  %3463 = vmatprep.subr.bf16.mxu0 %v3462_v30 }
  0x55   : > { %3076 = vmatmul.mubr.f32.gmra.mrb[6].mxu0 %v4229_v39  ;;  %3337 = vmatpush3.bf16.msra.mxu1 %v3334_v28  ;;  %v4304_v28 = vld [vmem:[#allocation2 + $0xa8] sm:$0xff] }
  0x56   : > { %3465 = vmatpush3.bf16.msra.mxu0 %v3462_v30  ;;  %2854 = vmatprep.mubr.f32.mxu1 %v4232_v41  ;;  %v3350_v30 = vpack.c.bf16 %v2364_v18, %v2363_v57  ;;  %v2369_v57 = vld [vmem:[%s4694_s3 + $0x1a0] sm:$0xff]  ;;  %v2370_v18 = vld [vmem:[%s4694_s3 + $0x1a8] sm:$0xff] }
  0x57   : > { %3078 = vmatprep.mubr.f32.mxu0 %v4235_v43  ;;  %3339 = vmatprep.subr.bf16.mxu1 %v3338_v42 }
  0x58   : > { %2855 = vmatmul.mubr.f32.gmra.mrb[8].mxu1 %v4244_v49  ;;  %3467 = vmatprep.subr.bf16.mxu0 %v3466_v44 }
  0x59   : > { %3079 = vmatmul.mubr.f32.gmra.mrb[8].mxu0 %v4253_v53  ;;  %3341 = vmatpush3.bf16.msra.mxu1 %v3338_v42  ;;  %v4316_v42 = vld [vmem:[#allocation2 + $0xb0] sm:$0xff] }
  0x5a   : > { %3469 = vmatpush3.bf16.msra.mxu0 %v3466_v44  ;;  %2857 = vmatprep.mubr.f32.mxu1 %v4256_v54  ;;  %v2429_v44 = vld [vmem:[%s4694_s3 + $0x380] sm:$0xff] }
  0x5b   : > { %3081 = vmatprep.mubr.f32.mxu0 %v4259_v58  ;;  %3343 = vmatprep.subr.bf16.mxu1 %v3342_v56 }
  0x5c   : > { %2858 = vmatmul.mubr.f32.gmra.mrb[10].mxu1 %v4268_v1  ;;  %3471 = vmatprep.subr.bf16.mxu0 %v3470_v31 }
  0x5d   : > { %3082 = vmatmul.mubr.f32.gmra.mrb[10].mxu0 %v4277_v10  ;;  %3345 = vmatpush3.bf16.msra.mxu1 %v3342_v56  ;;  %v3482_v56 = vpack.c.bf16 %v2430_v45, %v2429_v44  ;;  %v3366_v44 = vpack.c.bf16 %v2372_v38, %v2371_v37  ;;  %v4423_v38 = vld [vmem:[#allocation2 + $0xc0] sm:$0xff] }
  0x5e   : > { %3473 = vmatpush3.bf16.msra.mxu0 %v3470_v31  ;;  %2860 = vmatprep.mubr.f32.mxu1 %v4280_v11  ;;  %v2367_v31 = vld [vmem:[%s4694_s3 + $0x190] sm:$0xff] }
  0x5f   : > { %3084 = vmatprep.mubr.f32.mxu0 %v4283_v7  ;;  %3347 = vmatprep.subr.bf16.mxu1 %v3346_v12 }
  0x60   : > { %2861 = vmatmul.mubr.f32.gmra.mrb[12].mxu1 %v4292_v19  ;;  %3475 = vmatprep.subr.bf16.mxu0 %v3474_v14 }
  0x61   : > { %3085 = vmatmul.mubr.f32.gmra.mrb[12].mxu0 %v4301_v24  ;;  %3349 = vmatpush3.bf16.msra.mxu1 %v3346_v12  ;;  %v3358_v12 = vpack.c.bf16 %v2368_v61, %v2367_v31  ;;  %v2438_v31 = vld [vmem:[%s4694_s3 + $0x3c8] sm:$0xff] }
  0x62   : > { %3477 = vmatpush3.bf16.msra.mxu0 %v3474_v14  ;;  %2863 = vmatprep.mubr.f32.mxu1 %v4304_v28  ;;  %v3486_v14 = vpack.c.bf16 %v2432_v6, %v2431_v32  ;;  %v2375_v32 = vld [vmem:[%s4694_s3 + $0x1d0] sm:$0xff]  ;;  %v2376_v6 = vld [vmem:[%s4694_s3 + $0x1d8] sm:$0xff] }
  0x63   : > { %3087 = vmatprep.mubr.f32.mxu0 %v4307_v34  ;;  %3351 = vmatprep.subr.bf16.mxu1 %v3350_v30 }
  0x64   : > { %2864 = vmatmul.mubr.f32.gmra.mrb[14].mxu1 %v4316_v42  ;;  %3479 = vmatprep.subr.bf16.mxu0 %v3478_v35 }
  0x65   : > { %3088 = vmatmul.mubr.f32.gmra.mrb[14].mxu0 %v4325_v48  ;;  %3353 = vmatpush3.bf16.msra.mxu1 %v3350_v30  ;;  %v3362_v30 = vpack.c.bf16 %v2370_v18, %v2369_v57  ;;  %v3374_v57 = vpack.c.bf16 %v2376_v6, %v2375_v32  ;;  %v3699_v32 = vld [vmem:[#allocation2] sm:$0xff] }
  0x66   : > { %3481 = vmatpush3.bf16.msra.mxu0 %v3478_v35  ;;  %2898 = vmatprep.mubr.f32.mxu1 %v743_v50  ;;  %v3490_v35 = vpack.c.bf16 %v2434_v23, %v2433_v20  ;;  %v2373_v50 = vld [vmem:[%s4694_s3 + $0x1c0] sm:$0xff]  ;;  %v2378_v23 = vld [vmem:[%s4694_s3 + $0x1e8] sm:$0xff] }
  0x67   : > { %3122 = vmatprep.mubr.f32.mxu0 %v4184_v46  ;;  %3355 = vmatprep.subr.bf16.mxu1 %v3354_v52  ;;  %v2377_v20 = vld [vmem:[%s4694_s3 + $0x1e0] sm:$0xff] }
  0x68   : > { %2899 = vmatmul.mubr.f32.vlgmr.msra.gmra.mrb[0].mxu1 %v744_v0  ;;  %3483 = vmatprep.subr.bf16.mxu0 %v3482_v56  ;;  %v3378_v37 = vpack.c.bf16 %v2378_v23, %v2377_v20  ;;  %v2450_v20 = vld [vmem:[%s4694_s3 + $0x428] sm:$0xff] }
  0x69   : > { %3123 = vmatmul.mubr.f32.vlgmr.msra.gmra.mrb[0].mxu0 %v4196_v21  ;;  %3357 = vmatpush3.bf16.msra.mxu1 %v3354_v52  ;;  %v2374_v52 = vld [vmem:[%s4694_s3 + $0x1c8] sm:$0xff] }
  0x6a   : > { %3485 = vmatpush3.bf16.msra.mxu0 %v3482_v56  ;;  %2901 = vmatprep.mubr.f32.mxu1 %v4141_v60  ;;  %v2435_v60 = vld [vmem:[%s4694_s3 + $0x3b0] sm:$0xff]  ;;  %v2437_v56 = vld [vmem:[%s4694_s3 + $0x3c0] sm:$0xff]  ;;  %v3370_v61 = vpack.c.bf16 %v2374_v52, %v2373_v50  ;;  %v2444_v50 = vld [vmem:[%s4694_s3 + $0x3f8] sm:$0xff] }
  0x6b   : > { %3125 = vmatprep.mubr.f32.mxu0 %v4208_v27  ;;  %3359 = vmatprep.subr.bf16.mxu1 %v3358_v12  ;;  %v3498_v0 = vpack.c.bf16 %v2438_v31, %v2437_v56  ;;  %v4439_v52 = vld [vmem:[#allocation2 + $0xc8] sm:$0xff] }
  0x6c   : > { %2902 = vmatmul.mubr.f32.gmra.mrb[2].mxu1 %v4157_v4  ;;  %3487 = vmatprep.subr.bf16.mxu0 %v3486_v14  ;;  %v2436_v4 = vld [vmem:[%s4694_s3 + $0x3b8] sm:$0xff] }
  0x6d   : > { %3126 = vmatmul.mubr.f32.gmra.mrb[2].mxu0 %v4220_v36  ;;  %3361 = vmatpush3.bf16.msra.mxu1 %v3358_v12  ;;  %v3494_v45 = vpack.c.bf16 %v2436_v4, %v2435_v60  ;;  %v2439_v12 = vld [vmem:[%s4694_s3 + $0x3d0] sm:$0xff] }
  0x6e   : > { %3489 = vmatpush3.bf16.msra.mxu0 %v3486_v14  ;;  %2904 = vmatprep.mubr.f32.mxu1 %v4163_v8  ;;  %v2440_v14 = vld [vmem:[%s4694_s3 + $0x3d8] sm:$0xff]  ;;  %v2379_v4 = vld [vmem:[%s4694_s3 + $0x1f0] sm:$0xff] }
  0x6f   : > { %3128 = vmatprep.mubr.f32.mxu0 %v4232_v41  ;;  %3363 = vmatprep.subr.bf16.mxu1 %v3362_v30  ;;  %v3502_v18 = vpack.c.bf16 %v2440_v14, %v2439_v12  ;;  %v2447_v12 = vld [vmem:[%s4694_s3 + $0x410] sm:$0xff]  ;;  %v2448_v14 = vld [vmem:[%s4694_s3 + $0x418] sm:$0xff] }
  0x70   : > { %2905 = vmatmul.mubr.f32.gmra.mrb[4].mxu1 %v4181_v15  ;;  %3491 = vmatprep.subr.bf16.mxu0 %v3490_v35 }
  0x71   : > { %3129 = vmatmul.mubr.f32.gmra.mrb[4].mxu0 %v4244_v49  ;;  %3365 = vmatpush3.bf16.msra.mxu1 %v3362_v30  ;;  %v2441_v30 = vld [vmem:[%s4694_s3 + $0x3e0] sm:$0xff] }
  0x72   : > { %3493 = vmatpush3.bf16.msra.mxu0 %v3490_v35  ;;  %2907 = vmatprep.mubr.f32.mxu1 %v4187_v17  ;;  %v2442_v35 = vld [vmem:[%s4694_s3 + $0x3e8] sm:$0xff] }
  0x73   : > { %3131 = vmatprep.mubr.f32.mxu0 %v4256_v54  ;;  %3367 = vmatprep.subr.bf16.mxu1 %v3366_v44  ;;  %v3506_v60 = vpack.c.bf16 %v2442_v35, %v2441_v30 }
  0x74   : > { %2908 = vmatmul.mubr.f32.gmra.mrb[6].mxu1 %v4205_v25  ;;  %3495 = vmatprep.subr.bf16.mxu0 %v3494_v45 }
  0x75   : > { %3132 = vmatmul.mubr.f32.gmra.mrb[6].mxu0 %v4268_v1  ;;  %3369 = vmatpush3.bf16.msra.mxu1 %v3366_v44  ;;  %v2380_v44 = vld [vmem:[%s4694_s3 + $0x1f8] sm:$0xff] }
  0x76   : > { %3497 = vmatpush3.bf16.msra.mxu0 %v3494_v45  ;;  %2910 = vmatprep.mubr.f32.mxu1 %v4211_v29  ;;  %v2443_v45 = vld [vmem:[%s4694_s3 + $0x3f0] sm:$0xff]  ;;  %v3382_v56 = vpack.c.bf16 %v2380_v44, %v2379_v4 }
  0x77   : > { %3134 = vmatprep.mubr.f32.mxu0 %v4280_v11  ;;  %3371 = vmatprep.subr.bf16.mxu1 %v3370_v61  ;;  %v3510_v31 = vpack.c.bf16 %v2444_v50, %v2443_v45 }
  0x78   : > { %2911 = vmatmul.mubr.f32.gmra.mrb[8].mxu1 %v4229_v39  ;;  %3499 = vmatprep.subr.bf16.mxu0 %v3498_v0 }
  0x79   : > { %3135 = vmatmul.mubr.f32.gmra.mrb[8].mxu0 %v4292_v19  ;;  %3373 = vmatpush3.bf16.msra.mxu1 %v3370_v61  ;;  %v2445_v61 = vld [vmem:[%s4694_s3 + $0x400] sm:$0xff] }
  0x7a   : > { %3501 = vmatpush3.bf16.msra.mxu0 %v3498_v0  ;;  %2913 = vmatprep.mubr.f32.mxu1 %v4235_v43  ;;  %v2446_v0 = vld [vmem:[%s4694_s3 + $0x408] sm:$0xff] }
  0x7b   : > { %3137 = vmatprep.mubr.f32.mxu0 %v4304_v28  ;;  %3375 = vmatprep.subr.bf16.mxu1 %v3374_v57  ;;  %v3514_v6 = vpack.c.bf16 %v2446_v0, %v2445_v61 }
  0x7c   : > { %2914 = vmatmul.mubr.f32.gmra.mrb[10].mxu1 %v4253_v53  ;;  %3503 = vmatprep.subr.bf16.mxu0 %v3502_v18 }
  0x7d   : > { %3138 = vmatmul.mubr.f32.gmra.mrb[10].mxu0 %v4316_v42  ;;  %3377 = vmatpush3.bf16.msra.mxu1 %v3374_v57  ;;  %v3518_v57 = vpack.c.bf16 %v2448_v14, %v2447_v12 }
  0x7e   : > { %3505 = vmatpush3.bf16.msra.mxu0 %v3502_v18  ;;  %2916 = vmatprep.mubr.f32.mxu1 %v4259_v58  ;;  %v2449_v18 = vld [vmem:[%s4694_s3 + $0x420] sm:$0xff] }
  0x7f   : > { %3140 = vmatprep.mubr.f32.mxu0 %v4423_v38  ;;  %3379 = vmatprep.subr.bf16.mxu1 %v3378_v37 }
  0x80   : > { %2917 = vmatmul.mubr.f32.gmra.mrb[12].mxu1 %v4277_v10  ;;  %3507 = vmatprep.subr.bf16.mxu0 %v3506_v60 }
  0x81   : > { %3141 = vmatmul.mubr.f32.gmra.mrb[12].mxu0 %v4439_v52  ;;  %3381 = vmatpush3.bf16.msra.mxu1 %v3378_v37 }
  0x82   : > { %3509 = vmatpush3.bf16.msra.mxu0 %v3506_v60  ;;  %2919 = vmatprep.mubr.f32.mxu1 %v4283_v7 }
  0x83   : > { %3143 = vmatprep.mubr.f32.mxu0 %v3699_v32  ;;  %3383 = vmatprep.subr.bf16.mxu1 %v3382_v56 }
  0x84   : > { %2920 = vmatmul.mubr.f32.gmra.mrb[14].mxu1 %v4301_v24  ;;  %3511 = vmatprep.subr.bf16.mxu0 %v3510_v31 }
  0x85   : > { %3144 = vmatmul.mubr.f32.gmra.mrb[14].mxu0 %v3699_v32  ;;  %3385 = vmatpush3.bf16.msra.mxu1 %v3382_v56 }
  0x86   : > { %3513 = vmatpush3.bf16.msra.mxu0 %v3510_v31  ;;  %2954 = vmatprep.mubr.f32.mxu1 %v4160_v5  ;;  %v2451_v5 = vld [vmem:[%s4694_s3 + $0x430] sm:$0xff] }
  0x87   : > { %3178 = vmatprep.mubr.f32.mxu0 %v3919_v63  ;;  %3515 = vmatprep.subr.bf16.mxu0 %v3514_v6  ;;  %v3522_v63 = vpack.c.bf16 %v2450_v20, %v2449_v18 }
  0x88   : > { %2955 = vmatmul.mubr.f32.vlgmr.msra.gmra.mrb[0].mxu1 %v4172_v13  ;;  %3546 = vmatprep.subr.bf16.mxu1 %v3514_v6  ;;  %v2452_v13 = vld [vmem:[%s4694_s3 + $0x438] sm:$0xff] }
  0x89   : > { %3179 = vmatmul.mubr.f32.vlgmr.msra.gmra.mrb[0].mxu0 %v3925_v3  ;;  %3554 = vmatpush3.bf16.msra.mxu1 %v3514_v6  ;;  %v3526_v3 = vpack.c.bf16 %v2452_v13, %v2451_v5 }
  0x8a   : > { %3517 = vmatpush3.bf16.msra.mxu0 %v3514_v6  ;;  %2957 = vmatprep.mubr.f32.mxu1 %v4184_v46  ;;  %v2454_v46 = vld [vmem:[%s4694_s3 + $0x448] sm:$0xff] }
  0x8b   : > { %3181 = vmatprep.mubr.f32.mxu0 %v3931_v9  ;;  %3519 = vmatprep.subr.bf16.mxu0 %v3518_v57  ;;  %v2453_v9 = vld [vmem:[%s4694_s3 + $0x440] sm:$0xff] }
  0x8c   : > { %2958 = vmatmul.mubr.f32.gmra.mrb[2].mxu1 %v4196_v21  ;;  %3547 = vmatprep.subr.bf16.mxu1 %v3518_v57  ;;  %v2456_v21 = vld [vmem:[%s4694_s3 + $0x458] sm:$0xff] }
  0x8d   : > { %3182 = vmatmul.mubr.f32.gmra.mrb[2].mxu0 %v3943_v16  ;;  %3555 = vmatpush3.bf16.msra.mxu1 %v3518_v57  ;;  %v3530_v16 = vpack.c.bf16 %v2454_v46, %v2453_v9 }
  0x8e   : > { %3521 = vmatpush3.bf16.msra.mxu0 %v3518_v57  ;;  %2960 = vmatprep.mubr.f32.mxu1 %v4208_v27  ;;  %v2458_v27 = vld [vmem:[%s4694_s3 + $0x468] sm:$0xff] }
  0x8f   : > { %3184 = vmatprep.mubr.f32.mxu0 %v3955_v22  ;;  %3523 = vmatprep.subr.bf16.mxu0 %v3522_v63  ;;  %v2455_v22 = vld [vmem:[%s4694_s3 + $0x450] sm:$0xff] }
  0x90   : > { %2961 = vmatmul.mubr.f32.gmra.mrb[4].mxu1 %v4220_v36  ;;  %3548 = vmatprep.subr.bf16.mxu1 %v3522_v63  ;;  %v2460_v36 = vld [vmem:[%s4694_s3 + $0x478] sm:$0xff] }
  0x91   : > { %3185 = vmatmul.mubr.f32.gmra.mrb[4].mxu0 %v3961_v26  ;;  %3556 = vmatpush3.bf16.msra.mxu1 %v3522_v63  ;;  %v3534_v26 = vpack.c.bf16 %v2456_v21, %v2455_v22 }
  0x92   : > { %3525 = vmatpush3.bf16.msra.mxu0 %v3522_v63  ;;  %2963 = vmatprep.mubr.f32.mxu1 %v4232_v41  ;;  %v1729_v41 = vld [vmem:[#allocation2 + $0xe1] sm:$0xff] }
  0x93   : > { %3187 = vmatprep.mubr.f32.mxu0 %v3967_v33  ;;  %3527 = vmatprep.subr.bf16.mxu0 %v3526_v3  ;;  %v2457_v33 = vld [vmem:[%s4694_s3 + $0x460] sm:$0xff] }
  0x94   : > { %2964 = vmatmul.mubr.f32.gmra.mrb[6].mxu1 %v4244_v49  ;;  %3549 = vmatprep.subr.bf16.mxu1 %v3526_v3 }
  0x95   : > { %3188 = vmatmul.mubr.f32.gmra.mrb[6].mxu0 %v3979_v40  ;;  %3557 = vmatpush3.bf16.msra.mxu1 %v3526_v3  ;;  %v3538_v40 = vpack.c.bf16 %v2458_v27, %v2457_v33 }
  0x96   : > { %3529 = vmatpush3.bf16.msra.mxu0 %v3526_v3  ;;  %2966 = vmatprep.mubr.f32.mxu1 %v4256_v54 }
  0x97   : > { %3190 = vmatprep.mubr.f32.mxu0 %v3991_v47  ;;  %3531 = vmatprep.subr.bf16.mxu0 %v3530_v16  ;;  %v2459_v47 = vld [vmem:[%s4694_s3 + $0x470] sm:$0xff] }
  0x98   : > { %2967 = vmatmul.mubr.f32.gmra.mrb[8].mxu1 %v4268_v1  ;;  %3550 = vmatprep.subr.bf16.mxu1 %v3530_v16 }
  0x99   : > { %3191 = vmatmul.mubr.f32.gmra.mrb[8].mxu0 %v3997_v51  ;;  %3558 = vmatpush3.bf16.msra.mxu1 %v3530_v16  ;;  %v3542_v51 = vpack.c.bf16 %v2460_v36, %v2459_v47 }
  0x9a   : > { %3533 = vmatpush3.bf16.msra.mxu0 %v3530_v16  ;;  %2969 = vmatprep.mubr.f32.mxu1 %v4280_v11 }
  0x9b   : > { %3193 = vmatprep.mubr.f32.mxu0 %v4002_v55  ;;  %3535 = vmatprep.subr.bf16.mxu0 %v3534_v26  ;;  %v1728_v55 = vld [vmem:[#allocation2 + $0xd9] sm:$0xff] }
  0x9c   : > { %2970 = vmatmul.mubr.f32.gmra.mrb[10].mxu1 %v4292_v19  ;;  %3551 = vmatprep.subr.bf16.mxu1 %v3534_v26 }
  0x9d   : > { %3194 = vmatmul.mubr.f32.gmra.mrb[10].mxu0 %v4006_v59  ;;  %3559 = vmatpush3.bf16.msra.mxu1 %v3534_v26  ;;  %v1922_v59 = vld [vmem:[#allocation2 + $0xda] sm:$0xff] }
  0x9e   : > { %3537 = vmatpush3.bf16.msra.mxu0 %v3534_v26  ;;  %2972 = vmatprep.mubr.f32.mxu1 %v4304_v28 }
  0x9f   : > { %3196 = vmatprep.mubr.f32.mxu0 %v4016_v62  ;;  %3539 = vmatprep.subr.bf16.mxu0 %v3538_v40  ;;  %v1923_v62 = vld [vmem:[#allocation2 + $0xe2] sm:$0xff] }
  0xa0   : > { %2973 = vmatmul.mubr.f32.gmra.mrb[12].mxu1 %v4316_v42  ;;  %3552 = vmatprep.subr.bf16.mxu1 %v3538_v40 }
  0xa1   : > { %3197 = vmatmul.mubr.f32.gmra.mrb[12].mxu0 %v4025_v2  ;;  %3560 = vmatpush3.bf16.msra.mxu1 %v3538_v40 }
  0xa2   : > { %3541 = vmatpush3.bf16.msra.mxu0 %v3538_v40  ;;  %2975 = vmatprep.mubr.f32.mxu1 %v4423_v38 }
  0xa3   : > { %3199 = vmatprep.mubr.f32.mxu0 %v1728_v55  ;;  %3543 = vmatprep.subr.bf16.mxu0 %v3542_v51 }
  0xa4   : > { %2976 = vmatmul.mubr.f32.gmra.mrb[14].mxu1 %v4439_v52  ;;  %3553 = vmatprep.subr.bf16.mxu1 %v3542_v51  ;;  %v4557_v52 = vld [vmem:[%s4695_s4] ss:$0 sm:$0xff] }
  0xa5   : > { %3200 = vmatmul.mubr.f32.gmra.mrb[14].mxu0 %v1729_v41  ;;  %3561 = vmatpush3.bf16.msra.mxu1 %v3542_v51 }
  0xa6   : > { %3545 = vmatpush3.bf16.msra.mxu0 %v3542_v51  ;;  %3234 = vmatprep.mubr.f32.mxu0 %v4163_v8 }
  0xa7   : > { %3246 = vmatprep.mubr.f32.mxu1 %v4259_v58 }
  0xa8   : > { %3247 = vmatmul.mubr.f32.vlgmr.msra.gmra.mrb[16].mxu1 %v4277_v10 }
  0xa9   : > { %3235 = vmatmul.mubr.f32.vlgmr.msra.gmra.mrb[0].mxu0 %v4181_v15  ;;  %3249 = vmatprep.mubr.f32.mxu1 %v4283_v7 }
  0xaa   : > { %3237 = vmatprep.mubr.f32.mxu0 %v4187_v17 }
  0xac   : > { %3250 = vmatmul.mubr.f32.gmra.mrb[18].mxu1 %v4301_v24 }
  0xad   : > { %3238 = vmatmul.mubr.f32.gmra.mrb[2].mxu0 %v4205_v25  ;;  %3252 = vmatprep.mubr.f32.mxu1 %v4307_v34 }
  0xae   : > { %3240 = vmatprep.mubr.f32.mxu0 %v4211_v29 }
  0xb0   : > { %3253 = vmatmul.mubr.f32.gmra.mrb[20].mxu1 %v4325_v48 }
  0xb1   : > { %3241 = vmatmul.mubr.f32.gmra.mrb[4].mxu0 %v4229_v39  ;;  %3255 = vmatprep.mubr.f32.mxu1 %v1922_v59 }
  0xb2   : > { %3243 = vmatprep.mubr.f32.mxu0 %v4235_v43 }
  0xb4   : > { %3256 = vmatmul.mubr.f32.gmra.mrb[22].mxu1 %v1923_v62 }
  0xb5   : > { %3244 = vmatmul.mubr.f32.gmra.mrb[6].mxu0 %v4253_v53 }
 0x15b   : > { %v2956_v2 = vpop.f32.mrb[0].mxu1 }
 0x15c   : > { %v1036_v8 = vpop.f32.mrb[1].mxu1 }
 0x15f   : > { %v2959_v15 = vpop.f32.mrb[2].mxu1 }
 0x160   : > { %v4538_v17 = vpop.f32.mrb[3].mxu1 }
 0x163   : > { %v4540_v25 = vpop.f32.mrb[4].mxu1 }
 0x164   : > { %v4542_v29 = vpop.f32.mrb[5].mxu1 }
 0x167   : > { %v4544_v49 = vpop.f32.mrb[6].mxu1 }
 0x168   : > { %v4546_v54 = vpop.f32.mrb[7].mxu1 }
 0x16b   : > { %v2968_v39 = vpop.f32.mrb[8].mxu1 }
 0x16c   : > { %v3192_v58 = vpop.f32.mrb[8].mxu0  ;;  %v1076_v1 = vpop.f32.mrb[9].mxu1 }
 0x16d   : > { %v3570_v43 = vadd.f32 %v3192_v58, %v2968_v39  ;;  %v1853_v10 = vpop.f32.mrb[9].mxu0 }
 0x16e   : > { %v3572_v11 = vadd.f32 %v1853_v10, %v1076_v1 }
 0x16f   : > { %v2971_v53 = vpop.f32.mrb[10].mxu1 }
 0x170   : > { %v3195_v7 = vpop.f32.mrb[10].mxu0  ;;  %v1086_v19 = vpop.f32.mrb[11].mxu1 }
 0x171   : > { %v3574_v24 = vadd.f32 %v3195_v7, %v2971_v53  ;;  %v1863_v28 = vpop.f32.mrb[11].mxu0 }
 0x172   : > { %v3576_v34 = vadd.f32 %v1863_v28, %v1086_v19 }
 0x173   : > { %v2974_v42 = vpop.f32.mrb[12].mxu1 }
 0x174   : > { %v3198_v48 = vpop.f32.mrb[12].mxu0  ;;  %v1096_v23 = vpop.f32.mrb[13].mxu1 }
 0x175   : > { %v3578_v30 = vadd.f32 %v3198_v48, %v2974_v42  ;;  %v1873_v35 = vpop.f32.mrb[13].mxu0 }
 0x176   : > { %v4548_v37 = vadd.f32 %v1873_v35, %v1096_v23 }
 0x177   : > { %v2977_v38 = vpop.f32.mrb[14].mxu1 }
 0x178   : > { %v3201_v60 = vpop.f32.mrb[14].mxu0  ;;  %v1106_v4 = vpop.f32.mrb[15].mxu1 }
 0x179   : > { %v4550_v44 = vadd.f32 %v3201_v60, %v2977_v38  ;;  %v1883_v45 = vpop.f32.mrb[15].mxu0 }
 0x17a   : > { %v4552_v50 = vadd.f32 %v1883_v45, %v1106_v4 }
 0x17b   : > { %v3248_v56 = vpop.f32.mrb[16].mxu1 }
 0x17c   : > { %v3236_v31 = vpop.f32.mrb[0].mxu0  ;;  %v3571_v61 = vadd.f32 %v3570_v43, %v3248_v56  ;;  %v2047_v0 = vpop.f32.mrb[17].mxu1 }
 0x17d   : > { %v3562_v32 = vadd.f32 %v3236_v31, %v2956_v2  ;;  %v2007_v6 = vpop.f32.mrb[1].mxu0  ;;  %v3573_v12 = vadd.f32 %v3572_v11, %v2047_v0 }
 0x17e   : > { %v4567_v14 = vadd.f32 %v3571_v61, %v4557_v52  ;;  %v3563_v57 = vadd.f32 %v2007_v6, %v1036_v8 }
 0x17f   : > { %v2110_v18 = vadd.f32 %v3562_v32, %v4557_v52  ;;  %v4571_v20 = vadd.f32 %v3573_v12, %v4557_v52  ;;  %v3251_v63 = vpop.f32.mrb[18].mxu1 }
 0x180   : > { %2135 = vst.msk [vmem:[%s4564_s30 + $0x48] sm:$0xff] %vm2125_vm0, %v4567_v14  ;;  %v2109_v5 = vadd.f32 %v3563_v57, %v4557_v52  ;;  %v3239_v13 = vpop.f32.mrb[2].mxu0  ;;  %v3575_v3 = vadd.f32 %v3574_v24, %v3251_v63  ;;  %v2057_v9 = vpop.f32.mrb[19].mxu1 }
 0x181   : > { %2127 = vst.msk [vmem:[%s4564_s30 + $0x8] sm:$0xff] %vm2125_vm0, %v2110_v18  ;;  %v2143_v46 = vsel %vm2125_vm0, %v2110_v18, 0.0  ;;  %v2182_v16 = vmul.f32 %v2110_v18, %v2110_v18  ;;  %2134 = vst.msk [vmem:[%s4564_s30 + $0x40] sm:$0xff] %vm2125_vm0, %v4571_v20  ;;  %v2017_v22 = vpop.f32.mrb[3].mxu0  ;;  %v3564_v33 = vadd.f32 %v3239_v13, %v2959_v15  ;;  %v3577_v59 = vadd.f32 %v3576_v34, %v2057_v9 }
 0x182   : > { %2126 = vst.msk [vmem:[%s4564_s30] sm:$0xff] %vm2125_vm0, %v2109_v5  ;;  %v2142_v21 = vsel %vm2125_vm0, %v2109_v5, 0.0  ;;  %v2181_v26 = vmul.f32 %v2109_v5, %v2109_v5  ;;  %v4588_v47 = vadd.f32 %v3575_v3, %v4557_v52  ;;  %v3565_v41 = vadd.f32 %v2017_v22, %v4538_v17 }
 0x183   : > { %v2198_v27 = vsel %vm2125_vm0, %v2182_v16, 0.0  ;;  %v2144_v40 = vadd.f32 %v2143_v46, %v2142_v21  ;;  %v3254_v36 = vpop.f32.mrb[20].mxu1  ;;  %v2112_v55 = vadd.f32 %v3564_v33, %v4557_v52  ;;  %v4601_v1 = vadd.f32 %v3577_v59, %v4557_v52 }
 0x184   : > { %v2197_v51 = vsel %vm2125_vm0, %v2181_v26, 0.0  ;;  %v3242_v62 = vpop.f32.mrb[4].mxu0  ;;  %v2067_v2 = vpop.f32.mrb[21].mxu1  ;;  %2137 = vst.msk [vmem:[%s4564_s30 + $0x58] sm:$0xff] %vm2125_vm0, %v4588_v47  ;;  %v2111_v58 = vadd.f32 %v3565_v41, %v4557_v52  ;;  %v3579_v43 = vadd.f32 %v3578_v30, %v3254_v36  ;;  %v2189_v26 = vmul.f32 %v4571_v20, %v4571_v20 }
 0x185   : > { %v2199_v8 = vadd.f32 %v2198_v27, %v2197_v51  ;;  %v3566_v15 = vadd.f32 %v3242_v62, %v4540_v25  ;;  %v2027_v39 = vpop.f32.mrb[5].mxu0  ;;  %2129 = vst.msk [vmem:[%s4564_s30 + $0x18] sm:$0xff] %vm2125_vm0, %v2112_v55  ;;  %v2184_v53 = vmul.f32 %v2112_v55, %v2112_v55  ;;  %2136 = vst.msk [vmem:[%s4564_s30 + $0x50] sm:$0xff] %vm2125_vm0, %v4601_v1  ;;  %v2147_v28 = vsel %vm2125_vm0, %v2112_v55, 0.0 }
 0x186   : > { %v3567_v10 = vadd.f32 %v2027_v39, %v4542_v29  ;;  %2128 = vst.msk [vmem:[%s4564_s30 + $0x10] sm:$0xff] %vm2125_vm0, %v2111_v58  ;;  %v2145_v25 = vsel %vm2125_vm0, %v2111_v58, 0.0  ;;  %v2183_v7 = vmul.f32 %v2111_v58, %v2111_v58  ;;  %v4616_v48 = vadd.f32 %v3579_v43, %v4557_v52 }
 0x187   : > { %v2114_v17 = vadd.f32 %v3566_v15, %v4557_v52  ;;  %v3257_v11 = vpop.f32.mrb[22].mxu1  ;;  %v2146_v34 = vadd.f32 %v2145_v25, %v2144_v40  ;;  %v3581_v30 = vadd.f32 %v4548_v37, %v2067_v2  ;;  %v2202_v4 = vsel %vm2125_vm0, %v2184_v53, 0.0 }
 0x188   : > { %v3245_v19 = vpop.f32.mrb[6].mxu0  ;;  %v2077_v24 = vpop.f32.mrb[23].mxu1  ;;  %v2200_v42 = vsel %vm2125_vm0, %v2183_v7, 0.0  ;;  %v2113_v23 = vadd.f32 %v3567_v10, %v4557_v52  ;;  %2139 = vst.msk [vmem:[%s4564_s30 + $0x68] sm:$0xff] %vm2125_vm0, %v4616_v48  ;;  %v3583_v6 = vadd.f32 %v4550_v44, %v3257_v11  ;;  %v2190_v36 = vmul.f32 %v4567_v14, %v4567_v14 }
 0x189   : > { %2131 = vst.msk [vmem:[%s4564_s30 + $0x28] sm:$0xff] %vm2125_vm0, %v2114_v17  ;;  %v2037_v29 = vpop.f32.mrb[7].mxu0  ;;  %v2201_v35 = vadd.f32 %v2200_v42, %v2199_v8  ;;  %v2186_v38 = vmul.f32 %v2114_v17, %v2114_v17  ;;  %v2148_v60 = vadd.f32 %v2147_v28, %v2146_v34  ;;  %v2121_v0 = vadd.f32 %v3581_v30, %v4557_v52 }
 0x18a   : > { %2130 = vst.msk [vmem:[%s4564_s30 + $0x20] sm:$0xff] %vm2125_vm0, %v2113_v23  ;;  %v2149_v45 = vsel %vm2125_vm0, %v2113_v23, 0.0  ;;  %v2185_v56 = vmul.f32 %v2113_v23, %v2113_v23  ;;  %v3568_v37 = vadd.f32 %v3245_v19, %v4544_v49  ;;  %v3569_v12 = vadd.f32 %v2037_v29, %v4546_v54 }
 0x18b   : > { %v2150_v31 = vadd.f32 %v2149_v45, %v2148_v60  ;;  %v2203_v61 = vadd.f32 %v2202_v4, %v2201_v35  ;;  %v2151_v57 = vsel %vm2125_vm0, %v2114_v17, 0.0  ;;  %v2206_v18 = vsel %vm2125_vm0, %v2186_v38, 0.0  ;;  %2138 = vst.msk [vmem:[%s4564_s30 + $0x60] sm:$0xff] %vm2125_vm0, %v2121_v0 }
 0x18c   : > { %v2204_v32 = vsel %vm2125_vm0, %v2185_v56, 0.0  ;;  %v2116_v5 = vadd.f32 %v3568_v37, %v4557_v52  ;;  %v2124_v13 = vadd.f32 %v3583_v6, %v4557_v52  ;;  %v2115_v49 = vadd.f32 %v3569_v12, %v4557_v52 }
 0x18d   : > { %v2205_v63 = vadd.f32 %v2204_v32, %v2203_v61  ;;  %v2152_v3 = vadd.f32 %v2151_v57, %v2150_v31  ;;  %v3585_v9 = vadd.f32 %v4552_v50, %v2077_v24  ;;  %v2157_v51 = vsel %vm2125_vm0, %v4571_v20, 0.0 }
 0x18e   : > { %2133 = vst.msk [vmem:[%s4564_s30 + $0x38] sm:$0xff] %vm2125_vm0, %v2116_v5  ;;  %v2188_v44 = vmul.f32 %v2116_v5, %v2116_v5  ;;  %2141 = vst.msk [vmem:[%s4564_s30 + $0x78] sm:$0xff] %vm2125_vm0, %v2124_v13  ;;  %v2153_v46 = vsel %vm2125_vm0, %v2115_v49, 0.0  ;;  %v2187_v16 = vmul.f32 %v2115_v49, %v2115_v49  ;;  %v2155_v33 = vsel %vm2125_vm0, %v2116_v5, 0.0 }
 0x18f   : > { %v2207_v54 = vadd.f32 %v2206_v18, %v2205_v63  ;;  %2132 = vst.msk [vmem:[%s4564_s30 + $0x30] sm:$0xff] %vm2125_vm0, %v2115_v49  ;;  %v2154_v22 = vadd.f32 %v2153_v46, %v2152_v3  ;;  %v2123_v21 = vadd.f32 %v3585_v9, %v4557_v52  ;;  %v2159_v59 = vsel %vm2125_vm0, %v4567_v14, 0.0 }
 0x190   : > { %v2208_v50 = vsel %vm2125_vm0, %v2187_v16, 0.0  ;;  %v2210_v55 = vsel %vm2125_vm0, %v2188_v44, 0.0  ;;  %v2212_v62 = vsel %vm2125_vm0, %v2189_v26, 0.0  ;;  %v2191_v2 = vmul.f32 %v4601_v1, %v4601_v1 }
 0x191   : > { %v2156_v27 = vadd.f32 %v2155_v33, %v2154_v22  ;;  %v2209_v40 = vadd.f32 %v2208_v50, %v2207_v54  ;;  %2140 = vst.msk [vmem:[%s4564_s30 + $0x70] sm:$0xff] %vm2125_vm0, %v2123_v21  ;;  %v2214_v39 = vsel %vm2125_vm0, %v2190_v36, 0.0  ;;  %v2192_v58 = vmul.f32 %v4588_v47, %v4588_v47 }
 0x192   : > { %v2161_v20 = vsel %vm2125_vm0, %v4601_v1, 0.0  ;;  %v2163_v14 = vsel %vm2125_vm0, %v4588_v47, 0.0  ;;  %v2216_v10 = vsel %vm2125_vm0, %v2191_v2, 0.0  ;;  %v2193_v11 = vmul.f32 %v2121_v0, %v2121_v0 }
 0x193   : > { %v2158_v52 = vadd.f32 %v2157_v51, %v2156_v27  ;;  %v2211_v41 = vadd.f32 %v2210_v55, %v2209_v40  ;;  %v2218_v7 = vsel %vm2125_vm0, %v2192_v58, 0.0  ;;  %v2194_v19 = vmul.f32 %v4616_v48, %v4616_v48 }
 0x194   : > { %v2165_v24 = vsel %vm2125_vm0, %v2121_v0, 0.0  ;;  %v2167_v1 = vsel %vm2125_vm0, %v4616_v48, 0.0  ;;  %v2220_v29 = vsel %vm2125_vm0, %v2193_v11, 0.0  ;;  %v2195_v47 = vmul.f32 %v2123_v21, %v2123_v21 }
 0x195   : > { %v2160_v8 = vadd.f32 %v2159_v59, %v2158_v52  ;;  %v2213_v15 = vadd.f32 %v2212_v62, %v2211_v41  ;;  %v2222_v30 = vsel %vm2125_vm0, %v2194_v19, 0.0  ;;  %v2196_v35 = vmul.f32 %v2124_v13, %v2124_v13 }
 0x196   : > { %v2169_v38 = vsel %vm2125_vm0, %v2123_v21, 0.0  ;;  %v2171_v45 = vsel %vm2125_vm0, %v2124_v13, 0.0  ;;  %v2224_v56 = vsel %vm2125_vm0, %v2195_v47, 0.0 }
 0x197   : > { %v2215_v17 = vadd.f32 %v2214_v39, %v2213_v15  ;;  %v2162_v43 = vadd.f32 %v2161_v20, %v2160_v8  ;;  %v2226_v48 = vsel %vm2125_vm0, %v2196_v35, 0.0 }
 0x199   : > { %v2164_v53 = vadd.f32 %v2163_v14, %v2162_v43  ;;  %v2217_v25 = vadd.f32 %v2216_v10, %v2215_v17 }
 0x19b   : > { %v2166_v28 = vadd.f32 %v2165_v24, %v2164_v53  ;;  %v2219_v34 = vadd.f32 %v2218_v7, %v2217_v25 }
 0x19d   : > { %v2168_v42 = vadd.f32 %v2167_v1, %v2166_v28  ;;  %v2221_v23 = vadd.f32 %v2220_v29, %v2219_v34 }
 0x19f   : > { %v2170_v60 = vadd.f32 %v2169_v38, %v2168_v42  ;;  %v2223_v4 = vadd.f32 %v2222_v30, %v2221_v23 }
 0x1a1   : > { %v2172_v31 = vadd.f32 %v2171_v45, %v2170_v60  ;;  %v2225_v61 = vadd.f32 %v2224_v56, %v2223_v4 }
 0x1a3   : > { %v2173_v0 = vrot.slane %v2172_v31, 4  ;;  %v2227_v37 = vadd.f32 %v2226_v48, %v2225_v61 }
 0x1a5   : > { %v2174_v32 = vadd.f32 %v2173_v0, %v2172_v31  ;;  %v2228_v6 = vrot.slane %v2227_v37, 4 }
 0x1a7   : > { %v2175_v12 = vrot.slane %v2174_v32, 2  ;;  %v2229_v57 = vadd.f32 %v2228_v6, %v2227_v37 }
 0x1a9   : > { %v2176_v18 = vadd.f32 %v2175_v12, %v2174_v32  ;;  %v2230_v63 = vrot.slane %v2229_v57, 2 }
 0x1ab   : > { %v2177_v5 = vrot.slane %v2176_v18, 1  ;;  %v2231_v49 = vadd.f32 %v2230_v63, %v2229_v57 }
 0x1ad   : > { %v2178_v13 = vadd.f32 %v2177_v5, %v2176_v18  ;;  %v2232_v3 = vrot.slane %v2231_v49, 1 }
 0x1af   : > { %2180 = vst.msk [vmem:[%s262_s9] sm:$0x1] %vm2179_vm1, %v2178_v13  ;;  %v2233_v9 = vadd.f32 %v2232_v3, %v2231_v49 }
 0x1b1   : > { %2234 = vst.msk [vmem:[%s262_s9 + $0x1] sm:$0x1] %vm2179_vm1, %v2233_v9 }
 0x1b2 PF: > { %s17_s21 = sadd.s32 1, %s3706_s21  }
 0x1b3   : > { %p14_p4 = scmp.ge.s32.totalorder %s17_s21, 4  }
 0x1b5   :  { %16 = sbr.rel (!%p14_p4) target bundleno = 1 (0x1), region = 92 }

// kernel: up_forward.5
= control target key start
LH: loop header
LB: loop body
LE: loop exit
PB: predicated region body
PF: predicated region fallthrough
CT: control target
= control target key end

     0   :  { %s399_s12 = smov 0   ;;  %s439_s0 = inlined_call_operand.vmem [shape: f32[16,1024], index: 0, kind: input, shape index: {}]   ;;  %s440_s1 = inlined_call_operand.vmem [shape: f32[1,1024], index: 1, kind: input, shape index: {}]   ;;  %s441_s2 = inlined_call_operand.vmem [shape: f32[1,1024], index: 2, kind: input, shape index: {}]   ;;  %s442_s3 = inlined_call_operand.vmem [shape: f32[16,1024], index: 3, kind: output, shape index: {}]  }
   0x1 LB: > { %s350_s13 = sadd.s32 4294967295, %s377_s12   ;;  %p354_p0 = scmp.ge.s32.totalorder %s377_s12, 1  ;;  %s377_s12 = sphi %s399_s12, %s13_s12  }
   0x2   : > { %p137_p1 = scmp.lt.s32.totalorder %s377_s12, 3 }
   0x4   : > { %p138_p2 = pnand %p354_p0, %p137_p1 }
   0x5   : > { %p161_p3 = scmp.lt.s32.totalorder (!%p138_p2), %s350_s13, 1  ;;  %v181_v0 = vlaneseq (!%p138_p2)  ;;  %v179_v2 = vld [vmem:[%s440_s1] sm:$0xff] (!%p138_p2) }
   0x6   : > { %141 = sbr.rel (%p138_p2) target bundleno = 27 (0x1b), region = 32  ;;  %v229_v3 = vld [vmem:[%s441_s2] sm:$0xff] (!%p138_p2) }
   0x7   : > { %v182_v1 = vshrl.u32 (!%p138_p2), %v181_v0, 7 }
   0x9   : > { %v183_v4 = vsub.s32 (!%p138_p2), 0, %v182_v1  ;;  %v187_v5 = vsub.s32 (!%p138_p2), 1, %v182_v1  ;;  %v191_v6 = vsub.s32 (!%p138_p2), 2, %v182_v1  ;;  %v195_v7 = vsub.s32 (!%p138_p2), 3, %v182_v1 }
   0xa   : > { %v199_v8 = vsub.s32 (!%p138_p2), 4, %v182_v1  ;;  %v203_v9 = vsub.s32 (!%p138_p2), 5, %v182_v1  ;;  %v207_v10 = vsub.s32 (!%p138_p2), 6, %v182_v1  ;;  %v211_v11 = vsub.s32 (!%p138_p2), 7, %v182_v1 }
   0xb   : > { %v184_v13 = vrot.slane (!%p138_p2), %v179_v2, %v183_v4  ;;  %v234_v14 = vrot.slane (!%p138_p2), %v229_v3, %v183_v4  ;;  %v188_v16 = vrot.slane (!%p138_p2), %v179_v2, %v187_v5  ;;  %v238_v17 = vrot.slane (!%p138_p2), %v229_v3, %v187_v5 }
   0xc   : > { %v192_v19 = vrot.slane (!%p138_p2), %v179_v2, %v191_v6  ;;  %v242_v20 = vrot.slane (!%p138_p2), %v229_v3, %v191_v6  ;;  %v196_v22 = vrot.slane (!%p138_p2), %v179_v2, %v195_v7  ;;  %v246_v23 = vrot.slane (!%p138_p2), %v229_v3, %v195_v7 }
   0xd   : > { %s444_s13 = smov (!%p161_p3, %s350_s13), 1  ;;  %v200_v27 = vrot.slane %v179_v2, %v199_v8  ;;  %v250_v28 = vrot.slane %v229_v3, %v199_v8  ;;  %v204_v32 = vrot.slane %v179_v2, %v203_v9  ;;  %v254_v33 = vrot.slane %v229_v3, %v203_v9 }
   0xe   : > { %s361_s18 = sshll.u32 %s444_s13, 6  ;;  %v208_v38 = vrot.slane %v179_v2, %v207_v10  ;;  %v258_v42 = vrot.slane %v229_v3, %v207_v10  ;;  %v212_v51 = vrot.slane %v179_v2, %v211_v11  ;;  %v262_v54 = vrot.slane %v229_v3, %v211_v11 }
   0xf   : > { %s421_s21 = scalar_lea.vmem %s439_s0, %s361_s18  ;;  %s170_s24 = scalar_lea.vmem %s442_s3, %s361_s18 }
  0x10   : > { %v171_v12 = vld [vmem:[%s421_s21] sm:$0xff]  ;;  %v172_v15 = vld [vmem:[%s421_s21 + $0x8] sm:$0xff]  ;;  %v173_v18 = vld [vmem:[%s421_s21 + $0x10] sm:$0xff] }
  0x11   : > { %v174_v21 = vld [vmem:[%s421_s21 + $0x18] sm:$0xff]  ;;  %v175_v24 = vld [vmem:[%s421_s21 + $0x20] sm:$0xff]  ;;  %v221_v25 = vmul.f32 %v184_v13, %v171_v12  ;;  %v222_v26 = vmul.f32 %v188_v16, %v172_v15  ;;  %v176_v29 = vld [vmem:[%s421_s21 + $0x28] sm:$0xff]  ;;  %v223_v30 = vmul.f32 %v192_v19, %v173_v18 }
  0x12   : > { %v224_v31 = vmul.f32 %v196_v22, %v174_v21  ;;  %v177_v34 = vld [vmem:[%s421_s21 + $0x30] sm:$0xff]  ;;  %v225_v37 = vmul.f32 %v200_v27, %v175_v24  ;;  %v226_v41 = vmul.f32 %v204_v32, %v176_v29  ;;  %v178_v47 = vld [vmem:[%s421_s21 + $0x38] sm:$0xff] }
  0x13   : > { %v271_v35 = vadd.f32 %v234_v14, %v221_v25  ;;  %v272_v36 = vadd.f32 %v238_v17, %v222_v26  ;;  %v273_v39 = vadd.f32 %v242_v20, %v223_v30  ;;  %v227_v46 = vmul.f32 %v208_v38, %v177_v34 }
  0x14   : > { %v274_v40 = vadd.f32 %v246_v23, %v224_v31  ;;  %v275_v45 = vadd.f32 %v250_v28, %v225_v37  ;;  %v276_v50 = vadd.f32 %v254_v33, %v226_v41  ;;  %v228_v56 = vmul.f32 %v212_v51, %v178_v47 }
  0x15   : > { %v279_v43 = vmax.f32 %v271_v35, 0.0  ;;  %v280_v44 = vmax.f32 %v272_v36, 0.0  ;;  %v281_v48 = vmax.f32 %v273_v39, 0.0  ;;  %v277_v53 = vadd.f32 %v258_v42, %v227_v46 }
  0x16   : > { %v282_v49 = vmax.f32 %v274_v40, 0.0  ;;  %v283_v52 = vmax.f32 %v275_v45, 0.0  ;;  %v284_v55 = vmax.f32 %v276_v50, 0.0  ;;  %v278_v58 = vadd.f32 %v262_v54, %v228_v56 }
  0x17   : > { %287 = vst [vmem:[%s170_s24] sm:$0xff] %v279_v43  ;;  %288 = vst [vmem:[%s170_s24 + $0x8] sm:$0xff] %v280_v44  ;;  %v285_v57 = vmax.f32 %v277_v53, 0.0 }
  0x18   : > { %289 = vst [vmem:[%s170_s24 + $0x10] sm:$0xff] %v281_v48  ;;  %290 = vst [vmem:[%s170_s24 + $0x18] sm:$0xff] %v282_v49  ;;  %v286_v59 = vmax.f32 %v278_v58, 0.0 }
  0x19   : > { %291 = vst [vmem:[%s170_s24 + $0x20] sm:$0xff] %v283_v52  ;;  %292 = vst [vmem:[%s170_s24 + $0x28] sm:$0xff] %v284_v55 }
  0x1a   : > { %293 = vst [vmem:[%s170_s24 + $0x30] sm:$0xff] %v285_v57  ;;  %294 = vst [vmem:[%s170_s24 + $0x38] sm:$0xff] %v286_v59 }
  0x1b PF: > { %s13_s12 = sadd.s32 1, %s377_s12  }
  0x1c   : > { %p10_p4 = scmp.ge.s32.totalorder %s13_s12, 4  }
  0x1e   :  { %12 = sbr.rel (!%p10_p4) target bundleno = 1 (0x1), region = 62 }

</bundles_post_ra>
